<compile_context>
chip_gen: v7x
topology: tpu7x:2x2x1
jax: 0.10.0
libtpu: 0.0.40
codegen_flags: <defaults>
</compile_context>

<pallas_src>
import math
import functools

import jax
import jax.numpy as jnp
from jax.experimental import pallas as pl
from jax.experimental.pallas import tpu as pltpu


# ----------------------------------------------------------------------------
# Helpers
# ----------------------------------------------------------------------------

_LN_EPS = 1e-5          # PyTorch nn.LayerNorm default
_ROW_TILE_TARGET = 512  # measured ~85% of HBM roofline at 512-row tiles


def _layer_norm(z, gamma, beta):
    # z: [rows, D] f32 ; gamma/beta: [1, D] f32 ; biased variance
    mu = jnp.mean(z, axis=-1, keepdims=True)
    var = jnp.mean((z - mu) ** 2, axis=-1, keepdims=True)
    zn = (z - mu) * jax.lax.rsqrt(var + _LN_EPS)
    return zn * gamma + beta


def _row_tile(m, target=_ROW_TILE_TARGET):
    """Return (tile, padded_m). Full-block if m <= target, else pad to target."""
    if m <= target:
        return m, m
    mp = ((m + target - 1) // target) * target
    return target, mp


def _pad_rows(x, mp):
    m = x.shape[0]
    if mp == m:
        return x
    return jnp.pad(x, ((0, mp - m), (0, 0)))


def _nbytes(shape, dtype):
    n = 1
    for s in shape:
        n *= int(s)
    return n * jnp.dtype(dtype).itemsize


def _compiler_params(block_bytes):
    # Explicit scoped-VMEM budget: double-buffered blocks + headroom for
    # in-kernel intermediates, clamped to a sane range.
    limit = int(min(max(2 * block_bytes + (16 << 20), 32 << 20), 96 << 20))
    return pltpu.CompilerParams(dimension_semantics=("parallel",),
                                vmem_limit_bytes=limit)


# ----------------------------------------------------------------------------
# Pallas kernels
# ----------------------------------------------------------------------------

def _mha_batched(q, k, v, keep, num_heads, dk, scale):
    """q: [Sq, D] f32, k/v: [Skv, D] f32, keep: [Sq, Skv] (0/1). -> [Sq, D] f32."""
    sq = q.shape[0]
    skv = k.shape[0]
    # Head-batched views; scale folded into q before the bf16 cast.
    qh = (q * scale).astype(jnp.bfloat16).reshape(sq, num_heads, dk).swapaxes(0, 1)
    kh = k.astype(jnp.bfloat16).reshape(skv, num_heads, dk).swapaxes(0, 1)
    vh = v.astype(jnp.bfloat16).reshape(skv, num_heads, dk).swapaxes(0, 1)

    # QK^T for all heads in one batched MXU call: [H, Sq, Skv] f32
    s = jax.lax.dot_general(qh, kh, (((2,), (2,)), ((0,), (0,))),
                            preferred_element_type=jnp.float32)
    # masked_fill(mask == 0, -1e9), matching the PyTorch reference exactly.
    s = jnp.where(keep[None, :, :] == 0, jnp.float32(-1e9), s)
    s = s - jnp.max(s, axis=-1, keepdims=True)
    p = jnp.exp(s)
    p = p * (1.0 / jnp.sum(p, axis=-1, keepdims=True))

    # PV for all heads: [H, Sq, dk] f32
    o = jax.lax.dot_general(p.astype(jnp.bfloat16), vh, (((2,), (1,)), ((0,), (0,))),
                            preferred_element_type=jnp.float32)
    return o.swapaxes(0, 1).reshape(sq, num_heads * dk)   # lane-dense [Sq, D]


def _self_attn_kernel(x_ref, keep_ref, wqkv_ref, bqkv_ref, o_ref,
                      *, num_heads, d_model, scale):
    # Fused QKV projection + multi-head attention for one batch element.
    x = x_ref[0].astype(jnp.bfloat16)                             # [S, D]
    qkv = jnp.dot(x, wqkv_ref[...],
                  preferred_element_type=jnp.float32) + bqkv_ref[...]   # [S, 3D] f32
    q = qkv[:, :d_model]
    k = qkv[:, d_model:2 * d_model]
    v = qkv[:, 2 * d_model:]
    dk = d_model // num_heads
    o_ref[0] = _mha_batched(q, k, v, keep_ref[0], num_heads, dk, scale
                            ).astype(o_ref.dtype)


def _cross_attn_kernel(x_ref, enc_ref, keep_ref, wq_ref, bq_ref, wkv_ref, bkv_ref,
                       o_ref, *, num_heads, d_model, scale):
    # Fused Q and K|V projections + multi-head attention for one batch element.
    x = x_ref[0].astype(jnp.bfloat16)                             # [Sq, D]
    enc = enc_ref[0].astype(jnp.bfloat16)                         # [Skv, D]
    q = jnp.dot(x, wq_ref[...],
                preferred_element_type=jnp.float32) + bq_ref[...]        # [Sq, D]
    kv = jnp.dot(enc, wkv_ref[...],
                 preferred_element_type=jnp.float32) + bkv_ref[...]      # [Skv, 2D]
    k = kv[:, :d_model]
    v = kv[:, d_model:]
    dk = d_model // num_heads
    o_ref[0] = _mha_batched(q, k, v, keep_ref[0], num_heads, dk, scale
                            ).astype(o_ref.dtype)


def _proj_add_norm_kernel(a_ref, w_ref, b_ref, res_ref, g_ref, beta_ref, o_ref):
    # LayerNorm(res + a @ w + b)  -- fused output-projection epilogue
    proj = jnp.dot(a_ref[...].astype(jnp.bfloat16), w_ref[...],
                   preferred_element_type=jnp.float32) + b_ref[...]
    z = res_ref[...].astype(jnp.float32) + proj
    o_ref[...] = _layer_norm(z, g_ref[...], beta_ref[...]).astype(o_ref.dtype)


def _ffn_add_norm_kernel(x_ref, w1_ref, b1_ref, w2_ref, b2_ref, g_ref, beta_ref,
                         o_ref):
    # LayerNorm(x + fc2(relu(fc1(x))))  -- fused FFN + residual + norm
    x = x_ref[...].astype(jnp.float32)
    h = jnp.dot(x.astype(jnp.bfloat16), w1_ref[...],
                preferred_element_type=jnp.float32) + b1_ref[...]
    h = jnp.maximum(h, 0.0).astype(jnp.bfloat16)   # f32 copy dies right after ReLU
    y = jnp.dot(h, w2_ref[...],
                preferred_element_type=jnp.float32) + b2_ref[...]
    z = x + y
    o_ref[...] = _layer_norm(z, g_ref[...], beta_ref[...]).astype(o_ref.dtype)


# ----------------------------------------------------------------------------
# Wrappers (pallas_call glue)
# ----------------------------------------------------------------------------

def self_attention(x, keep, w_qkv, b_qkv, num_heads):
    # x: [B, S, D] f32, keep: [B, S, S] bf16 (0/1). Output bf16 (fed to bf16 MXU).
    B, S, D = x.shape
    scale = 1.0 / math.sqrt(D // num_heads)
    kernel = functools.partial(_self_attn_kernel, num_heads=num_heads,
                               d_model=D, scale=scale)
    blocks = [((1, S, D), x.dtype), ((1, S, S), keep.dtype),
              (w_qkv.shape, w_qkv.dtype), (b_qkv.shape, b_qkv.dtype),
              ((1, S, D), jnp.bfloat16)]
    return pl.pallas_call(
        kernel,
        out_shape=jax.ShapeDtypeStruct((B, S, D), jnp.bfloat16),
        grid=(B,),
        in_specs=[
            pl.BlockSpec((1, S, D), lambda b: (b, 0, 0)),
            pl.BlockSpec((1, S, S), lambda b: (b, 0, 0)),
            pl.BlockSpec(w_qkv.shape, lambda b: (0, 0)),
            pl.BlockSpec(b_qkv.shape, lambda b: (0, 0)),
        ],
        out_specs=pl.BlockSpec((1, S, D), lambda b: (b, 0, 0)),
        compiler_params=_compiler_params(sum(_nbytes(s, d) for s, d in blocks)),
    )(x, keep, w_qkv, b_qkv)


def cross_attention(x, enc, keep, wq, bq, w_kv, b_kv, num_heads):
    # x: [B, Sq, D] f32, enc: [B, Skv, D] f32, keep: [B, Sq, Skv] bf16 (0/1).
    B, Sq, D = x.shape
    Skv = enc.shape[1]
    scale = 1.0 / math.sqrt(D // num_heads)
    kernel = functools.partial(_cross_attn_kernel, num_heads=num_heads,
                               d_model=D, scale=scale)
    blocks = [((1, Sq, D), x.dtype), ((1, Skv, D), enc.dtype),
              ((1, Sq, Skv), keep.dtype), (wq.shape, wq.dtype),
              (bq.shape, bq.dtype), (w_kv.shape, w_kv.dtype),
              (b_kv.shape, b_kv.dtype), ((1, Sq, D), jnp.bfloat16)]
    return pl.pallas_call(
        kernel,
        out_shape=jax.ShapeDtypeStruct((B, Sq, D), jnp.bfloat16),
        grid=(B,),
        in_specs=[
            pl.BlockSpec((1, Sq, D), lambda b: (b, 0, 0)),
            pl.BlockSpec((1, Skv, D), lambda b: (b, 0, 0)),
            pl.BlockSpec((1, Sq, Skv), lambda b: (b, 0, 0)),
            pl.BlockSpec(wq.shape, lambda b: (0, 0)),
            pl.BlockSpec(bq.shape, lambda b: (0, 0)),
            pl.BlockSpec(w_kv.shape, lambda b: (0, 0)),
            pl.BlockSpec(b_kv.shape, lambda b: (0, 0)),
        ],
        out_specs=pl.BlockSpec((1, Sq, D), lambda b: (b, 0, 0)),
        compiler_params=_compiler_params(sum(_nbytes(s, d) for s, d in blocks)),
    )(x, enc, keep, wq, bq, w_kv, b_kv)


def proj_add_norm(a2d, w, b, res2d, gamma, beta):
    # out = LayerNorm(res + a @ w + b), row-tiled (weights resident).
    M, D = res2d.shape
    Din = a2d.shape[1]
    tm, Mp = _row_tile(M)
    a_p = _pad_rows(a2d, Mp)
    r_p = _pad_rows(res2d, Mp)
    blocks = [((tm, Din), a2d.dtype), (w.shape, w.dtype), (b.shape, b.dtype),
              ((tm, D), res2d.dtype), (gamma.shape, gamma.dtype),
              (beta.shape, beta.dtype), ((tm, D), jnp.float32)]
    out = pl.pallas_call(
        _proj_add_norm_kernel,
        out_shape=jax.ShapeDtypeStruct((Mp, D), jnp.float32),
        grid=(Mp // tm,),
        in_specs=[
            pl.BlockSpec((tm, Din), lambda i: (i, 0)),
            pl.BlockSpec(w.shape, lambda i: (0, 0)),
            pl.BlockSpec(b.shape, lambda i: (0, 0)),
            pl.BlockSpec((tm, D), lambda i: (i, 0)),
            pl.BlockSpec(gamma.shape, lambda i: (0, 0)),
            pl.BlockSpec(beta.shape, lambda i: (0, 0)),
        ],
        out_specs=pl.BlockSpec((tm, D), lambda i: (i, 0)),
        compiler_params=_compiler_params(sum(_nbytes(s, d) for s, d in blocks)),
    )(a_p, w, b, r_p, gamma, beta)
    return out[:M] if Mp != M else out


def ffn_add_norm(x2d, w1, b1, w2, b2, gamma, beta):
    # out = LayerNorm(x + fc2(relu(fc1(x)))), row-tiled (weights resident).
    M, D = x2d.shape
    Dff = w1.shape[1]
    tm, Mp = _row_tile(M)
    x_p = _pad_rows(x2d, Mp)
    blocks = [((tm, D), x2d.dtype), (w1.shape, w1.dtype), (b1.shape, b1.dtype),
              (w2.shape, w2.dtype), (b2.shape, b2.dtype),
              (gamma.shape, gamma.dtype), (beta.shape, beta.dtype),
              ((tm, D), jnp.float32)]
    out = pl.pallas_call(
        _ffn_add_norm_kernel,
        out_shape=jax.ShapeDtypeStruct((Mp, D), jnp.float32),
        grid=(Mp // tm,),
        in_specs=[
            pl.BlockSpec((tm, D), lambda i: (i, 0)),
            pl.BlockSpec(w1.shape, lambda i: (0, 0)),
            pl.BlockSpec(b1.shape, lambda i: (0, 0)),
            pl.BlockSpec(w2.shape, lambda i: (0, 0)),
            pl.BlockSpec(b2.shape, lambda i: (0, 0)),
            pl.BlockSpec(gamma.shape, lambda i: (0, 0)),
            pl.BlockSpec(beta.shape, lambda i: (0, 0)),
        ],
        out_specs=pl.BlockSpec((tm, D), lambda i: (i, 0)),
        compiler_params=_compiler_params(sum(_nbytes(s, d) for s, d in blocks)),
    )(x_p, w1, b1, w2, b2, gamma, beta)
    return out[:M] if Mp != M else out


# ----------------------------------------------------------------------------
# Decoder layer forward
# ----------------------------------------------------------------------------

def decoder_layer(x, enc_output, src_mask, tgt_mask, params, num_heads):
    B, S, D = x.shape
    x2d = x.reshape(B * S, D)

    # masks -> compact 0/1 bf16 "keep" tensors; masked_fill happens in-kernel.
    tgt_keep = (tgt_mask != 0).astype(jnp.bfloat16)
    src_keep = (src_mask != 0).astype(jnp.bfloat16)

    # --- self-attention (QKV fused in-kernel) + fused out-proj/add/norm ---
    sp = params["self_attn"]
    attn = self_attention(x, tgt_keep, sp["w_qkv"], sp["b_qkv"], num_heads)  # bf16
    x2d = proj_add_norm(attn.reshape(B * S, D), sp["wo"], sp["bo"],
                        x2d, params["ln1_g"], params["ln1_b"])

    # --- cross-attention (Q and K|V fused in-kernel) + fused out-proj/add/norm ---
    cp = params["cross_attn"]
    attn = cross_attention(x2d.reshape(B, S, D), enc_output, src_keep,
                           cp["wq"], cp["bq"], cp["w_kv"], cp["b_kv"], num_heads)
    x2d = proj_add_norm(attn.reshape(B * S, D), cp["wo"], cp["bo"],
                        x2d, params["ln2_g"], params["ln2_b"])

    # --- position-wise feed-forward + fused add/norm ---
    x2d = ffn_add_norm(x2d, params["w1"], params["b1"], params["w2"], params["b2"],
                       params["ln3_g"], params["ln3_b"])
    return x2d.reshape(B, S, D)


# ----------------------------------------------------------------------------
# Deterministic parameter init (PyTorch nn.Linear-style uniform bounds)
# ----------------------------------------------------------------------------

def _init_linear(key, fan_in, fan_out):
    kw, kb = jax.random.split(key)
    bound = 1.0 / math.sqrt(fan_in)
    # stored as [in, out] so kernels compute x @ W + b (== PyTorch x @ W.T + b)
    w = jax.random.uniform(kw, (fan_in, fan_out), jnp.float32, -bound, bound)
    b = jax.random.uniform(kb, (1, fan_out), jnp.float32, -bound, bound)
    return w, b


def init_params(key, d_model, d_ff):
    keys = jax.random.split(key, 10)

    def mha_self(ks):
        wq, bq = _init_linear(ks[0], d_model, d_model)
        wk, bk = _init_linear(ks[1], d_model, d_model)
        wv, bv = _init_linear(ks[2], d_model, d_model)
        wo, bo = _init_linear(ks[3], d_model, d_model)
        return dict(
            w_qkv=jnp.concatenate([wq, wk, wv], axis=1).astype(jnp.bfloat16),
            b_qkv=jnp.concatenate([bq, bk, bv], axis=1),
            wo=wo.astype(jnp.bfloat16), bo=bo)

    def mha_cross(ks):
        wq, bq = _init_linear(ks[0], d_model, d_model)
        wk, bk = _init_linear(ks[1], d_model, d_model)
        wv, bv = _init_linear(ks[2], d_model, d_model)
        wo, bo = _init_linear(ks[3], d_model, d_model)
        return dict(
            wq=wq.astype(jnp.bfloat16), bq=bq,
            w_kv=jnp.concatenate([wk, wv], axis=1).astype(jnp.bfloat16),
            b_kv=jnp.concatenate([bk, bv], axis=1),
            wo=wo.astype(jnp.bfloat16), bo=bo)

    params = dict(
        self_attn=mha_self(keys[0:4]),
        cross_attn=mha_cross(keys[4:8]),
        ln1_g=jnp.ones((1, d_model), jnp.float32),
        ln1_b=jnp.zeros((1, d_model), jnp.float32),
        ln2_g=jnp.ones((1, d_model), jnp.float32),
        ln2_b=jnp.zeros((1, d_model), jnp.float32),
        ln3_g=jnp.ones((1, d_model), jnp.float32),
        ln3_b=jnp.zeros((1, d_model), jnp.float32),
    )
    w1, b1 = _init_linear(keys[8], d_model, d_ff)
    w2, b2 = _init_linear(keys[9], d_ff, d_model)
    params["w1"], params["b1"] = w1.astype(jnp.bfloat16), b1
    params["w2"], params["b2"] = w2.astype(jnp.bfloat16), b2
    return params


# ----------------------------------------------------------------------------
# Main
# ----------------------------------------------------------------------------

if __name__ == "__main__":
    # small shapes consistent with the module (scaled down from 512/8/2048)
    B, S_tgt, S_src = 2, 16, 16
    D_MODEL, NUM_HEADS, D_FF = 128, 4, 256

    key = jax.random.PRNGKey(0)
    k_x, k_enc, k_p = jax.random.split(key, 3)

    x = jax.random.normal(k_x, (B, S_tgt, D_MODEL), jnp.float32)
    enc_output = jax.random.normal(k_enc, (B, S_src, D_MODEL), jnp.float32)

    # tgt_mask: causal [B, S_tgt, S_tgt]; src_mask: all ones [B, S_tgt, S_src]
    causal = jnp.tril(jnp.ones((S_tgt, S_tgt), jnp.int32))
    tgt_mask = jnp.broadcast_to(causal[None], (B, S_tgt, S_tgt))
    src_mask = jnp.ones((B, S_tgt, S_src), jnp.int32)

    params = init_params(k_p, D_MODEL, D_FF)

    decoder = jax.jit(decoder_layer, static_argnames=("num_heads",))
    out = decoder(x, enc_output, src_mask, tgt_mask, params, num_heads=NUM_HEADS)
    out = jax.block_until_ready(out)

    assert out.shape == (B, S_tgt, D_MODEL)
    assert bool(jnp.all(jnp.isfinite(out)))
    print("KERNEL_OK")
</pallas_src>

<mosaic_0001>
module attributes {stable_mosaic.version = 11 : i64} {
  func.func @_self_attn_kernel(%arg0: i32, %arg1: memref<1x16x128xf32, #tpu.memory_space<vmem>>, %arg2: memref<1x16x16xbf16, #tpu.memory_space<vmem>>, %arg3: memref<128x384xbf16, #tpu.memory_space<vmem>>, %arg4: memref<1x384xf32, #tpu.memory_space<vmem>>, %arg5: memref<1x16x128xbf16, #tpu.memory_space<vmem>>) attributes {dimension_semantics = [#tpu.dimension_semantics<parallel>], iteration_bounds = array<i64: 2>, scalar_prefetch = 0 : i64, scratch_operands = 0 : i64, tpu.core_type = #tpu.core_type<tc>, window_params = [{transform_indices = @transform_0, window_bounds = array<i64: 1, 16, 128>}, {transform_indices = @transform_1, window_bounds = array<i64: 1, 16, 16>}, {pipeline_mode = #tpu.pipeline_mode<synchronous>, transform_indices = @transform_2, window_bounds = array<i64: 128, 384>}, {pipeline_mode = #tpu.pipeline_mode<synchronous>, transform_indices = @transform_3, window_bounds = array<i64: 1, 384>}, {transform_indices = @transform_4, window_bounds = array<i64: 1, 16, 128>}]} {
    %c0 = arith.constant 0 : index
    %c0_0 = arith.constant 0 : index
    %c0_1 = arith.constant 0 : index
    %0 = vector.load %arg1[%c0, %c0_0, %c0_1] : memref<1x16x128xf32, #tpu.memory_space<vmem>>, vector<1x16x128xf32>
    %1 = vector.shape_cast %0 : vector<1x16x128xf32> to vector<16x128xf32>
    %2 = arith.truncf %1 : vector<16x128xf32> to vector<16x128xbf16>
    %c0_2 = arith.constant 0 : index
    %c0_3 = arith.constant 0 : index
    %3 = vector.load %arg3[%c0_2, %c0_3] : memref<128x384xbf16, #tpu.memory_space<vmem>>, vector<128x384xbf16>
    %cst = arith.constant dense<0.000000e+00> : vector<16x384xf32>
    %4 = tpu.matmul %2, %3, %cst {dimension_numbers = #tpu.dot_dimension_numbers<[1], [0], [0], [1], [0, 0, 1, 1], [], []>} : vector<16x128xbf16>, vector<128x384xbf16>, vector<16x384xf32> -> vector<16x384xf32>
    %c0_4 = arith.constant 0 : index
    %c0_5 = arith.constant 0 : index
    %5 = vector.load %arg4[%c0_4, %c0_5] : memref<1x384xf32, #tpu.memory_space<vmem>>, vector<1x384xf32>
    %6 = vector.broadcast %5 : vector<1x384xf32> to vector<16x384xf32>
    %7 = arith.addf %4, %6 : vector<16x384xf32>
    %8 = vector.extract_strided_slice %7 {offsets = [0, 0], sizes = [16, 128], strides = [1, 1]} : vector<16x384xf32> to vector<16x128xf32>
    %9 = vector.extract_strided_slice %7 {offsets = [0, 128], sizes = [16, 128], strides = [1, 1]} : vector<16x384xf32> to vector<16x128xf32>
    %10 = vector.extract_strided_slice %7 {offsets = [0, 256], sizes = [16, 128], strides = [1, 1]} : vector<16x384xf32> to vector<16x128xf32>
    %c0_6 = arith.constant 0 : index
    %c0_7 = arith.constant 0 : index
    %c0_8 = arith.constant 0 : index
    %11 = vector.load %arg2[%c0_6, %c0_7, %c0_8] : memref<1x16x16xbf16, #tpu.memory_space<vmem>>, vector<1x16x16xbf16>
    %12 = vector.shape_cast %11 : vector<1x16x16xbf16> to vector<16x16xbf16>
    %cst_9 = arith.constant 0.176776692 : f32
    %13 = vector.broadcast %cst_9 : f32 to vector<16x128xf32>
    %14 = arith.mulf %8, %13 : vector<16x128xf32>
    %15 = arith.truncf %14 : vector<16x128xf32> to vector<16x128xbf16>
    %16 = vector.shape_cast %15 : vector<16x128xbf16> to vector<16x4x32xbf16>
    %17 = tpu.transpose %16, [1, 0, 2] : vector<16x4x32xbf16> -> vector<4x16x32xbf16>
    %18 = arith.truncf %9 : vector<16x128xf32> to vector<16x128xbf16>
    %19 = vector.shape_cast %18 : vector<16x128xbf16> to vector<16x4x32xbf16>
    %20 = tpu.transpose %19, [1, 0, 2] : vector<16x4x32xbf16> -> vector<4x16x32xbf16>
    %21 = arith.truncf %10 : vector<16x128xf32> to vector<16x128xbf16>
    %22 = vector.shape_cast %21 : vector<16x128xbf16> to vector<16x4x32xbf16>
    %23 = tpu.transpose %22, [1, 0, 2] : vector<16x4x32xbf16> -> vector<4x16x32xbf16>
    %cst_10 = arith.constant dense<0.000000e+00> : vector<4x16x16xf32>
    %24 = tpu.matmul %17, %20, %cst_10 {dimension_numbers = #tpu.dot_dimension_numbers<[2], [2], [1], [1], [0, 0, 0, 1, 1, 1], [0], [0]>} : vector<4x16x32xbf16>, vector<4x16x32xbf16>, vector<4x16x16xf32> -> vector<4x16x16xf32>
    %25 = vector.shape_cast %12 : vector<16x16xbf16> to vector<1x16x16xbf16>
    %cst_11 = arith.constant 0.000000e+00 : bf16
    %26 = vector.broadcast %cst_11 : bf16 to vector<1x16x16xbf16>
    %27 = arith.cmpf oeq, %25, %26 : vector<1x16x16xbf16>
    %cst_12 = arith.constant -1.000000e+09 : f32
    %28 = vector.shape_cast %27 : vector<1x16x16xi1> to vector<1x16x16xi1>
    %29 = vector.broadcast %28 : vector<1x16x16xi1> to vector<4x16x16xi1>
    %30 = vector.broadcast %cst_12 : f32 to vector<4x16x16xf32>
    %31 = arith.select %29, %30, %24 : vector<4x16x16xi1>, vector<4x16x16xf32>
    %cst_13 = arith.constant dense<0xFF800000> : vector<4x16xf32>
    %32 = vector.multi_reduction <maximumf>, %31, %cst_13 [2] : vector<4x16x16xf32> to vector<4x16xf32>
    %33 = vector.shape_cast %32 : vector<4x16xf32> to vector<4x16x1xf32>
    %34 = vector.broadcast %33 : vector<4x16x1xf32> to vector<4x16x16xf32>
    %35 = arith.subf %31, %34 : vector<4x16x16xf32>
    %36 = math.exp %35 : vector<4x16x16xf32>
    %cst_14 = arith.constant dense<0.000000e+00> : vector<4x16xf32>
    %37 = vector.multi_reduction <add>, %36, %cst_14 [2] : vector<4x16x16xf32> to vector<4x16xf32>
    %38 = vector.shape_cast %37 : vector<4x16xf32> to vector<4x16x1xf32>
    %cst_15 = arith.constant 1.000000e+00 : f32
    %39 = vector.broadcast %cst_15 : f32 to vector<4x16x1xf32>
    %40 = arith.divf %39, %38 : vector<4x16x1xf32>
    %41 = vector.broadcast %40 : vector<4x16x1xf32> to vector<4x16x16xf32>
    %42 = arith.mulf %36, %41 : vector<4x16x16xf32>
    %43 = arith.truncf %42 : vector<4x16x16xf32> to vector<4x16x16xbf16>
    %cst_16 = arith.constant dense<0.000000e+00> : vector<4x16x32xf32>
    %44 = tpu.matmul %43, %23, %cst_16 {dimension_numbers = #tpu.dot_dimension_numbers<[2], [1], [1], [2], [0, 0, 0, 1, 1, 2], [0], [0]>} : vector<4x16x16xbf16>, vector<4x16x32xbf16>, vector<4x16x32xf32> -> vector<4x16x32xf32>
    %45 = tpu.transpose %44, [1, 0, 2] : vector<4x16x32xf32> -> vector<16x4x32xf32>
    %46 = vector.shape_cast %45 : vector<16x4x32xf32> to vector<16x128xf32>
    %47 = arith.truncf %46 : vector<16x128xf32> to vector<16x128xbf16>
    %c0_17 = arith.constant 0 : index
    %c0_18 = arith.constant 0 : index
    %c0_19 = arith.constant 0 : index
    %48 = vector.load %arg5[%c0_17, %c0_18, %c0_19] : memref<1x16x128xbf16, #tpu.memory_space<vmem>>, vector<1x16x128xbf16>
    %49 = vector.shape_cast %48 : vector<1x16x128xbf16> to vector<16x128xbf16>
    %50 = vector.shape_cast %47 : vector<16x128xbf16> to vector<1x16x128xbf16>
    tpu.vector_store %arg5[%c0_17, %c0_18, %c0_19], %50 {strides = array<i32>} : memref<1x16x128xbf16, #tpu.memory_space<vmem>>, vector<1x16x128xbf16>,
    return
  }
  func.func @transform_0(%arg0: i32) -> (i32, i32, i32) {
    %c0_i32 = arith.constant 0 : i32
    %c0_i32_0 = arith.constant 0 : i32
    %c0_i32_1 = arith.constant 0 : i32
    return %arg0, %c0_i32, %c0_i32_0 : i32, i32, i32
  }
  func.func @transform_1(%arg0: i32) -> (i32, i32, i32) {
    %c0_i32 = arith.constant 0 : i32
    %c0_i32_0 = arith.constant 0 : i32
    %c0_i32_1 = arith.constant 0 : i32
    return %arg0, %c0_i32, %c0_i32_0 : i32, i32, i32
  }
  func.func @transform_2(%arg0: i32) -> (i32, i32) {
    %c0_i32 = arith.constant 0 : i32
    %c0_i32_0 = arith.constant 0 : i32
    %c0_i32_1 = arith.constant 0 : i32
    return %c0_i32, %c0_i32_0 : i32, i32
  }
  func.func @transform_3(%arg0: i32) -> (i32, i32) {
    %c0_i32 = arith.constant 0 : i32
    %c0_i32_0 = arith.constant 0 : i32
    %c0_i32_1 = arith.constant 0 : i32
    return %c0_i32, %c0_i32_0 : i32, i32
  }
  func.func @transform_4(%arg0: i32) -> (i32, i32, i32) {
    %c0_i32 = arith.constant 0 : i32
    %c0_i32_0 = arith.constant 0 : i32
    %c0_i32_1 = arith.constant 0 : i32
    return %arg0, %c0_i32, %c0_i32_0 : i32, i32, i32
  }
}

module attributes {stable_mosaic.version = 11 : i64} {
  func.func @_proj_add_norm_kernel(%arg0: i32, %arg1: memref<32x128xbf16, #tpu.memory_space<vmem>>, %arg2: memref<128x128xbf16, #tpu.memory_space<vmem>>, %arg3: memref<1x128xf32, #tpu.memory_space<vmem>>, %arg4: memref<32x128xf32, #tpu.memory_space<vmem>>, %arg5: memref<1x128xf32, #tpu.memory_space<vmem>>, %arg6: memref<1x128xf32, #tpu.memory_space<vmem>>, %arg7: memref<32x128xf32, #tpu.memory_space<vmem>>) attributes {dimension_semantics = [#tpu.dimension_semantics<parallel>], iteration_bounds = array<i64: 1>, scalar_prefetch = 0 : i64, scratch_operands = 0 : i64, tpu.core_type = #tpu.core_type<tc>, window_params = [{transform_indices = @transform_0, window_bounds = array<i64: 32, 128>}, {pipeline_mode = #tpu.pipeline_mode<synchronous>, transform_indices = @transform_1, window_bounds = array<i64: 128, 128>}, {pipeline_mode = #tpu.pipeline_mode<synchronous>, transform_indices = @transform_2, window_bounds = array<i64: 1, 128>}, {transform_indices = @transform_3, window_bounds = array<i64: 32, 128>}, {pipeline_mode = #tpu.pipeline_mode<synchronous>, transform_indices = @transform_4, window_bounds = array<i64: 1, 128>}, {pipeline_mode = #tpu.pipeline_mode<synchronous>, transform_indices = @transform_5, window_bounds = array<i64: 1, 128>}, {transform_indices = @transform_6, window_bounds = array<i64: 32, 128>}]} {
    %c0 = arith.constant 0 : index
    %c0_0 = arith.constant 0 : index
    %0 = vector.load %arg1[%c0, %c0_0] : memref<32x128xbf16, #tpu.memory_space<vmem>>, vector<32x128xbf16>
    %c0_1 = arith.constant 0 : index
    %c0_2 = arith.constant 0 : index
    %1 = vector.load %arg2[%c0_1, %c0_2] : memref<128x128xbf16, #tpu.memory_space<vmem>>, vector<128x128xbf16>
    %cst = arith.constant dense<0.000000e+00> : vector<32x128xf32>
    %2 = tpu.matmul %0, %1, %cst {dimension_numbers = #tpu.dot_dimension_numbers<[1], [0], [0], [1], [0, 0, 1, 1], [], []>} : vector<32x128xbf16>, vector<128x128xbf16>, vector<32x128xf32> -> vector<32x128xf32>
    %c0_3 = arith.constant 0 : index
    %c0_4 = arith.constant 0 : index
    %3 = vector.load %arg3[%c0_3, %c0_4] : memref<1x128xf32, #tpu.memory_space<vmem>>, vector<1x128xf32>
    %4 = vector.broadcast %3 : vector<1x128xf32> to vector<32x128xf32>
    %5 = arith.addf %2, %4 : vector<32x128xf32>
    %c0_5 = arith.constant 0 : index
    %c0_6 = arith.constant 0 : index
    %6 = vector.load %arg4[%c0_5, %c0_6] : memref<32x128xf32, #tpu.memory_space<vmem>>, vector<32x128xf32>
    %7 = arith.addf %6, %5 : vector<32x128xf32>
    %c0_7 = arith.constant 0 : index
    %c0_8 = arith.constant 0 : index
    %8 = vector.load %arg5[%c0_7, %c0_8] : memref<1x128xf32, #tpu.memory_space<vmem>>, vector<1x128xf32>
    %c0_9 = arith.constant 0 : index
    %c0_10 = arith.constant 0 : index
    %9 = vector.load %arg6[%c0_9, %c0_10] : memref<1x128xf32, #tpu.memory_space<vmem>>, vector<1x128xf32>
    %cst_11 = arith.constant dense<0.000000e+00> : vector<32xf32>
    %10 = vector.multi_reduction <add>, %7, %cst_11 [1] : vector<32x128xf32> to vector<32xf32>
    %11 = vector.shape_cast %10 : vector<32xf32> to vector<32x1xf32>
    %cst_12 = arith.constant 1.280000e+02 : f32
    %12 = vector.broadcast %cst_12 : f32 to vector<32x1xf32>
    %13 = arith.divf %11, %12 : vector<32x1xf32>
    %14 = vector.broadcast %13 : vector<32x1xf32> to vector<32x128xf32>
    %15 = arith.subf %7, %14 : vector<32x128xf32>
    %16 = arith.mulf %15, %15 : vector<32x128xf32>
    %cst_13 = arith.constant dense<0.000000e+00> : vector<32xf32>
    %17 = vector.multi_reduction <add>, %16, %cst_13 [1] : vector<32x128xf32> to vector<32xf32>
    %18 = vector.shape_cast %17 : vector<32xf32> to vector<32x1xf32>
    %cst_14 = arith.constant 1.280000e+02 : f32
    %19 = vector.broadcast %cst_14 : f32 to vector<32x1xf32>
    %20 = arith.divf %18, %19 : vector<32x1xf32>
    %21 = vector.broadcast %13 : vector<32x1xf32> to vector<32x128xf32>
    %22 = arith.subf %7, %21 : vector<32x128xf32>
    %cst_15 = arith.constant 9.99999974E-6 : f32
    %23 = vector.broadcast %cst_15 : f32 to vector<32x1xf32>
    %24 = arith.addf %20, %23 : vector<32x1xf32>
    %25 = math.rsqrt %24 : vector<32x1xf32>
    %26 = vector.broadcast %25 : vector<32x1xf32> to vector<32x128xf32>
    %27 = arith.mulf %22, %26 : vector<32x128xf32>
    %28 = vector.broadcast %8 : vector<1x128xf32> to vector<32x128xf32>
    %29 = arith.mulf %27, %28 : vector<32x128xf32>
    %30 = vector.broadcast %9 : vector<1x128xf32> to vector<32x128xf32>
    %31 = arith.addf %29, %30 : vector<32x128xf32>
    %c0_16 = arith.constant 0 : index
    %c0_17 = arith.constant 0 : index
    %32 = vector.load %arg7[%c0_16, %c0_17] : memref<32x128xf32, #tpu.memory_space<vmem>>, vector<32x128xf32>
    tpu.vector_store %arg7[%c0_16, %c0_17], %31 {strides = array<i32>} : memref<32x128xf32, #tpu.memory_space<vmem>>, vector<32x128xf32>,
    return
  }
  func.func @transform_0(%arg0: i32) -> (i32, i32) {
    %c0_i32 = arith.constant 0 : i32
    %c0_i32_0 = arith.constant 0 : i32
    return %arg0, %c0_i32 : i32, i32
  }
  func.func @transform_1(%arg0: i32) -> (i32, i32) {
    %c0_i32 = arith.constant 0 : i32
    %c0_i32_0 = arith.constant 0 : i32
    %c0_i32_1 = arith.constant 0 : i32
    return %c0_i32, %c0_i32_0 : i32, i32
  }
  func.func @transform_2(%arg0: i32) -> (i32, i32) {
    %c0_i32 = arith.constant 0 : i32
    %c0_i32_0 = arith.constant 0 : i32
    %c0_i32_1 = arith.constant 0 : i32
    return %c0_i32, %c0_i32_0 : i32, i32
  }
  func.func @transform_3(%arg0: i32) -> (i32, i32) {
    %c0_i32 = arith.constant 0 : i32
    %c0_i32_0 = arith.constant 0 : i32
    return %arg0, %c0_i32 : i32, i32
  }
  func.func @transform_4(%arg0: i32) -> (i32, i32) {
    %c0_i32 = arith.constant 0 : i32
    %c0_i32_0 = arith.constant 0 : i32
    %c0_i32_1 = arith.constant 0 : i32
    return %c0_i32, %c0_i32_0 : i32, i32
  }
  func.func @transform_5(%arg0: i32) -> (i32, i32) {
    %c0_i32 = arith.constant 0 : i32
    %c0_i32_0 = arith.constant 0 : i32
    %c0_i32_1 = arith.constant 0 : i32
    return %c0_i32, %c0_i32_0 : i32, i32
  }
  func.func @transform_6(%arg0: i32) -> (i32, i32) {
    %c0_i32 = arith.constant 0 : i32
    %c0_i32_0 = arith.constant 0 : i32
    return %arg0, %c0_i32 : i32, i32
  }
}

module attributes {stable_mosaic.version = 11 : i64} {
  func.func @_ffn_add_norm_kernel(%arg0: i32, %arg1: memref<32x128xf32, #tpu.memory_space<vmem>>, %arg2: memref<128x256xbf16, #tpu.memory_space<vmem>>, %arg3: memref<1x256xf32, #tpu.memory_space<vmem>>, %arg4: memref<256x128xbf16, #tpu.memory_space<vmem>>, %arg5: memref<1x128xf32, #tpu.memory_space<vmem>>, %arg6: memref<1x128xf32, #tpu.memory_space<vmem>>, %arg7: memref<1x128xf32, #tpu.memory_space<vmem>>, %arg8: memref<32x128xf32, #tpu.memory_space<vmem>>) attributes {dimension_semantics = [#tpu.dimension_semantics<parallel>], iteration_bounds = array<i64: 1>, scalar_prefetch = 0 : i64, scratch_operands = 0 : i64, tpu.core_type = #tpu.core_type<tc>, window_params = [{transform_indices = @transform_0, window_bounds = array<i64: 32, 128>}, {pipeline_mode = #tpu.pipeline_mode<synchronous>, transform_indices = @transform_1, window_bounds = array<i64: 128, 256>}, {pipeline_mode = #tpu.pipeline_mode<synchronous>, transform_indices = @transform_2, window_bounds = array<i64: 1, 256>}, {pipeline_mode = #tpu.pipeline_mode<synchronous>, transform_indices = @transform_3, window_bounds = array<i64: 256, 128>}, {pipeline_mode = #tpu.pipeline_mode<synchronous>, transform_indices = @transform_4, window_bounds = array<i64: 1, 128>}, {pipeline_mode = #tpu.pipeline_mode<synchronous>, transform_indices = @transform_5, window_bounds = array<i64: 1, 128>}, {pipeline_mode = #tpu.pipeline_mode<synchronous>, transform_indices = @transform_6, window_bounds = array<i64: 1, 128>}, {transform_indices = @transform_7, window_bounds = array<i64: 32, 128>}]} {
    %c0 = arith.constant 0 : index
    %c0_0 = arith.constant 0 : index
    %0 = vector.load %arg1[%c0, %c0_0] : memref<32x128xf32, #tpu.memory_space<vmem>>, vector<32x128xf32>
    %1 = arith.truncf %0 : vector<32x128xf32> to vector<32x128xbf16>
    %c0_1 = arith.constant 0 : index
    %c0_2 = arith.constant 0 : index
    %2 = vector.load %arg2[%c0_1, %c0_2] : memref<128x256xbf16, #tpu.memory_space<vmem>>, vector<128x256xbf16>
    %cst = arith.constant dense<0.000000e+00> : vector<32x256xf32>
    %3 = tpu.matmul %1, %2, %cst {dimension_numbers = #tpu.dot_dimension_numbers<[1], [0], [0], [1], [0, 0, 1, 1], [], []>} : vector<32x128xbf16>, vector<128x256xbf16>, vector<32x256xf32> -> vector<32x256xf32>
    %c0_3 = arith.constant 0 : index
    %c0_4 = arith.constant 0 : index
    %4 = vector.load %arg3[%c0_3, %c0_4] : memref<1x256xf32, #tpu.memory_space<vmem>>, vector<1x256xf32>
    %5 = vector.broadcast %4 : vector<1x256xf32> to vector<32x256xf32>
    %6 = arith.addf %3, %5 : vector<32x256xf32>
    %cst_5 = arith.constant 0.000000e+00 : f32
    %7 = vector.broadcast %cst_5 : f32 to vector<32x256xf32>
    %8 = arith.maximumf %6, %7 : vector<32x256xf32>
    %9 = arith.truncf %8 : vector<32x256xf32> to vector<32x256xbf16>
    %c0_6 = arith.constant 0 : index
    %c0_7 = arith.constant 0 : index
    %10 = vector.load %arg4[%c0_6, %c0_7] : memref<256x128xbf16, #tpu.memory_space<vmem>>, vector<256x128xbf16>
    %cst_8 = arith.constant dense<0.000000e+00> : vector<32x128xf32>
    %11 = tpu.matmul %9, %10, %cst_8 {dimension_numbers = #tpu.dot_dimension_numbers<[1], [0], [0], [1], [0, 0, 1, 1], [], []>} : vector<32x256xbf16>, vector<256x128xbf16>, vector<32x128xf32> -> vector<32x128xf32>
    %c0_9 = arith.constant 0 : index
    %c0_10 = arith.constant 0 : index
    %12 = vector.load %arg5[%c0_9, %c0_10] : memref<1x128xf32, #tpu.memory_space<vmem>>, vector<1x128xf32>
    %13 = vector.broadcast %12 : vector<1x128xf32> to vector<32x128xf32>
    %14 = arith.addf %11, %13 : vector<32x128xf32>
    %15 = arith.addf %0, %14 : vector<32x128xf32>
    %c0_11 = arith.constant 0 : index
    %c0_12 = arith.constant 0 : index
    %16 = vector.load %arg6[%c0_11, %c0_12] : memref<1x128xf32, #tpu.memory_space<vmem>>, vector<1x128xf32>
    %c0_13 = arith.constant 0 : index
    %c0_14 = arith.constant 0 : index
    %17 = vector.load %arg7[%c0_13, %c0_14] : memref<1x128xf32, #tpu.memory_space<vmem>>, vector<1x128xf32>
    %cst_15 = arith.constant dense<0.000000e+00> : vector<32xf32>
    %18 = vector.multi_reduction <add>, %15, %cst_15 [1] : vector<32x128xf32> to vector<32xf32>
    %19 = vector.shape_cast %18 : vector<32xf32> to vector<32x1xf32>
    %cst_16 = arith.constant 1.280000e+02 : f32
    %20 = vector.broadcast %cst_16 : f32 to vector<32x1xf32>
    %21 = arith.divf %19, %20 : vector<32x1xf32>
    %22 = vector.broadcast %21 : vector<32x1xf32> to vector<32x128xf32>
    %23 = arith.subf %15, %22 : vector<32x128xf32>
    %24 = arith.mulf %23, %23 : vector<32x128xf32>
    %cst_17 = arith.constant dense<0.000000e+00> : vector<32xf32>
    %25 = vector.multi_reduction <add>, %24, %cst_17 [1] : vector<32x128xf32> to vector<32xf32>
    %26 = vector.shape_cast %25 : vector<32xf32> to vector<32x1xf32>
    %cst_18 = arith.constant 1.280000e+02 : f32
    %27 = vector.broadcast %cst_18 : f32 to vector<32x1xf32>
    %28 = arith.divf %26, %27 : vector<32x1xf32>
    %29 = vector.broadcast %21 : vector<32x1xf32> to vector<32x128xf32>
    %30 = arith.subf %15, %29 : vector<32x128xf32>
    %cst_19 = arith.constant 9.99999974E-6 : f32
    %31 = vector.broadcast %cst_19 : f32 to vector<32x1xf32>
    %32 = arith.addf %28, %31 : vector<32x1xf32>
    %33 = math.rsqrt %32 : vector<32x1xf32>
    %34 = vector.broadcast %33 : vector<32x1xf32> to vector<32x128xf32>
    %35 = arith.mulf %30, %34 : vector<32x128xf32>
    %36 = vector.broadcast %16 : vector<1x128xf32> to vector<32x128xf32>
    %37 = arith.mulf %35, %36 : vector<32x128xf32>
    %38 = vector.broadcast %17 : vector<1x128xf32> to vector<32x128xf32>
    %39 = arith.addf %37, %38 : vector<32x128xf32>
    %c0_20 = arith.constant 0 : index
    %c0_21 = arith.constant 0 : index
    %40 = vector.load %arg8[%c0_20, %c0_21] : memref<32x128xf32, #tpu.memory_space<vmem>>, vector<32x128xf32>
    tpu.vector_store %arg8[%c0_20, %c0_21], %39 {strides = array<i32>} : memref<32x128xf32, #tpu.memory_space<vmem>>, vector<32x128xf32>,
    return
  }
  func.func @transform_0(%arg0: i32) -> (i32, i32) {
    %c0_i32 = arith.constant 0 : i32
    %c0_i32_0 = arith.constant 0 : i32
    return %arg0, %c0_i32 : i32, i32
  }
  func.func @transform_1(%arg0: i32) -> (i32, i32) {
    %c0_i32 = arith.constant 0 : i32
    %c0_i32_0 = arith.constant 0 : i32
    %c0_i32_1 = arith.constant 0 : i32
    return %c0_i32, %c0_i32_0 : i32, i32
  }
  func.func @transform_2(%arg0: i32) -> (i32, i32) {
    %c0_i32 = arith.constant 0 : i32
    %c0_i32_0 = arith.constant 0 : i32
    %c0_i32_1 = arith.constant 0 : i32
    return %c0_i32, %c0_i32_0 : i32, i32
  }
  func.func @transform_3(%arg0: i32) -> (i32, i32) {
    %c0_i32 = arith.constant 0 : i32
    %c0_i32_0 = arith.constant 0 : i32
    %c0_i32_1 = arith.constant 0 : i32
    return %c0_i32, %c0_i32_0 : i32, i32
  }
  func.func @transform_4(%arg0: i32) -> (i32, i32) {
    %c0_i32 = arith.constant 0 : i32
    %c0_i32_0 = arith.constant 0 : i32
    %c0_i32_1 = arith.constant 0 : i32
    return %c0_i32, %c0_i32_0 : i32, i32
  }
  func.func @transform_5(%arg0: i32) -> (i32, i32) {
    %c0_i32 = arith.constant 0 : i32
    %c0_i32_0 = arith.constant 0 : i32
    %c0_i32_1 = arith.constant 0 : i32
    return %c0_i32, %c0_i32_0 : i32, i32
  }
  func.func @transform_6(%arg0: i32) -> (i32, i32) {
    %c0_i32 = arith.constant 0 : i32
    %c0_i32_0 = arith.constant 0 : i32
    %c0_i32_1 = arith.constant 0 : i32
    return %c0_i32, %c0_i32_0 : i32, i32
  }
  func.func @transform_7(%arg0: i32) -> (i32, i32) {
    %c0_i32 = arith.constant 0 : i32
    %c0_i32_0 = arith.constant 0 : i32
    return %arg0, %c0_i32 : i32, i32
  }
}

module attributes {stable_mosaic.version = 11 : i64} {
  func.func @_cross_attn_kernel(%arg0: i32, %arg1: memref<1x16x128xf32, #tpu.memory_space<vmem>>, %arg2: memref<1x16x128xf32, #tpu.memory_space<vmem>>, %arg3: memref<1x16x16xbf16, #tpu.memory_space<vmem>>, %arg4: memref<128x128xbf16, #tpu.memory_space<vmem>>, %arg5: memref<1x128xf32, #tpu.memory_space<vmem>>, %arg6: memref<128x256xbf16, #tpu.memory_space<vmem>>, %arg7: memref<1x256xf32, #tpu.memory_space<vmem>>, %arg8: memref<1x16x128xbf16, #tpu.memory_space<vmem>>) attributes {dimension_semantics = [#tpu.dimension_semantics<parallel>], iteration_bounds = array<i64: 2>, scalar_prefetch = 0 : i64, scratch_operands = 0 : i64, tpu.core_type = #tpu.core_type<tc>, window_params = [{transform_indices = @transform_0, window_bounds = array<i64: 1, 16, 128>}, {transform_indices = @transform_1, window_bounds = array<i64: 1, 16, 128>}, {transform_indices = @transform_2, window_bounds = array<i64: 1, 16, 16>}, {pipeline_mode = #tpu.pipeline_mode<synchronous>, transform_indices = @transform_3, window_bounds = array<i64: 128, 128>}, {pipeline_mode = #tpu.pipeline_mode<synchronous>, transform_indices = @transform_4, window_bounds = array<i64: 1, 128>}, {pipeline_mode = #tpu.pipeline_mode<synchronous>, transform_indices = @transform_5, window_bounds = array<i64: 128, 256>}, {pipeline_mode = #tpu.pipeline_mode<synchronous>, transform_indices = @transform_6, window_bounds = array<i64: 1, 256>}, {transform_indices = @transform_7, window_bounds = array<i64: 1, 16, 128>}]} {
    %c0 = arith.constant 0 : index
    %c0_0 = arith.constant 0 : index
    %c0_1 = arith.constant 0 : index
    %0 = vector.load %arg1[%c0, %c0_0, %c0_1] : memref<1x16x128xf32, #tpu.memory_space<vmem>>, vector<1x16x128xf32>
    %1 = vector.shape_cast %0 : vector<1x16x128xf32> to vector<16x128xf32>
    %2 = arith.truncf %1 : vector<16x128xf32> to vector<16x128xbf16>
    %c0_2 = arith.constant 0 : index
    %c0_3 = arith.constant 0 : index
    %c0_4 = arith.constant 0 : index
    %3 = vector.load %arg2[%c0_2, %c0_3, %c0_4] : memref<1x16x128xf32, #tpu.memory_space<vmem>>, vector<1x16x128xf32>
    %4 = vector.shape_cast %3 : vector<1x16x128xf32> to vector<16x128xf32>
    %5 = arith.truncf %4 : vector<16x128xf32> to vector<16x128xbf16>
    %c0_5 = arith.constant 0 : index
    %c0_6 = arith.constant 0 : index
    %6 = vector.load %arg4[%c0_5, %c0_6] : memref<128x128xbf16, #tpu.memory_space<vmem>>, vector<128x128xbf16>
    %cst = arith.constant dense<0.000000e+00> : vector<16x128xf32>
    %7 = tpu.matmul %2, %6, %cst {dimension_numbers = #tpu.dot_dimension_numbers<[1], [0], [0], [1], [0, 0, 1, 1], [], []>} : vector<16x128xbf16>, vector<128x128xbf16>, vector<16x128xf32> -> vector<16x128xf32>
    %c0_7 = arith.constant 0 : index
    %c0_8 = arith.constant 0 : index
    %8 = vector.load %arg5[%c0_7, %c0_8] : memref<1x128xf32, #tpu.memory_space<vmem>>, vector<1x128xf32>
    %9 = vector.broadcast %8 : vector<1x128xf32> to vector<16x128xf32>
    %10 = arith.addf %7, %9 : vector<16x128xf32>
    %c0_9 = arith.constant 0 : index
    %c0_10 = arith.constant 0 : index
    %11 = vector.load %arg6[%c0_9, %c0_10] : memref<128x256xbf16, #tpu.memory_space<vmem>>, vector<128x256xbf16>
    %cst_11 = arith.constant dense<0.000000e+00> : vector<16x256xf32>
    %12 = tpu.matmul %5, %11, %cst_11 {dimension_numbers = #tpu.dot_dimension_numbers<[1], [0], [0], [1], [0, 0, 1, 1], [], []>} : vector<16x128xbf16>, vector<128x256xbf16>, vector<16x256xf32> -> vector<16x256xf32>
    %c0_12 = arith.constant 0 : index
    %c0_13 = arith.constant 0 : index
    %13 = vector.load %arg7[%c0_12, %c0_13] : memref<1x256xf32, #tpu.memory_space<vmem>>, vector<1x256xf32>
    %14 = vector.broadcast %13 : vector<1x256xf32> to vector<16x256xf32>
    %15 = arith.addf %12, %14 : vector<16x256xf32>
    %16 = vector.extract_strided_slice %15 {offsets = [0, 0], sizes = [16, 128], strides = [1, 1]} : vector<16x256xf32> to vector<16x128xf32>
    %17 = vector.extract_strided_slice %15 {offsets = [0, 128], sizes = [16, 128], strides = [1, 1]} : vector<16x256xf32> to vector<16x128xf32>
    %c0_14 = arith.constant 0 : index
    %c0_15 = arith.constant 0 : index
    %c0_16 = arith.constant 0 : index
    %18 = vector.load %arg3[%c0_14, %c0_15, %c0_16] : memref<1x16x16xbf16, #tpu.memory_space<vmem>>, vector<1x16x16xbf16>
    %19 = vector.shape_cast %18 : vector<1x16x16xbf16> to vector<16x16xbf16>
    %cst_17 = arith.constant 0.176776692 : f32
    %20 = vector.broadcast %cst_17 : f32 to vector<16x128xf32>
    %21 = arith.mulf %10, %20 : vector<16x128xf32>
    %22 = arith.truncf %21 : vector<16x128xf32> to vector<16x128xbf16>
    %23 = vector.shape_cast %22 : vector<16x128xbf16> to vector<16x4x32xbf16>
    %24 = tpu.transpose %23, [1, 0, 2] : vector<16x4x32xbf16> -> vector<4x16x32xbf16>
    %25 = arith.truncf %16 : vector<16x128xf32> to vector<16x128xbf16>
    %26 = vector.shape_cast %25 : vector<16x128xbf16> to vector<16x4x32xbf16>
    %27 = tpu.transpose %26, [1, 0, 2] : vector<16x4x32xbf16> -> vector<4x16x32xbf16>
    %28 = arith.truncf %17 : vector<16x128xf32> to vector<16x128xbf16>
    %29 = vector.shape_cast %28 : vector<16x128xbf16> to vector<16x4x32xbf16>
    %30 = tpu.transpose %29, [1, 0, 2] : vector<16x4x32xbf16> -> vector<4x16x32xbf16>
    %cst_18 = arith.constant dense<0.000000e+00> : vector<4x16x16xf32>
    %31 = tpu.matmul %24, %27, %cst_18 {dimension_numbers = #tpu.dot_dimension_numbers<[2], [2], [1], [1], [0, 0, 0, 1, 1, 1], [0], [0]>} : vector<4x16x32xbf16>, vector<4x16x32xbf16>, vector<4x16x16xf32> -> vector<4x16x16xf32>
    %32 = vector.shape_cast %19 : vector<16x16xbf16> to vector<1x16x16xbf16>
    %cst_19 = arith.constant 0.000000e+00 : bf16
    %33 = vector.broadcast %cst_19 : bf16 to vector<1x16x16xbf16>
    %34 = arith.cmpf oeq, %32, %33 : vector<1x16x16xbf16>
    %cst_20 = arith.constant -1.000000e+09 : f32
    %35 = vector.shape_cast %34 : vector<1x16x16xi1> to vector<1x16x16xi1>
    %36 = vector.broadcast %35 : vector<1x16x16xi1> to vector<4x16x16xi1>
    %37 = vector.broadcast %cst_20 : f32 to vector<4x16x16xf32>
    %38 = arith.select %36, %37, %31 : vector<4x16x16xi1>, vector<4x16x16xf32>
    %cst_21 = arith.constant dense<0xFF800000> : vector<4x16xf32>
    %39 = vector.multi_reduction <maximumf>, %38, %cst_21 [2] : vector<4x16x16xf32> to vector<4x16xf32>
    %40 = vector.shape_cast %39 : vector<4x16xf32> to vector<4x16x1xf32>
    %41 = vector.broadcast %40 : vector<4x16x1xf32> to vector<4x16x16xf32>
    %42 = arith.subf %38, %41 : vector<4x16x16xf32>
    %43 = math.exp %42 : vector<4x16x16xf32>
    %cst_22 = arith.constant dense<0.000000e+00> : vector<4x16xf32>
    %44 = vector.multi_reduction <add>, %43, %cst_22 [2] : vector<4x16x16xf32> to vector<4x16xf32>
    %45 = vector.shape_cast %44 : vector<4x16xf32> to vector<4x16x1xf32>
    %cst_23 = arith.constant 1.000000e+00 : f32
    %46 = vector.broadcast %cst_23 : f32 to vector<4x16x1xf32>
    %47 = arith.divf %46, %45 : vector<4x16x1xf32>
    %48 = vector.broadcast %47 : vector<4x16x1xf32> to vector<4x16x16xf32>
    %49 = arith.mulf %43, %48 : vector<4x16x16xf32>
    %50 = arith.truncf %49 : vector<4x16x16xf32> to vector<4x16x16xbf16>
    %cst_24 = arith.constant dense<0.000000e+00> : vector<4x16x32xf32>
    %51 = tpu.matmul %50, %30, %cst_24 {dimension_numbers = #tpu.dot_dimension_numbers<[2], [1], [1], [2], [0, 0, 0, 1, 1, 2], [0], [0]>} : vector<4x16x16xbf16>, vector<4x16x32xbf16>, vector<4x16x32xf32> -> vector<4x16x32xf32>
    %52 = tpu.transpose %51, [1, 0, 2] : vector<4x16x32xf32> -> vector<16x4x32xf32>
    %53 = vector.shape_cast %52 : vector<16x4x32xf32> to vector<16x128xf32>
    %54 = arith.truncf %53 : vector<16x128xf32> to vector<16x128xbf16>
    %c0_25 = arith.constant 0 : index
    %c0_26 = arith.constant 0 : index
    %c0_27 = arith.constant 0 : index
    %55 = vector.load %arg8[%c0_25, %c0_26, %c0_27] : memref<1x16x128xbf16, #tpu.memory_space<vmem>>, vector<1x16x128xbf16>
    %56 = vector.shape_cast %55 : vector<1x16x128xbf16> to vector<16x128xbf16>
    %57 = vector.shape_cast %54 : vector<16x128xbf16> to vector<1x16x128xbf16>
    tpu.vector_store %arg8[%c0_25, %c0_26, %c0_27], %57 {strides = array<i32>} : memref<1x16x128xbf16, #tpu.memory_space<vmem>>, vector<1x16x128xbf16>,
    return
  }
  func.func @transform_0(%arg0: i32) -> (i32, i32, i32) {
    %c0_i32 = arith.constant 0 : i32
    %c0_i32_0 = arith.constant 0 : i32
    %c0_i32_1 = arith.constant 0 : i32
    return %arg0, %c0_i32, %c0_i32_0 : i32, i32, i32
  }
  func.func @transform_1(%arg0: i32) -> (i32, i32, i32) {
    %c0_i32 = arith.constant 0 : i32
    %c0_i32_0 = arith.constant 0 : i32
    %c0_i32_1 = arith.constant 0 : i32
    return %arg0, %c0_i32, %c0_i32_0 : i32, i32, i32
  }
  func.func @transform_2(%arg0: i32) -> (i32, i32, i32) {
    %c0_i32 = arith.constant 0 : i32
    %c0_i32_0 = arith.constant 0 : i32
    %c0_i32_1 = arith.constant 0 : i32
    return %arg0, %c0_i32, %c0_i32_0 : i32, i32, i32
  }
  func.func @transform_3(%arg0: i32) -> (i32, i32) {
    %c0_i32 = arith.constant 0 : i32
    %c0_i32_0 = arith.constant 0 : i32
    %c0_i32_1 = arith.constant 0 : i32
    return %c0_i32, %c0_i32_0 : i32, i32
  }
  func.func @transform_4(%arg0: i32) -> (i32, i32) {
    %c0_i32 = arith.constant 0 : i32
    %c0_i32_0 = arith.constant 0 : i32
    %c0_i32_1 = arith.constant 0 : i32
    return %c0_i32, %c0_i32_0 : i32, i32
  }
  func.func @transform_5(%arg0: i32) -> (i32, i32) {
    %c0_i32 = arith.constant 0 : i32
    %c0_i32_0 = arith.constant 0 : i32
    %c0_i32_1 = arith.constant 0 : i32
    return %c0_i32, %c0_i32_0 : i32, i32
  }
  func.func @transform_6(%arg0: i32) -> (i32, i32) {
    %c0_i32 = arith.constant 0 : i32
    %c0_i32_0 = arith.constant 0 : i32
    %c0_i32_1 = arith.constant 0 : i32
    return %c0_i32, %c0_i32_0 : i32, i32
  }
  func.func @transform_7(%arg0: i32) -> (i32, i32, i32) {
    %c0_i32 = arith.constant 0 : i32
    %c0_i32_0 = arith.constant 0 : i32
    %c0_i32_1 = arith.constant 0 : i32
    return %arg0, %c0_i32, %c0_i32_0 : i32, i32, i32
  }
}

</mosaic_0001>

<bundles_post_ra>
// kernel: decoder_layer.6
= control target key start
LH: loop header
LB: loop body
LE: loop exit
PB: predicated region body
PF: predicated region fallthrough
CT: control target
= control target key end

     0   :  { %s402_s1 = inlined_call_operand.vmem [shape: bf16[128,128], index: 1, kind: input, shape index: {}]   ;;  %s403_s0 = inlined_call_operand.vmem [shape: bf16[32,128], index: 0, kind: input, shape index: {}]   ;;  %s404_s2 = inlined_call_operand.vmem [shape: f32[1,128], index: 2, kind: input, shape index: {}]   ;;  %s405_s3 = inlined_call_operand.vmem [shape: f32[32,128], index: 3, kind: input, shape index: {}]   ;;  %s406_s4 = inlined_call_operand.vmem [shape: f32[1,128], index: 4, kind: input, shape index: {}]   ;;  %s407_s5 = inlined_call_operand.vmem [shape: f32[1,128], index: 5, kind: input, shape index: {}]   ;;  %s408_s6 = inlined_call_operand.vmem [shape: f32[32,128], index: 6, kind: output, shape index: {}]  }
   0x1   :  { %v286_v0 = vld [vmem:[%s402_s1] sm:$0xff]   ;;  %v287_v1 = vld [vmem:[%s402_s1 + $0x8] sm:$0xff]   ;;  %v288_v2 = vld [vmem:[%s402_s1 + $0x10] sm:$0xff]  }
   0x2   :  { %266 = vmatprep.subr.bf16.mxu0 %v286_v0  ;;  %v289_v3 = vld [vmem:[%s402_s1 + $0x18] sm:$0xff]   ;;  %v294_v4 = vld [vmem:[%s403_s0] sm:$0xff]   ;;  %v291_v6 = vld [vmem:[%s402_s1 + $0x28] sm:$0xff]  }
   0x3   :  { %267 = vmatpush3.bf16.msra.mxu0 %v286_v0  ;;  %282 = vmatprep.mubr.bf16.mxu0 %v294_v4  ;;  %v290_v5 = vld [vmem:[%s402_s1 + $0x20] sm:$0xff]   ;;  %v292_v7 = vld [vmem:[%s402_s1 + $0x30] sm:$0xff]   ;;  %v293_v8 = vld [vmem:[%s402_s1 + $0x38] sm:$0xff]  }
   0x4   :  { %268 = vmatprep.subr.bf16.mxu0 %v287_v1  ;;  %v295_v9 = vld [vmem:[%s403_s0 + $0x8] sm:$0xff]   ;;  %v243_v10 = vld [vmem:[%s404_s2] ss:$0 sm:$0xff]  ;;  %v162_v12 = vld [vmem:[%s405_s3 + $0x10] sm:$0xff] }
   0x5   :  { %v160_v15 = vld [vmem:[%s405_s3] sm:$0xff]  ;;  %v163_v23 = vld [vmem:[%s405_s3 + $0x18] sm:$0xff]  ;;  %v161_v24 = vld [vmem:[%s405_s3 + $0x8] sm:$0xff] }
   0x6   :  { %v254_v56 = vld [vmem:[%s406_s4] ss:$0 sm:$0xff] }
   0x7   :  { %269 = vmatpush3.bf16.msra.mxu0 %v287_v1  ;;  %v255_v58 = vld [vmem:[%s407_s5] ss:$0 sm:$0xff] }
   0x8   :  { %270 = vmatprep.subr.bf16.mxu0 %v288_v2 }
   0xb   :  { %271 = vmatpush3.bf16.msra.mxu0 %v288_v2 }
   0xc   :  { %272 = vmatprep.subr.bf16.mxu0 %v289_v3 }
   0xf   :  { %273 = vmatpush3.bf16.msra.mxu0 %v289_v3 }
  0x10   :  { %274 = vmatprep.subr.bf16.mxu0 %v290_v5 }
  0x13   :  { %275 = vmatpush3.bf16.msra.mxu0 %v290_v5 }
  0x14   :  { %276 = vmatprep.subr.bf16.mxu0 %v291_v6 }
  0x17   :  { %277 = vmatpush3.bf16.msra.mxu0 %v291_v6 }
  0x18   :  { %278 = vmatprep.subr.bf16.mxu0 %v292_v7 }
  0x1b   :  { %279 = vmatpush3.bf16.msra.mxu0 %v292_v7 }
  0x1c   :  { %280 = vmatprep.subr.bf16.mxu0 %v293_v8 }
  0x1f   :  { %281 = vmatpush3.bf16.msra.mxu0 %v293_v8 }
  0x22   :  { %283 = vmatmul.mubr.bf16.vlgmr.msra.gmra.mrb[0].mxu0 %v295_v9 }
  0xf5   :  { %v284_v11 = vpop.f32.mrb[0].mxu0 }
  0xf6   :  { %v154_v13 = vadd.f32 %v284_v11, %v243_v10  ;;  %v145_v14 = vpop.f32.mrb[1].mxu0 }
  0xf7   :  { %v146_v16 = vadd.f32 %v243_v10, %v145_v14  ;;  %v285_v17 = vpop.f32.mrb[2].mxu0 }
  0xf8   :  { %v157_v18 = vadd.f32 %v285_v17, %v243_v10  ;;  %v148_v19 = vpop.f32.mrb[3].mxu0  ;;  %v166_v20 = vadd.f32 %v162_v12, %v154_v13 }
  0xf9   :  { %v149_v21 = vadd.f32 %v243_v10, %v148_v19  ;;  %v164_v22 = vadd.f32 %v160_v15, %v146_v16 }
  0xfa   :  { %174 = vadd.xlane.f32.xlu1 %v166_v20  ;;  %v167_v25 = vadd.f32 %v163_v23, %v157_v18 }
  0xfb   :  { %170 = vadd.xlane.f32.xlu0 %v164_v22  ;;  %v165_v26 = vadd.f32 %v161_v24, %v149_v21 }
  0xfe   :  { %176 = vadd.xlane.f32.xlu1 %v167_v25 }
  0xff   :  { %172 = vadd.xlane.f32.xlu0 %v165_v26 }
 0x187   :  { %v175_v27 = vpop.xlane.xlu1 %174 }
 0x188   :  { %v171_v28 = vpop.xlane.xlu0 %170  ;;  %v181_v29 = vmul.f32 0.0078125, %v175_v27 }
 0x189   :  { %v179_v30 = vmul.f32 0.0078125, %v171_v28 }
 0x18a   :  { %v185_v34 = vsub.f32 %v166_v20, %v181_v29 }
 0x18b   :  { %v183_v31 = vsub.f32 %v164_v22, %v179_v30  ;;  %v177_v32 = vpop.xlane.xlu1 %176 }
 0x18c   :  { %v173_v33 = vpop.xlane.xlu0 %172  ;;  %v182_v35 = vmul.f32 0.0078125, %v177_v32  ;;  %v189_v40 = vmul.f32 %v185_v34, %v185_v34 }
 0x18d   :  { %v180_v36 = vmul.f32 0.0078125, %v173_v33  ;;  %v187_v37 = vmul.f32 %v183_v31, %v183_v31 }
 0x18e   :  { %v186_v39 = vsub.f32 %v167_v25, %v182_v35 }
 0x18f   :  { %v184_v38 = vsub.f32 %v165_v26, %v180_v36  ;;  %191 = vadd.xlane.f32.xlu0 %v187_v37 }
 0x190   :  { %v190_v42 = vmul.f32 %v186_v39, %v186_v39 }
 0x191   :  { %v188_v41 = vmul.f32 %v184_v38, %v184_v38 }
 0x193   :  { %195 = vadd.xlane.f32.xlu0 %v189_v40  ;;  %193 = vadd.xlane.f32.xlu1 %v188_v41 }
 0x197   :  { %197 = vadd.xlane.f32.xlu1 %v190_v42 }
 0x21c   :  { %v192_v43 = vpop.xlane.xlu0 %191 }
 0x21d   :  { %v199_v44 = vmul.f32 0.0078125, %v192_v43 }
 0x21f   :  { %v203_v45 = vadd.f32 1e-05, %v199_v44 }
 0x220   :  { %v194_v46 = vpop.xlane.xlu1 %193  ;;  %v196_v47 = vpop.xlane.xlu0 %195 }
 0x221   :  { %296 = vrsqrt.f32 %v203_v45  ;;  %v200_v48 = vmul.f32 0.0078125, %v194_v46  ;;  %v201_v49 = vmul.f32 0.0078125, %v196_v47 }
 0x223   :  { %v204_v50 = vadd.f32 1e-05, %v200_v48  ;;  %v205_v51 = vadd.f32 1e-05, %v201_v49 }
 0x224   :  { %v198_v52 = vpop.xlane.xlu1 %197 }
 0x225   :  { %298 = vrsqrt.f32 %v204_v50  ;;  %v202_v53 = vmul.f32 0.0078125, %v198_v52 }
 0x226   :  { %300 = vrsqrt.f32 %v205_v51 }
 0x227   :  { %v206_v54 = vadd.f32 1e-05, %v202_v53 }
 0x229   :  { %302 = vrsqrt.f32 %v206_v54 }
 0x22b   :  { %v297_v55 = vpop.eup %296 }
 0x22c   :  { %v211_v57 = vmul.f32 %v297_v55, %v183_v31 }
 0x22e   :  { %v221_v59 = vmul.f32 %v254_v56, %v211_v57 }
 0x22f   :  { %v299_v60 = vpop.eup %298 }
 0x230   :  { %v301_v61 = vpop.eup %300  ;;  %v231_v62 = vadd.f32 %v255_v58, %v221_v59  ;;  %v212_v63 = vmul.f32 %v299_v60, %v184_v38 }
 0x231   :  { %v213_v0 = vmul.f32 %v301_v61, %v185_v34 }
 0x232   :  { %235 = vst [vmem:[%s408_s6] sm:$0xff] %v231_v62  ;;  %v222_v1 = vmul.f32 %v254_v56, %v212_v63 }
 0x233   :  { %v303_v2 = vpop.eup %302  ;;  %v223_v3 = vmul.f32 %v254_v56, %v213_v0 }
 0x234   :  { %v232_v4 = vadd.f32 %v255_v58, %v222_v1  ;;  %v214_v5 = vmul.f32 %v303_v2, %v186_v39 }
 0x235   :  { %v233_v6 = vadd.f32 %v255_v58, %v223_v3 }
 0x236   :  { %236 = vst [vmem:[%s408_s6 + $0x8] sm:$0xff] %v232_v4  ;;  %v224_v7 = vmul.f32 %v254_v56, %v214_v5 }
 0x237   :  { %237 = vst [vmem:[%s408_s6 + $0x10] sm:$0xff] %v233_v6 }
 0x238   :  { %v234_v8 = vadd.f32 %v255_v58, %v224_v7 }
 0x23a   :  { %238 = vst [vmem:[%s408_s6 + $0x18] sm:$0xff] %v234_v8 }

// kernel: decoder_layer.9
= control target key start
LH: loop header
LB: loop body
LE: loop exit
PB: predicated region body
PF: predicated region fallthrough
CT: control target
= control target key end

     0   :  { %v621_v2 = vmov 0   ;;  %s813_s0 = inlined_call_operand.vmem [shape: f32[32,128], index: 0, kind: input, shape index: {}]   ;;  %s814_s1 = inlined_call_operand.vmem [shape: bf16[128,256], index: 1, kind: input, shape index: {}]   ;;  %s815_s2 = inlined_call_operand.vmem [shape: f32[1,256], index: 2, kind: input, shape index: {}]   ;;  %s816_s3 = inlined_call_operand.vmem [shape: bf16[256,128], index: 3, kind: input, shape index: {}]   ;;  %s817_s4 = inlined_call_operand.vmem [shape: f32[1,128], index: 4, kind: input, shape index: {}]   ;;  %s818_s5 = inlined_call_operand.vmem [shape: f32[1,128], index: 5, kind: input, shape index: {}]   ;;  %s819_s6 = inlined_call_operand.vmem [shape: f32[1,128], index: 6, kind: input, shape index: {}]   ;;  %s820_s7 = inlined_call_operand.hbm [shape: f32[32,128], index: 7, kind: output, shape index: {}]  }
   0x1   :  { %v549_v0 = vld [vmem:[%s814_s1 + $0x4] ss:$8 sps:$4 sm:$0xff]   ;;  %v551_v1 = vld [vmem:[%s814_s1] ss:$8 sps:$4 sm:$0xff]   ;;  %174 = vmatprep.mubr.bf16.mxu0 %v621_v2  ;;  %v552_v3 = vld [vmem:[%s814_s1 + $0x14] ss:$8 sps:$4 sm:$0xff]  }
   0x2   :  { %142 = vmatprep.subr.bf16.mxu0 %v549_v0  ;;  %v554_v4 = vld [vmem:[%s814_s1 + $0x10] ss:$8 sps:$4 sm:$0xff]   ;;  %v555_v5 = vld [vmem:[%s814_s1 + $0x24] ss:$8 sps:$4 sm:$0xff]   ;;  %v557_v6 = vld [vmem:[%s814_s1 + $0x20] ss:$8 sps:$4 sm:$0xff]  }
   0x3   :  { %143 = vmatpush1.bf16.msra.mxu0 %v551_v1  ;;  %v558_v7 = vld [vmem:[%s814_s1 + $0x34] ss:$8 sps:$4 sm:$0xff]   ;;  %v560_v8 = vld [vmem:[%s814_s1 + $0x30] ss:$8 sps:$4 sm:$0xff]   ;;  %v561_v9 = vld [vmem:[%s814_s1 + $0x44] ss:$8 sps:$4 sm:$0xff]  }
   0x4   :  { %144 = vmatprep.subr.bf16.mxu0 %v552_v3  ;;  %v573_v10 = vld [vmem:[%s816_s3 + $0x40] sm:$0xff]   ;;  %v564_v13 = vld [vmem:[%s814_s1 + $0x54] ss:$8 sps:$4 sm:$0xff]   ;;  %v575_v14 = vld [vmem:[%s816_s3 + $0x48] sm:$0xff]  }
   0x5   :  { %v563_v11 = vld [vmem:[%s814_s1 + $0x40] ss:$8 sps:$4 sm:$0xff]   ;;  %517 = vmatprep.subr.bf16.mxu1 %v573_v10  ;;  %v577_v16 = vld [vmem:[%s816_s3 + $0x50] sm:$0xff]   ;;  %v567_v18 = vld [vmem:[%s814_s1 + $0x64] ss:$8 sps:$4 sm:$0xff]  }
   0x6   :  { %v574_v12 = vld [vmem:[%s816_s3] sm:$0xff]   ;;  %v576_v15 = vld [vmem:[%s816_s3 + $0x8] sm:$0xff]   ;;  %v566_v17 = vld [vmem:[%s814_s1 + $0x50] ss:$8 sps:$4 sm:$0xff]  }
   0x7   :  { %145 = vmatpush1.bf16.msra.mxu0 %v554_v4  ;;  %518 = vmatpush3.bf16.msra.mxu1 %v574_v12  ;;  %v578_v19 = vld [vmem:[%s816_s3 + $0x10] sm:$0xff]   ;;  %v579_v20 = vld [vmem:[%s816_s3 + $0x58] sm:$0xff]   ;;  %v569_v21 = vld [vmem:[%s814_s1 + $0x60] ss:$8 sps:$4 sm:$0xff]  }
   0x8   :  { %146 = vmatprep.subr.bf16.mxu0 %v555_v5  ;;  %519 = vmatprep.subr.bf16.mxu1 %v575_v14  ;;  %v570_v22 = vld [vmem:[%s814_s1 + $0x74] ss:$8 sps:$4 sm:$0xff]   ;;  %v581_v24 = vld [vmem:[%s816_s3 + $0x60] sm:$0xff]   ;;  %v572_v25 = vld [vmem:[%s814_s1 + $0x70] ss:$8 sps:$4 sm:$0xff]  }
   0x9   :  { %v580_v23 = vld [vmem:[%s816_s3 + $0x18] sm:$0xff]  }
   0xb   :  { %147 = vmatpush1.bf16.msra.mxu0 %v557_v6  ;;  %520 = vmatpush3.bf16.msra.mxu1 %v576_v15 }
   0xc   :  { %148 = vmatprep.subr.bf16.mxu0 %v558_v7  ;;  %521 = vmatprep.subr.bf16.mxu1 %v577_v16 }
   0xf   :  { %149 = vmatpush1.bf16.msra.mxu0 %v560_v8  ;;  %522 = vmatpush3.bf16.msra.mxu1 %v578_v19 }
  0x10   :  { %150 = vmatprep.subr.bf16.mxu0 %v561_v9  ;;  %523 = vmatprep.subr.bf16.mxu1 %v579_v20 }
  0x13   :  { %151 = vmatpush1.bf16.msra.mxu0 %v563_v11 }
  0x14   :  { %152 = vmatprep.subr.bf16.mxu0 %v564_v13 }
  0x17   :  { %153 = vmatpush1.bf16.msra.mxu0 %v566_v17 }
  0x18   :  { %154 = vmatprep.subr.bf16.mxu0 %v567_v18 }
  0x19   :  { %12 = vsyncpa [#allocation3], 0  ;;  %v743_v26 = vld [vmem:[%s813_s0] sm:$0xff]  ;;  %v748_v27 = vld [vmem:[%s813_s0 + $0x8] sm:$0xff]  ;;  %524 = vmatpush3.bf16.msra.mxu1 %v580_v23  ;;  %v52_v39 = vlaneseq }
  0x1a   :  { %v582_v28 = vld [vmem:[%s816_s3 + $0x20] sm:$0xff]   ;;  %525 = vmatprep.subr.bf16.mxu1 %v581_v24  ;;  %v583_v29 = vld [vmem:[%s816_s3 + $0x68] sm:$0xff]   ;;  %v32_v30 = vpack.c.bf16 %v748_v27, %v743_v26  ;;  %v761_v31 = vld [vmem:[%s813_s0 + $0x10] sm:$0xff] }
  0x1b   :  { %155 = vmatpush1.bf16.msra.mxu0 %v569_v21  ;;  %v766_v32 = vld [vmem:[%s813_s0 + $0x18] sm:$0xff]  ;;  %v584_v34 = vld [vmem:[%s816_s3 + $0x28] sm:$0xff]   ;;  %v585_v35 = vld [vmem:[%s816_s3 + $0x70] sm:$0xff]   ;;  %v53_v40 = vshrl.u32 %v52_v39, 7 }
  0x1c   :  { %156 = vmatprep.subr.bf16.mxu0 %v570_v22  ;;  %v33_v33 = vpack.c.bf16 %v766_v32, %v761_v31  ;;  %v586_v36 = vld [vmem:[%s816_s3 + $0x30] sm:$0xff]   ;;  %v587_v37 = vld [vmem:[%s816_s3 + $0x78] sm:$0xff]   ;;  %v50_v42 = vld [vmem:[%s815_s2] sm:$0x3] }
  0x1d   :  { %526 = vmatpush3.bf16.msra.mxu1 %v582_v28  ;;  %v588_v38 = vld [vmem:[%s816_s3 + $0x38] sm:$0xff]   ;;  %v54_v41 = vsub.s32 0, %v53_v40  ;;  %v58_v43 = vsub.s32 1, %v53_v40  ;;  %v498_v11 = vld [vmem:[%s817_s4] ss:$0 sm:$0xff] }
  0x1e   :  { %527 = vmatprep.subr.bf16.mxu1 %v583_v29 }
  0x1f   :  { %157 = vmatpush1.bf16.msra.mxu0 %v572_v25  ;;  %v55_v44 = vrot.slane %v50_v42, %v54_v41  ;;  %v59_v45 = vrot.slane %v50_v42, %v58_v43 }
  0x21   :  { %528 = vmatpush3.bf16.msra.mxu1 %v584_v34 }
  0x22   :  { %175 = vmatmul.mubr.bf16.vlgmr.msra.gmra.mrb[0].mxu0 %v32_v30  ;;  %529 = vmatprep.subr.bf16.mxu1 %v585_v35 }
  0x23   :  { %184 = vmatprep.mubr.bf16.mxu0 %v621_v2 }
  0x25   :  { %530 = vmatpush3.bf16.msra.mxu1 %v586_v36 }
  0x26   :  { %531 = vmatprep.subr.bf16.mxu1 %v587_v37 }
  0x29   :  { %532 = vmatpush3.bf16.msra.mxu1 %v588_v38 }
  0x2a   :  { %185 = vmatmul.mubr.bf16.gmra.mrb[4].mxu0 %v33_v33 }
  0xf5   :  { %v176_v46 = vpop.f32.mrb[0].mxu0 }
  0xf6   :  { %v177_v47 = vadd.f32 %v176_v46, %v55_v44  ;;  %v178_v48 = vpop.f32.mrb[1].mxu0 }
  0xf7   :  { %v179_v49 = vadd.f32 %v178_v48, %v59_v45  ;;  %v180_v50 = vpop.f32.mrb[2].mxu0 }
  0xf8   :  { %v181_v51 = vadd.f32 %v180_v50, %v55_v44  ;;  %v182_v52 = vpop.f32.mrb[3].mxu0  ;;  %v195_v54 = vmax.f32 %v177_v47, 0.0 }
  0xf9   :  { %v183_v53 = vadd.f32 %v182_v52, %v59_v45  ;;  %v196_v56 = vmax.f32 %v179_v49, 0.0 }
  0xfa   :  { %v197_v55 = vmax.f32 %v181_v51, 0.0 }
  0xfb   :  { %v198_v57 = vmax.f32 %v183_v53, 0.0 }
  0xfc   :  { %v203_v58 = vpack.c.bf16 %v197_v55, %v195_v54 }
  0xfd   :  { %v186_v59 = vpop.f32.mrb[4].mxu0  ;;  %v204_v60 = vpack.c.bf16 %v198_v57, %v196_v56 }
  0xfe   :  { %v187_v61 = vadd.f32 %v186_v59, %v55_v44  ;;  %v188_v62 = vpop.f32.mrb[5].mxu0  ;;  %v515_v59 = vld [vmem:[%s818_s5] ss:$0 sm:$0xff]  ;;  %s622_s5 = smov [#allocation2]  }
  0xff   :  { %v189_v63 = vadd.f32 %v188_v62, %v59_v45  ;;  %v190_v0 = vpop.f32.mrb[6].mxu0  ;;  %374 = vmatprep.mubr.bf16.mxu1 %v204_v60  ;;  %v516_v62 = vld [vmem:[%s819_s6] ss:$0 sm:$0xff]  ;;  %s471_s30 = sshll.u32 %s622_s5, 4  ;;  %s472_s30 = int_to_ptr.vmem [resolvable:$true] %s471_s30 }
 0x100   :  { %v191_v1 = vadd.f32 %v190_v0, %v55_v44  ;;  %v192_v2 = vpop.f32.mrb[7].mxu0  ;;  %375 = vmatmul.mubr.bf16.vlgmr.msra.gmra.mrb[0].mxu1 %v203_v58  ;;  %v199_v4 = vmax.f32 %v187_v61, 0.0  ;;  %s597_s6 = scalar_lea.vmem %s472_s30, 512  ;;  %p602_p1 = scmp.lt.s32.totalorder %s472_s30, %s472_s30 }
 0x101   :  { %v193_v3 = vadd.f32 %v192_v2, %v59_v45  ;;  %v200_v6 = vmax.f32 %v189_v63, 0.0  ;;  %p598_p0 = scmp.ne.s32.totalorder %s472_s30, %s597_s6  ;;  %p603_p2 = scmp.lt.s32.totalorder %s597_s6, %s597_s6 }
 0x102   :  { %v201_v5 = vmax.f32 %v191_v1, 0.0 }
 0x103   :  { %v202_v7 = vmax.f32 %v193_v3, 0.0  ;;  %p604_p3 = por %p603_p2, %p602_p1 }
 0x104   :  { %v205_v8 = vpack.c.bf16 %v201_v5, %v199_v4 }
 0x105   :  { %v206_v9 = vpack.c.bf16 %v202_v7, %v200_v6  ;;  %p605_p4 = pnand %p604_p3, %p598_p0 }
 0x107   :  { %382 = vmatprep.mubr.bf16.mxu1 %v206_v9 }
 0x108   :  { %383 = vmatmul.mubr.bf16.gmra.mrb[4].mxu1 %v205_v8 }
 0x1d3   :  { %v533_v10 = vpop.f32.mrb[0].mxu1 }
 0x1d4   :  { %v534_v12 = vpop.f32.mrb[1].mxu1 }
 0x1d5   :  { %v535_v13 = vadd.f32 %v534_v12, %v533_v10  ;;  %v536_v14 = vpop.f32.mrb[2].mxu1 }
 0x1d6   :  { %v537_v15 = vpop.f32.mrb[3].mxu1 }
 0x1d7   :  { %v377_v16 = vadd.f32 %v535_v13, %v498_v11  ;;  %v538_v17 = vadd.f32 %v537_v15, %v536_v14 }
 0x1d9   :  { %v380_v18 = vadd.f32 %v538_v17, %v498_v11  ;;  %v391_v19 = vadd.f32 %v377_v16, %v743_v26 }
 0x1db   :  { %v539_v20 = vpop.f32.mrb[4].mxu1  ;;  %397 = vadd.xlane.f32.xlu0 %v391_v19  ;;  %v392_v24 = vadd.f32 %v380_v18, %v748_v27 }
 0x1dc   :  { %v540_v21 = vpop.f32.mrb[5].mxu1 }
 0x1dd   :  { %v541_v22 = vadd.f32 %v540_v21, %v539_v20  ;;  %v542_v23 = vpop.f32.mrb[6].mxu1 }
 0x1de   :  { %v543_v25 = vpop.f32.mrb[7].mxu1 }
 0x1df   :  { %v385_v28 = vadd.f32 %v541_v22, %v498_v11  ;;  %v544_v29 = vadd.f32 %v543_v25, %v542_v23  ;;  %399 = vadd.xlane.f32.xlu0 %v392_v24 }
 0x1e1   :  { %v388_v30 = vadd.f32 %v544_v29, %v498_v11  ;;  %v393_v33 = vadd.f32 %v385_v28, %v761_v31 }
 0x1e3   :  { %401 = vadd.xlane.f32.xlu1 %v393_v33  ;;  %v394_v34 = vadd.f32 %v388_v30, %v766_v32 }
 0x1e7   :  { %403 = vadd.xlane.f32.xlu1 %v394_v34 }
 0x268   :  { %v398_v35 = vpop.xlane.xlu0 %397 }
 0x269   :  { %v406_v26 = vmul.f32 0.0078125, %v398_v35 }
 0x26b   :  { %v410_v36 = vsub.f32 %v391_v19, %v406_v26 }
 0x26c   :  { %v400_v37 = vpop.xlane.xlu0 %399 }
 0x26d   :  { %v407_v38 = vmul.f32 0.0078125, %v400_v37  ;;  %v414_v39 = vmul.f32 %v410_v36, %v410_v36 }
 0x26f   :  { %v411_v40 = vsub.f32 %v392_v24, %v407_v38  ;;  %418 = vadd.xlane.f32.xlu0 %v414_v39 }
 0x270   :  { %v402_v27 = vpop.xlane.xlu1 %401 }
 0x271   :  { %v408_v41 = vmul.f32 0.0078125, %v402_v27  ;;  %v415_v42 = vmul.f32 %v411_v40, %v411_v40 }
 0x273   :  { %v412_v43 = vsub.f32 %v393_v33, %v408_v41  ;;  %420 = vadd.xlane.f32.xlu1 %v415_v42 }
 0x274   :  { %v404_v44 = vpop.xlane.xlu1 %403 }
 0x275   :  { %v409_v45 = vmul.f32 0.0078125, %v404_v44  ;;  %v416_v31 = vmul.f32 %v412_v43, %v412_v43 }
 0x277   :  { %v413_v46 = vsub.f32 %v394_v34, %v409_v45  ;;  %422 = vadd.xlane.f32.xlu0 %v416_v31 }
 0x279   :  { %v417_v32 = vmul.f32 %v413_v46, %v413_v46 }
 0x27b   :  { %424 = vadd.xlane.f32.xlu1 %v417_v32 }
 0x2fc   :  { %v419_v47 = vpop.xlane.xlu0 %418 }
 0x2fd   :  { %v426_v48 = vmul.f32 0.0078125, %v419_v47 }
 0x2ff   :  { %v430_v49 = vadd.f32 1e-05, %v426_v48 }
 0x300   :  { %v421_v50 = vpop.xlane.xlu1 %420 }
 0x301   :  { %589 = vrsqrt.f32 %v430_v49  ;;  %v427_v51 = vmul.f32 0.0078125, %v421_v50 }
 0x303   :  { %v431_v52 = vadd.f32 1e-05, %v427_v51 }
 0x304   :  { %v423_v53 = vpop.xlane.xlu0 %422 }
 0x305   :  { %591 = vrsqrt.f32 %v431_v52  ;;  %v428_v54 = vmul.f32 0.0078125, %v423_v53 }
 0x307   :  { %v432_v55 = vadd.f32 1e-05, %v428_v54 }
 0x308   :  { %v425_v56 = vpop.xlane.xlu1 %424 }
 0x309   :  { %593 = vrsqrt.f32 %v432_v55  ;;  %v429_v57 = vmul.f32 0.0078125, %v425_v56 }
 0x30b   :  { %v590_v58 = vpop.eup %589  ;;  %v433_v60 = vadd.f32 1e-05, %v429_v57 }
 0x30c   :  { %v438_v61 = vmul.f32 %v590_v58, %v410_v36 }
 0x30d   :  { %595 = vrsqrt.f32 %v433_v60 }
 0x30e   :  { %v448_v63 = vmul.f32 %v515_v59, %v438_v61 }
 0x30f   :  { %v592_v0 = vpop.eup %591 }
 0x310   :  { %v439_v1 = vmul.f32 %v592_v0, %v411_v40  ;;  %v458_v2 = vadd.f32 %v516_v62, %v448_v63 }
 0x312   :  { %v449_v3 = vmul.f32 %v515_v59, %v439_v1  ;;  %462 = vst [vmem:[#allocation2] sm:$0xff] %v458_v2 }
 0x313   :  { %v594_v4 = vpop.eup %593 }
 0x314   :  { %v440_v5 = vmul.f32 %v594_v4, %v412_v43  ;;  %v459_v6 = vadd.f32 %v516_v62, %v449_v3 }
 0x316   :  { %v450_v7 = vmul.f32 %v515_v59, %v440_v5  ;;  %463 = vst [vmem:[#allocation2 + $0x8] sm:$0xff] %v459_v6 }
 0x317   :  { %v596_v8 = vpop.eup %595 }
 0x318   :  { %v460_v9 = vadd.f32 %v516_v62, %v450_v7  ;;  %v441_v10 = vmul.f32 %v596_v8, %v413_v46 }
 0x31a   :  { %464 = vst [vmem:[#allocation2 + $0x10] sm:$0xff] %v460_v9  ;;  %v451_v11 = vmul.f32 %v515_v59, %v441_v10 }
 0x31c   :  { %v461_v12 = vadd.f32 %v516_v62, %v451_v11 }
 0x31e   :  { %465 = vst [vmem:[#allocation2 + $0x18] sm:$0xff] %v461_v12 }
 0x31f   :  { %608 = shalt.err (!%p605_p4)
}
 0x320   :  { %s609_s10 = scalar_lea.hbm %s820_s7, 512 }
 0x321   :  { %p610_p5 = scmp.ne.s32.totalorder %s820_s7, %s609_s10  ;;  %p613_p6 = scmp.lt.u32.totalorder %s609_s10, %s820_s7 }
 0x323   :  { %p615_p7 = pnand %p613_p6, %p610_p5 }
 0x325   :  { %618 = shalt.err (!%p615_p7)
}
 0x326   :  { %s623_s14 = smov 128   ;;  %s624_s15 = smov 8  }
 0x327   :  { %477 = dma.vmem_to_hbm [thread:$0]  %s472_s30, 512, %s820_s7, [#allocation3], %s623_s14, %s623_s14, %s624_s15  }
 0x328   :  { %619 = dma.done.wait [#allocation3], 512  }
 0x329   :  { %620 = vsyncadd [#allocation3], 4294966784 }
 0x32a   :  { %481 = vsyncpa [#allocation3], 1 }

// kernel: decoder_layer.5
= control target key start
LH: loop header
LB: loop body
LE: loop exit
PB: predicated region body
PF: predicated region fallthrough
CT: control target
= control target key end

     0   :  { %9 = vsyncpa [#allocation3], 0  ;;  %s2549_s15 = smov 0   ;;  %s2916_s0 = inlined_call_operand.vmem [shape: f32[2,16,128], index: 0, kind: input, shape index: {}]   ;;  %s2917_s1 = inlined_call_operand.vmem [shape: bf16[2,16,16], index: 1, kind: input, shape index: {}]   ;;  %s2918_s2 = inlined_call_operand.hbm [shape: bf16[128,384], index: 2, kind: input, shape index: {}]   ;;  %s2919_s3 = inlined_call_operand.vmem [shape: f32[1,384], index: 3, kind: input, shape index: {}]   ;;  %s2920_s4 = inlined_call_operand.vmem [shape: bf16[2,16,128], index: 4, kind: output, shape index: {}]  }
   0x1 LB: > { %s2555_s16 = sadd.s32 4294967295, %s2511_s15   ;;  %p2199_p0 = scmp.ge.s32.totalorder %s2511_s15, 1  ;;  %s2511_s15 = sphi %s2549_s15, %s15_s15  }
   0x2   : > { %p140_p1 = scmp.lt.s32.totalorder %s2511_s15, 3  ;;  %s2513_s17 = smov [#allocation2]  }
   0x3   : > { %s152_s18 = sshll.u32 %s2513_s17, 4  ;;  %p2921_p3 = scmp.eq.s32.totalorder %s2555_s16, 0  ;;  %s153_s18 = int_to_ptr.vmem [resolvable:$true] %s152_s18 }
   0x4   : > { %p2559_p2 = pnand %p2199_p0, %p140_p1  ;;  %s2473_s23 = scalar_lea.hbm %s2918_s2, 3072 }
   0x5   : > { %p2474_p6 = scmp.ne.s32.totalorder %s2918_s2, %s2473_s23  ;;  %p2480_p10 = scmp.lt.u32.totalorder %s2473_s23, %s2918_s2 }
   0x6   : > { %s2923_s19 = scalar_select %p2559_p2, 1, 0 }
   0x7   : > { %p2369_p4 = pneg %p2559_p2 }
   0x9   : > { %p2568_p5 = pnand %p2921_p3, %p2369_p4 }
   0xb   : > { %p2475_p7 = pneg %p2568_p5 }
   0xd   : > { %p2476_p8 = pnand %p2475_p7, %p2474_p6 }
   0xf   : > { %p2477_p9 = pneg %p2476_p8 }
  0x11   : > { %p2482_p11 = pnand %p2480_p10, %p2477_p9 }
  0x13   : > { %2485 = shalt.err (!%p2482_p11)
}
  0x14   : > { %s2486_s28 = scalar_lea.vmem %s153_s18, 3072  ;;  %p2494_p1 = scmp.lt.s32.totalorder %s153_s18, %s153_s18 }
  0x15   : > { %p2487_p12 = scmp.ne.s32.totalorder %s153_s18, %s2486_s28  ;;  %p2495_p4 = scmp.lt.s32.totalorder %s2486_s28, %s2486_s28 }
  0x17   : > { %p2489_p13 = pnand %p2487_p12, %p2475_p7  ;;  %p2496_p3 = por %p2495_p4, %p2494_p1 }
  0x19   : > { %p2490_p0 = pneg %p2489_p13 }
  0x1b   : > { %p2497_p2 = pnand %p2496_p3, %p2490_p0 }
  0x1d   : > { %2500 = shalt.err (!%p2497_p2)
}
  0x1e   : > { %s2514_s29 = smov 192   ;;  %s2515_s30 = smov 12  }
  0x1f   : > { %2372 = dma.hbm_to_vmem [thread:$0]  (!%p2568_p5), %s2918_s2, 3072, %s153_s18, [#allocation3], %s2514_s29, %s2514_s29, %s2515_s30  }
  0x20   : > { %p2925_p6 = scmp.ne.s32.totalorder %s2923_s19, 0 }
  0x21   : > { %p2926_p8 = scmp.eq.s32.totalorder (!%p2925_p6), %s2555_s16, 0 }
  0x22   : > { %187 = sbr.rel (%p2925_p6) target bundleno = 1360 (0x550), region = 36 }
  0x29   : > { %2506 = dma.done.wait (%p2926_p8), [#allocation3], 3072   ;;  %p2927_p7 = pmov %p2926_p8 }
  0x2a   : > { %v2516_v0 = vmov 0   ;;  %v2409_v1 = vld [vmem:[#allocation2 + $0x4] ss:$12 sps:$4 sm:$0xff]   ;;  %v2411_v2 = vld [vmem:[#allocation2] ss:$12 sps:$4 sm:$0xff]   ;;  %p218_p2 = scmp.lt.s32.totalorder %s2555_s16, 1  ;;  %v273_v23 = vlaneseq }
  0x2b   : > { %2508 = vsyncadd (%p2927_p7), [#allocation3], 4294964224  ;;  %448 = vmatprep.mubr.bf16.mxu0 %v2516_v0  ;;  %416 = vmatprep.subr.bf16.mxu0 %v2409_v1  ;;  %v2412_v3 = vld [vmem:[#allocation2 + $0x1c] ss:$12 sps:$4 sm:$0xff]   ;;  %v2414_v4 = vld [vmem:[#allocation2 + $0x18] ss:$12 sps:$4 sm:$0xff]   ;;  %v2643_v53 = vpack.i.b16 %v2516_v0, %v2516_v0 }
  0x2c   : > { %417 = vmatpush1.bf16.msra.mxu0 %v2411_v2  ;;  %v2415_v5 = vld [vmem:[#allocation2 + $0x34] ss:$12 sps:$4 sm:$0xff]   ;;  %v2417_v6 = vld [vmem:[#allocation2 + $0x30] ss:$12 sps:$4 sm:$0xff]   ;;  %v2418_v7 = vld [vmem:[#allocation2 + $0x4c] ss:$12 sps:$4 sm:$0xff]  }
  0x2d   : > { %418 = vmatprep.subr.bf16.mxu0 %v2412_v3  ;;  %v2420_v8 = vld [vmem:[#allocation2 + $0x48] ss:$12 sps:$4 sm:$0xff]   ;;  %v2421_v9 = vld [vmem:[#allocation2 + $0x64] ss:$12 sps:$4 sm:$0xff]   ;;  %v2423_v10 = vld [vmem:[#allocation2 + $0x60] ss:$12 sps:$4 sm:$0xff]  }
  0x2e   : > { %v2424_v11 = vld [vmem:[#allocation2 + $0x7c] ss:$12 sps:$4 sm:$0xff]   ;;  %s2933_s16 = smov (!%p218_p2, %s2555_s16), 1  ;;  %v2426_v12 = vld [vmem:[#allocation2 + $0x78] ss:$12 sps:$4 sm:$0xff]   ;;  %v2517_v21 = vmov 0.0  }
  0x2f   : > { %v2427_v13 = vld [vmem:[#allocation2 + $0x94] ss:$12 sps:$4 sm:$0xff]   ;;  %s2262_s7 = sshll.u32 %s2933_s16, 4  ;;  %v2429_v14 = vld [vmem:[#allocation2 + $0x90] ss:$12 sps:$4 sm:$0xff]   ;;  %2297 = vmatprep.subr.bf16.mxu1 %v2517_v21  ;;  %v2607_v24 = vshrl.u32 %v273_v23, 7 }
  0x30   : > { %419 = vmatpush1.bf16.msra.mxu0 %v2414_v4  ;;  %v2430_v15 = vld [vmem:[#allocation2 + $0xac] ss:$12 sps:$4 sm:$0xff]   ;;  %s222_s10 = scalar_lea.vmem %s2916_s0, %s2262_s7  ;;  %v2432_v16 = vld [vmem:[#allocation2 + $0xa8] ss:$12 sps:$4 sm:$0xff]   ;;  %v2613_v26 = vld [vmem:[%s2919_s3] sm:$0x7] }
  0x31   : > { %420 = vmatprep.subr.bf16.mxu0 %v2415_v5  ;;  %v236_v17 = vld [vmem:[%s222_s10] sm:$0xff]  ;;  %v237_v18 = vld [vmem:[%s222_s10 + $0x8] sm:$0xff]  ;;  %v275_v25 = vsub.s32 0, %v2607_v24  ;;  %v279_v28 = vsub.s32 1, %v2607_v24  ;;  %v2436_v41 = vld [vmem:[#allocation2 + $0x50] ss:$12 sps:$4 sm:$0xff]  }
  0x32   : > { %v238_v19 = vpack.c.bf16 %v237_v18, %v236_v17  ;;  %v2433_v20 = vld [vmem:[#allocation2 + $0x8] ss:$12 sps:$4 sm:$0xff]   ;;  %v2434_v22 = vld [vmem:[#allocation2 + $0x20] ss:$12 sps:$4 sm:$0xff]   ;;  %v2435_v27 = vld [vmem:[#allocation2 + $0x38] ss:$12 sps:$4 sm:$0xff]  }
  0x33   : > { %2298 = vmatpush3.bf16.msra.mxu1 %v2433_v20  ;;  %v276_v29 = vrot.slane %v2613_v26, %v275_v25  ;;  %v280_v31 = vrot.slane %v2613_v26, %v279_v28  ;;  %s2518_s13 = smov 32   ;;  %s2519_s14 = smov 96   ;;  %v2437_v44 = vld [vmem:[#allocation2 + $0x68] ss:$12 sps:$4 sm:$0xff]   ;;  %v2438_v45 = vld [vmem:[#allocation2 + $0x80] ss:$12 sps:$4 sm:$0xff]  }
  0x34   : > { %421 = vmatpush1.bf16.msra.mxu0 %v2417_v6  ;;  %2299 = vmatprep.subr.bf16.mxu1 %v2517_v21  ;;  %s2520_s17 = smov 64   ;;  %v2439_v46 = vld [vmem:[#allocation2 + $0x98] ss:$12 sps:$4 sm:$0xff]   ;;  %v2440_v47 = vld [vmem:[#allocation2 + $0xb0] ss:$12 sps:$4 sm:$0xff]   ;;  %vm2521_vm0 = vmmov 0  }
  0x35   : > { %422 = vmatprep.subr.bf16.mxu0 %v2418_v7  ;;  %2313 = vmatprep.mubr.msk.bf16.mxu1 %vm2521_vm0, %v2517_v21  ;;  %v2522_v48 = vmov 1983009808   ;;  %v2523_v50 = vmov 1934713408   ;;  %vm1318_vm1 = vcmask 261120   ;;  %s2263_s18 = sshll.u32 %s2933_s16, 3 }
  0x36   : > { %v536_v49 = vunpack.c.l.s4 %v2522_v48  ;;  %v567_v51 = vunpack.c.l.s4 %v2523_v50  ;;  %s227_s21 = scalar_lea.vmem %s2917_s1, %s2263_s18  ;;  %vm1527_vm5 = vcmask 130048   ;;  %vm2102_vm7 = vcmask 523264   ;;  %s232_s24 = scalar_lea.vmem %s2920_s4, %s2263_s18 }
  0x37   : > { %2300 = vmatpush3.bf16.msra.mxu1 %v2434_v22  ;;  %vm2105_vm8 = vcmask 785408  }
  0x38   : > { %423 = vmatpush1.bf16.msra.mxu0 %v2420_v8  ;;  %2301 = vmatprep.subr.bf16.mxu1 %v2517_v21  ;;  %v537_v52 = vunpack.c.0.s8 %v536_v49  ;;  %v568_v56 = vunpack.c.0.s8 %v567_v51 }
  0x39   : > { %424 = vmatprep.subr.bf16.mxu0 %v2421_v9 }
  0x3a   : > { %v2646_v60 = vsub.s32 %v537_v52, %v2607_v24  ;;  %v2650_v2 = vsub.s32 %v568_v56, %v2607_v24 }
  0x3b   : > { %2302 = vmatpush3.bf16.msra.mxu1 %v2435_v27 }
  0x3c   : > { %425 = vmatpush1.bf16.msra.mxu0 %v2423_v10  ;;  %2303 = vmatprep.subr.bf16.mxu1 %v2517_v21 }
  0x3d   : > { %426 = vmatprep.subr.bf16.mxu0 %v2424_v11 }
  0x3f   : > { %2304 = vmatpush3.bf16.msra.mxu1 %v2436_v41 }
  0x40   : > { %427 = vmatpush1.bf16.msra.mxu0 %v2426_v12  ;;  %2305 = vmatprep.subr.bf16.mxu1 %v2517_v21 }
  0x41   : > { %428 = vmatprep.subr.bf16.mxu0 %v2427_v13 }
  0x43   : > { %2306 = vmatpush3.bf16.msra.mxu1 %v2437_v44 }
  0x44   : > { %429 = vmatpush1.bf16.msra.mxu0 %v2429_v14  ;;  %2307 = vmatprep.subr.bf16.mxu1 %v2517_v21 }
  0x45   : > { %430 = vmatprep.subr.bf16.mxu0 %v2430_v15 }
  0x47   : > { %2308 = vmatpush3.bf16.msra.mxu1 %v2438_v45 }
  0x48   : > { %431 = vmatpush1.bf16.msra.mxu0 %v2432_v16  ;;  %2309 = vmatprep.subr.bf16.mxu1 %v2517_v21 }
  0x49   : > { %2317 = vmatprep.subr.bf16.mxu0 %v2517_v21 }
  0x4b   : > { %449 = vmatmul.mubr.bf16.vlgmr.msra.gmra.mrb[0].mxu0 %v238_v19  ;;  %2310 = vmatpush3.bf16.msra.mxu1 %v2439_v46 }
  0x4c   : > { %2311 = vmatprep.subr.bf16.mxu1 %v2517_v21  ;;  %2319 = vmatprep.mubr.msk.bf16.mxu0 %vm2521_vm0, %v2517_v21 }
  0x4f   : > { %2312 = vmatpush3.bf16.msra.mxu1 %v2440_v47 }
  0x50   : > { %2323 = vmatprep.subr.bf16.mxu1 %v2517_v21 }
  0x52   : > { %2314 = vmatmul.mubr.bf16.vlgmr.msra.gmra.mrb[0].mxu1 %v238_v19 }
  0x53   : > { %2325 = vmatprep.mubr.msk.bf16.mxu1 %vm2521_vm0, %v2517_v21 }
 0x11e   : > { %v450_v30 = vpop.f32.mrb[0].mxu0 }
 0x11f   : > { %v451_v32 = vadd.f32 %v450_v30, %v276_v29  ;;  %v452_v33 = vpop.f32.mrb[1].mxu0 }
 0x120   : > { %v454_v34 = vpop.f32.mrb[2].mxu0  ;;  %v453_v37 = vadd.f32 %v452_v33, %v280_v31 }
 0x121   : > { %v455_v35 = vadd.f32 %v454_v34, %v276_v29  ;;  %v456_v36 = vpop.f32.mrb[3].mxu0  ;;  %v502_v39 = vmul.f32 0.17677669, %v451_v32 }
 0x122   : > { %v457_v38 = vadd.f32 %v456_v36, %v280_v31 }
 0x123   : > { %v503_v40 = vmul.f32 0.17677669, %v455_v35 }
 0x124   : > { %v778_v42 = vpack.c.bf16 %v457_v38, %v453_v37 }
 0x125   : > { %v2619_v43 = vpack.c.bf16 %v503_v40, %v502_v39 }
 0x126   : > { %784 = vrot.lane.b32.xlu1 %v778_v42, %s2518_s13  ;;  %780 = vrot.lane.b32.xlu0 %v778_v42, %s2519_s14  ;;  %v790_v58 = vshrl.u32 %v778_v42, 16 }
 0x127   : > { %v516_v12 = vshrl.u32 %v2619_v43, 16 }
 0x12a   : > { %782 = vrot.lane.b32.xlu0 %v778_v42, %s2520_s17  ;;  %506 = vrot.lane.b32.xlu1 %v2619_v43, %s2519_s14 }
 0x12e   : > { %508 = vrot.lane.b32.xlu0 %v2619_v43, %s2520_s17  ;;  %510 = vrot.lane.b32.xlu1 %v2619_v43, %s2518_s13 }
 0x198   : > { %v785_v54 = vpop.permute.xlu1 %784  ;;  %v781_v55 = vpop.permute.xlu0 %780 }
 0x199   : > { %v788_v57 = vpack.i.b16 %v781_v55, %v778_v42  ;;  %v791_v59 = vshrl.u32 %v781_v55, 16  ;;  %v799_v5 = vshrl.u32 %v785_v54, 16 }
 0x19b   : > { %v792_v61 = vpack.i.b16 %v791_v59, %v790_v58  ;;  %v802_v62 = vcombine.high %v788_v57, %v2643_v53  ;;  %v809_v9 = vrot.slane %v788_v57, %v2646_v60 }
 0x19c   : > { %v783_v63 = vpop.permute.xlu0 %782  ;;  %v507_v1 = vpop.permute.xlu1 %506 }
 0x19d   : > { %v868_v3 = vcombine.high %v792_v61, %v2643_v53  ;;  %v796_v4 = vpack.i.b16 %v785_v54, %v783_v63  ;;  %v798_v6 = vshrl.u32 %v783_v63, 16  ;;  %v514_v7 = vpack.i.b16 %v507_v1, %v2619_v43 }
 0x19e   : > { %v517_v8 = vshrl.u32 %v507_v1, 16  ;;  %v816_v13 = vrot.slane %v802_v62, %v2646_v60  ;;  %v875_v14 = vrot.slane %v792_v61, %v2646_v60 }
 0x19f   : > { %v817_v10 = vcombine.high %v796_v4, %v2643_v53  ;;  %v824_v11 = vrot.slane %v796_v4, %v2646_v60  ;;  %v882_v15 = vrot.slane %v868_v3, %v2646_v60  ;;  %v800_v16 = vpack.i.b16 %v799_v5, %v798_v6 }
 0x1a0   : > { %v518_v20 = vpack.i.b16 %v517_v8, %v516_v12  ;;  %v509_v22 = vpop.permute.xlu0 %508  ;;  %v534_v27 = vcombine.high %v514_v7, %v2643_v53  ;;  %v541_v28 = vrot.slane %v514_v7, %v2646_v60  ;;  %v511_v45 = vpop.permute.xlu1 %510 }
 0x1a1   : > { %v831_v17 = vrot.slane %v817_v10, %v2646_v60  ;;  %v832_v18 = vcombine.low %v809_v9, %v824_v11  ;;  %v833_v19 = vcombine.high %v809_v9, %v824_v11  ;;  %v883_v23 = vcombine.high %v800_v16, %v2643_v53 }
 0x1a2   : > { %v890_v25 = vrot.slane %v800_v16, %v2646_v60  ;;  %v524_v36 = vshrl.u32 %v509_v22, 16  ;;  %v600_v54 = vcombine.high %v518_v20, %v2643_v53  ;;  %v548_v55 = vrot.slane %v534_v27, %v2646_v60 }
 0x1a3   : > { %v840_v29 = vrot.slane %v832_v18, %v2650_v2  ;;  %v847_v30 = vrot.slane %v833_v19, %v2650_v2  ;;  %v848_v31 = vcombine.low %v816_v13, %v831_v17  ;;  %v849_v32 = vcombine.high %v816_v13, %v831_v17 }
 0x1a4   : > { %v897_v33 = vrot.slane %v883_v23, %v2646_v60  ;;  %v898_v34 = vcombine.low %v875_v14, %v890_v25  ;;  %v899_v35 = vcombine.high %v875_v14, %v890_v25  ;;  %v522_v56 = vpack.i.b16 %v511_v45, %v509_v22 }
 0x1a5   : > { %v856_v37 = vrot.slane %v848_v31, %v2650_v2  ;;  %v863_v38 = vrot.slane %v849_v32, %v2650_v2  ;;  %v934_v39 = vcombine.low %v840_v29, %v847_v30  ;;  %v2238_v40 = vcombine.high %v840_v29, %v847_v30 }
 0x1a6   : > { %v906_v41 = vrot.slane %v898_v34, %v2650_v2  ;;  %v913_v42 = vrot.slane %v899_v35, %v2650_v2  ;;  %v914_v43 = vcombine.low %v882_v15, %v897_v33  ;;  %v915_v44 = vcombine.high %v882_v15, %v897_v33 }
 0x1a7   : > { %v941_v46 = vrot.slane %v934_v39, %v2646_v60  ;;  %v949_v47 = vrot.slane %v2238_v40, %v2646_v60  ;;  %v950_v48 = vcombine.low %v856_v37, %v863_v38  ;;  %v2239_v49 = vcombine.high %v856_v37, %v863_v38 }
 0x1a8   : > { %v922_v50 = vrot.slane %v914_v43, %v2650_v2  ;;  %v929_v51 = vrot.slane %v915_v44, %v2650_v2  ;;  %v984_v52 = vcombine.low %v906_v41, %v913_v42  ;;  %v525_v57 = vshrl.u32 %v511_v45, 16 }
 0x1a9   : > { %v957_v58 = vrot.slane %v950_v48, %v2646_v60  ;;  %v2240_v59 = vcombine.high %v906_v41, %v913_v42  ;;  %v965_v62 = vrot.slane %v2239_v49, %v2646_v60  ;;  %v966_v63 = vcombine.low %v941_v46, %v949_v47 }
 0x1aa   : > { %v1000_v61 = vcombine.low %v922_v50, %v929_v51  ;;  %v607_v1 = vrot.slane %v518_v20, %v2646_v60  ;;  %v526_v3 = vpack.i.b16 %v525_v57, %v524_v36  ;;  %v549_v4 = vcombine.high %v522_v56, %v2643_v53 }
 0x1ab   : > { %v556_v5 = vrot.slane %v522_v56, %v2646_v60  ;;  %v2241_v6 = vcombine.high %v922_v50, %v929_v51  ;;  %v614_v7 = vrot.slane %v600_v54, %v2646_v60  ;;  %v974_v8 = vcombine.low %v957_v58, %v965_v62 }
 0x1ac   : > { %v991_v9 = vrot.slane %v984_v52, %v2646_v60  ;;  %v563_v10 = vrot.slane %v549_v4, %v2646_v60  ;;  %v615_v13 = vcombine.high %v526_v3, %v2643_v53  ;;  %v622_v14 = vrot.slane %v526_v3, %v2646_v60 }
 0x1ad   : > { %v564_v11 = vcombine.low %v541_v28, %v556_v5  ;;  %v565_v12 = vcombine.high %v541_v28, %v556_v5  ;;  %v973_v15 = vrot.slane %v966_v63, %v2650_v2  ;;  %v999_v16 = vrot.slane %v2240_v59, %v2646_v60 }
 0x1ae   : > { %v1007_v17 = vrot.slane %v1000_v61, %v2646_v60  ;;  %v580_v20 = vcombine.low %v548_v55, %v563_v10  ;;  %v581_v22 = vcombine.high %v548_v55, %v563_v10  ;;  %v629_v23 = vrot.slane %v615_v13, %v2646_v60 }
 0x1af   : > { %v572_v18 = vrot.slane %v564_v11, %v2650_v2  ;;  %v579_v19 = vrot.slane %v565_v12, %v2650_v2  ;;  %v630_v25 = vcombine.low %v607_v1, %v622_v14  ;;  %v631_v27 = vcombine.high %v607_v1, %v622_v14 }
 0x1b0   : > { %v981_v28 = vrot.slane %v974_v8, %v2650_v2  ;;  %v588_v29 = vrot.slane %v580_v20, %v2650_v2  ;;  %v595_v30 = vrot.slane %v581_v22, %v2650_v2  ;;  %v646_v35 = vcombine.low %v614_v7, %v629_v23 }
 0x1b1   : > { %v666_v31 = vcombine.low %v572_v18, %v579_v19  ;;  %v2234_v32 = vcombine.high %v572_v18, %v579_v19  ;;  %v638_v33 = vrot.slane %v630_v25, %v2650_v2  ;;  %v645_v34 = vrot.slane %v631_v27, %v2650_v2 }
 0x1b2   : > { %v647_v36 = vcombine.high %v614_v7, %v629_v23  ;;  %v682_v37 = vcombine.low %v588_v29, %v595_v30  ;;  %v2235_v38 = vcombine.high %v588_v29, %v595_v30  ;;  %v1015_v39 = vrot.slane %v2241_v6, %v2646_v60 }
 0x1b3   : > { %v1016_v40 = vcombine.low %v991_v9, %v999_v16  ;;  %v654_v41 = vrot.slane %v646_v35, %v2650_v2  ;;  %v716_v43 = vcombine.low %v638_v33, %v645_v34  ;;  %v2236_v44 = vcombine.high %v638_v33, %v645_v34 }
 0x1b4   : > { %v661_v42 = vrot.slane %v647_v36, %v2650_v2  ;;  %v673_v45 = vrot.slane %v666_v31, %v2646_v60  ;;  %v681_v46 = vrot.slane %v2234_v32, %v2646_v60  ;;  %v689_v47 = vrot.slane %v682_v37, %v2646_v60 }
 0x1b5   : > { %v697_v48 = vrot.slane %v2235_v38, %v2646_v60  ;;  %v723_v49 = vrot.slane %v716_v43, %v2646_v60  ;;  %v731_v50 = vrot.slane %v2236_v44, %v2646_v60  ;;  %v1024_v54 = vcombine.low %v1007_v17, %v1015_v39  ;;  %v493_v39 = vpop.f32.mrb[0].mxu1 }
 0x1b6   : > { %v732_v51 = vcombine.low %v654_v41, %v661_v42  ;;  %v2237_v52 = vcombine.high %v654_v41, %v661_v42  ;;  %v982_v58 = vcombine.low %v973_v15, %v981_v28  ;;  %v1023_v61 = vrot.slane %v1016_v40, %v2650_v2  ;;  %v2315_v41 = vpop.f32.mrb[1].mxu1 }
 0x1b7   : > { %v706_v55 = vcombine.low %v689_v47, %v697_v48  ;;  %v748_v59 = vcombine.low %v723_v49, %v731_v50  ;;  %v1031_v62 = vrot.slane %v1024_v54, %v2650_v2  ;;  %v698_v63 = vcombine.low %v673_v45, %v681_v46  ;;  %v496_v42 = vpop.f32.mrb[2].mxu1  ;;  %v500_v46 = vld [vmem:[%s227_s21] sm:$0xf]  ;;  %v501_v47 = vld [vmem:[%s227_s21 + $0x4] sm:$0xf] }
 0x1b8   : > { %v739_v56 = vrot.slane %v732_v51, %v2646_v60  ;;  %v747_v57 = vrot.slane %v2237_v52, %v2646_v60  ;;  %v1037_v4 = vshrl.u32 %v982_v58, 16  ;;  %v983_v16 = vcombine.high %v973_v15, %v981_v28  ;;  %v2316_v44 = vpop.f32.mrb[3].mxu1 }
 0x1b9   : > { %v1032_v3 = vcombine.low %v1023_v61, %v1031_v62  ;;  %v713_v5 = vrot.slane %v706_v55, %v2650_v2  ;;  %v755_v9 = vrot.slane %v748_v59, %v2650_v2  ;;  %v1033_v10 = vcombine.high %v1023_v61, %v1031_v62 }
 0x1ba   : > { %v756_v1 = vcombine.low %v739_v56, %v747_v57  ;;  %v705_v11 = vrot.slane %v698_v63, %v2650_v2  ;;  %v1043_v23 = vshrl.u32 %v983_v16, 16  ;;  %v283_v37 = vsub.s32 2, %v2607_v24 }
 0x1bb   : > { %v1036_v7 = vpack.i.b16 %v1032_v3, %v982_v58  ;;  %v1038_v8 = vshrl.u32 %v1032_v3, 16  ;;  %v1044_v19 = vshrl.u32 %v1033_v10, 16  ;;  %v1042_v20 = vpack.i.b16 %v1033_v10, %v983_v16 }
 0x1bc   : > { %v763_v6 = vrot.slane %v756_v1, %v2650_v2  ;;  %v714_v18 = vcombine.low %v705_v11, %v713_v5  ;;  %v715_v32 = vcombine.high %v705_v11, %v713_v5  ;;  %v284_v38 = vrot.slane %v2613_v26, %v283_v37 }
 0x1bd   : > { %v1323_v12 = vsel %vm1318_vm1, %v1036_v7, 0  ;;  %v1039_v13 = vpack.i.b16 %v1038_v8, %v1037_v4  ;;  %v1045_v29 = vpack.i.b16 %v1044_v19, %v1043_v23  ;;  %v1417_v15 = vsel %vm1318_vm1, %v1042_v20, 0 }
 0x1be   : > { %v764_v14 = vcombine.low %v755_v9, %v763_v6  ;;  %2318 = vmatpush3.bf16.xpose.msra.mxu0 %v1323_v12  ;;  %v769_v27 = vshrl.u32 %v714_v18, 16  ;;  %v765_v30 = vcombine.high %v755_v9, %v763_v6  ;;  %v775_v35 = vshrl.u32 %v715_v32, 16 }
 0x1bf   : > { %v1370_v17 = vsel %vm1318_vm1, %v1039_v13, 0  ;;  %2329 = vmatprep.subr.bf16.mxu0 %v2517_v21  ;;  %v1464_v31 = vsel %vm1318_vm1, %v1045_v29, 0  ;;  %v494_v40 = vadd.f32 %v493_v39, %v284_v38  ;;  %v497_v43 = vadd.f32 %v496_v42, %v284_v38 }
 0x1c0   : > { %2324 = vmatpush3.bf16.xpose.msra.mxu1 %v1370_v17  ;;  %v770_v22 = vshrl.u32 %v764_v14, 16  ;;  %v768_v25 = vpack.i.b16 %v764_v14, %v714_v18  ;;  %v776_v33 = vshrl.u32 %v765_v30, 16  ;;  %v774_v34 = vpack.i.b16 %v765_v30, %v715_v32 }
 0x1c1   : > { %2335 = vmatprep.subr.bf16.mxu1 %v2517_v21  ;;  %v2739_v45 = vpack.c.bf16 %v497_v43, %v494_v40  ;;  %vm1507_vm2 = vcmp.eq.bf16.partialorder %v500_v46, 0  ;;  %vm1508_vm3 = vcmp.eq.bf16.partialorder %v501_v47, 0 }
 0x1c2   : > { %v771_v28 = vpack.i.b16 %v770_v22, %v769_v27  ;;  %v777_v36 = vpack.i.b16 %v776_v33, %v775_v35  ;;  %v1509_v24 = vsel %vm1507_vm2, 65537, %v2516_v0  ;;  %v1510_v26 = vsel %vm1508_vm3, 65537, %v2516_v0 }
 0x1c3   : > { %v1511_v48 = vunpack.c.l.b16 %v1509_v24  ;;  %v1512_v49 = vunpack.c.l.b16 %v1510_v26 }
 0x1c5   : > { %2320 = vmatmul.mubr.msk.bf16.vlgmr.msra.gmra.mrb[4].mxu0 %vm1318_vm1, %v768_v25  ;;  %vm2749_vm4 = vcmp.ne.s32.totalorder %v1511_v48, 0  ;;  %vm2753_vm6 = vcmp.ne.s32.totalorder %v1512_v49, 0 }
 0x1c6   : > { %2330 = vmatpush3.bf16.xpose.msra.mxu0 %v1417_v15  ;;  %2331 = vmatprep.mubr.msk.bf16.mxu0 %vm2521_vm0, %v2517_v21 }
 0x1c7   : > { %2326 = vmatmul.mubr.msk.bf16.vlgmr.msra.gmra.mrb[4].mxu1 %vm1318_vm1, %v771_v28  ;;  %2341 = vmatprep.subr.bf16.mxu0 %v2517_v21 }
 0x1c8   : > { %2336 = vmatpush3.bf16.xpose.msra.mxu1 %v1464_v31  ;;  %2337 = vmatprep.mubr.msk.bf16.mxu1 %vm2521_vm0, %v2517_v21 }
 0x1c9   : > { %2347 = vmatprep.subr.bf16.mxu1 %v2517_v21 }
 0x1cd   : > { %2332 = vmatmul.mubr.msk.bf16.vlgmr.msra.gmra.mrb[8].mxu0 %vm1318_vm1, %v774_v34 }
 0x1ce   : > { %2343 = vmatprep.mubr.msk.bf16.mxu0 %vm2521_vm0, %v2517_v21 }
 0x1cf   : > { %2338 = vmatmul.mubr.msk.bf16.vlgmr.msra.gmra.mrb[8].mxu1 %vm1318_vm1, %v777_v36 }
 0x1d0   : > { %2349 = vmatprep.mubr.msk.bf16.mxu1 %vm2521_vm0, %v2517_v21 }
 0x298   : > { %v1359_v51 = vpop.f32.mrb[4].mxu0 }
 0x299   : > { %v1519_v54 = vsel %vm2749_vm4, -1e+09, %v1359_v51  ;;  %v2321_v55 = vpop.f32.mrb[5].mxu0  ;;  %v1058_v51 = vshrl.u32 %v2739_v45, 16 }
 0x29a   : > { %v1362_v56 = vpop.f32.mrb[6].mxu0  ;;  %v1406_v57 = vpop.f32.mrb[4].mxu1  ;;  %v1528_v0 = vsel %vm1527_vm5, %v1519_v54, -inf }
 0x29b   : > { %v1520_v58 = vsel %vm2753_vm6, -1e+09, %v1362_v56  ;;  %v1521_v59 = vsel %vm2749_vm4, -1e+09, %v1406_v57  ;;  %v2327_v61 = vpop.f32.mrb[5].mxu1  ;;  %1529 = vmax.xlane.f32.xlu0 %v1528_v0  ;;  %v2322_v62 = vpop.f32.mrb[7].mxu0 }
 0x29c   : > { %v1409_v63 = vpop.f32.mrb[6].mxu1  ;;  %v1531_v1 = vsel %vm1527_vm5, %v1520_v58, -inf  ;;  %v1534_v4 = vsel %vm1527_vm5, %v1521_v59, -inf }
 0x29d   : > { %v2328_v3 = vpop.f32.mrb[7].mxu1  ;;  %1532 = vmax.xlane.f32.xlu1 %v1531_v1  ;;  %v1522_v5 = vsel %vm2753_vm6, -1e+09, %v1409_v63 }
 0x29e   : > { %v1537_v11 = vsel %vm1527_vm5, %v1522_v5, -inf }
 0x29f   : > { %1535 = vmax.xlane.f32.xlu0 %v1534_v4 }
 0x2a0   : > { %v1453_v6 = vpop.f32.mrb[8].mxu0 }
 0x2a1   : > { %v1523_v7 = vsel %vm2749_vm4, -1e+09, %v1453_v6  ;;  %v2333_v8 = vpop.f32.mrb[9].mxu0 }
 0x2a2   : > { %v1456_v9 = vpop.f32.mrb[10].mxu0  ;;  %v1500_v10 = vpop.f32.mrb[8].mxu1  ;;  %v1540_v12 = vsel %vm1527_vm5, %v1523_v7, -inf }
 0x2a3   : > { %v1524_v13 = vsel %vm2753_vm6, -1e+09, %v1456_v9  ;;  %v1525_v14 = vsel %vm2749_vm4, -1e+09, %v1500_v10  ;;  %v2339_v16 = vpop.f32.mrb[9].mxu1  ;;  %1538 = vmax.xlane.f32.xlu0 %v1537_v11  ;;  %1541 = vmax.xlane.f32.xlu1 %v1540_v12  ;;  %v2334_v17 = vpop.f32.mrb[11].mxu0 }
 0x2a4   : > { %v1503_v18 = vpop.f32.mrb[10].mxu1  ;;  %v1546_v20 = vsel %vm1527_vm5, %v1525_v14, -inf  ;;  %v1543_v22 = vsel %vm1527_vm5, %v1524_v13, -inf }
 0x2a5   : > { %v2340_v19 = vpop.f32.mrb[11].mxu1  ;;  %v1526_v23 = vsel %vm2753_vm6, -1e+09, %v1503_v18 }
 0x2a6   : > { %v1549_v25 = vsel %vm1527_vm5, %v1526_v23, -inf }
 0x2a7   : > { %1547 = vmax.xlane.f32.xlu1 %v1546_v20  ;;  %1544 = vmax.xlane.f32.xlu0 %v1543_v22 }
 0x2ab   : > { %1550 = vmax.xlane.f32.xlu0 %v1549_v25 }
 0x2b8   : > { %1048 = vrot.lane.b32.xlu1 %v2739_v45, %s2519_s14 }
 0x2bc   : > { %1052 = vrot.lane.b32.xlu1 %v2739_v45, %s2518_s13 }
 0x2c1   : > { %1050 = vrot.lane.b32.xlu0 %v2739_v45, %s2520_s17 }
 0x328   : > { %v1530_v27 = vpop.xlane.xlu0 %1529 }
 0x329   : > { %v1552_v29 = vsub.f32 %v1519_v54, %v1530_v27 }
 0x32a   : > { %v1533_v15 = vpop.xlane.xlu1 %1532 }
 0x32b   : > { %v1560_v28 = vmul.f32 1.442695, %v1552_v29  ;;  %v1553_v30 = vsub.f32 %v1520_v58, %v1533_v15 }
 0x32c   : > { %v1536_v31 = vpop.xlane.xlu0 %1535 }
 0x32d   : > { %2441 = vpow2.f32 %v1560_v28  ;;  %v1562_v32 = vmul.f32 1.442695, %v1553_v30  ;;  %v1554_v33 = vsub.f32 %v1521_v59, %v1536_v31 }
 0x32f   : > { %2443 = vpow2.f32 %v1562_v32  ;;  %v1564_v34 = vmul.f32 1.442695, %v1554_v33 }
 0x330   : > { %v1539_v35 = vpop.xlane.xlu0 %1538  ;;  %v1542_v36 = vpop.xlane.xlu1 %1541 }
 0x331   : > { %2445 = vpow2.f32 %v1564_v34  ;;  %v1555_v37 = vsub.f32 %v1522_v5, %v1539_v35  ;;  %v1556_v38 = vsub.f32 %v1523_v7, %v1542_v36 }
 0x333   : > { %v1566_v39 = vmul.f32 1.442695, %v1555_v37  ;;  %v1568_v40 = vmul.f32 1.442695, %v1556_v38 }
 0x334   : > { %v1548_v41 = vpop.xlane.xlu1 %1547  ;;  %v1545_v42 = vpop.xlane.xlu0 %1544 }
 0x335   : > { %2447 = vpow2.f32 %v1566_v39  ;;  %v1558_v43 = vsub.f32 %v1525_v14, %v1548_v41  ;;  %v1557_v44 = vsub.f32 %v1524_v13, %v1545_v42 }
 0x336   : > { %2449 = vpow2.f32 %v1568_v40 }
 0x337   : > { %v2787_v46 = vpop.eup %2441  ;;  %v1570_v47 = vmul.f32 1.442695, %v1557_v44  ;;  %v1572_v24 = vmul.f32 1.442695, %v1558_v43 }
 0x338   : > { %v1049_v26 = vpop.permute.xlu1 %1048  ;;  %v1551_v48 = vpop.xlane.xlu0 %1550  ;;  %v1576_v49 = vsel %vm1527_vm5, %v2787_v46, 0.0 }
 0x339   : > { %v2791_v50 = vpop.eup %2443  ;;  %v1056_v52 = vpack.i.b16 %v1049_v26, %v2739_v45  ;;  %v1059_v54 = vshrl.u32 %v1049_v26, 16  ;;  %v1559_v55 = vsub.f32 %v1526_v23, %v1551_v48  ;;  %1577 = vadd.xlane.f32.xlu1 %v1576_v49  ;;  %2451 = vpow2.f32 %v1570_v47 }
 0x33a   : > { %v1579_v56 = vsel %vm1527_vm5, %v2791_v50, 0.0  ;;  %2453 = vpow2.f32 %v1572_v24 }
 0x33b   : > { %v2797_v57 = vpop.eup %2445  ;;  %v1060_v0 = vpack.i.b16 %v1059_v54, %v1058_v51  ;;  %v1574_v58 = vmul.f32 1.442695, %v1559_v55  ;;  %1580 = vadd.xlane.f32.xlu0 %v1579_v56  ;;  %v1070_v62 = vcombine.high %v1056_v52, %v2643_v53  ;;  %v1077_v5 = vrot.slane %v1056_v52, %v2646_v60 }
 0x33c   : > { %v1053_v59 = vpop.permute.xlu1 %1052  ;;  %v1051_v61 = vpop.permute.xlu0 %1050  ;;  %v1582_v3 = vsel %vm1527_vm5, %v2797_v57, 0.0 }
 0x33d   : > { %2455 = vpow2.f32 %v1574_v58  ;;  %v1067_v63 = vshrl.u32 %v1053_v59, 16  ;;  %v1064_v45 = vpack.i.b16 %v1053_v59, %v1051_v61  ;;  %v1066_v1 = vshrl.u32 %v1051_v61, 16 }
 0x33e   : > { %v1136_v6 = vcombine.high %v1060_v0, %v2643_v53  ;;  %v1084_v12 = vrot.slane %v1070_v62, %v2646_v60  ;;  %v1143_v19 = vrot.slane %v1060_v0, %v2646_v60 }
 0x33f   : > { %v2802_v4 = vpop.eup %2447  ;;  %1583 = vadd.xlane.f32.xlu0 %v1582_v3  ;;  %v1068_v8 = vpack.i.b16 %v1067_v63, %v1066_v1  ;;  %v1085_v9 = vcombine.high %v1064_v45, %v2643_v53  ;;  %v1092_v10 = vrot.slane %v1064_v45, %v2646_v60 }
 0x340   : > { %v2806_v7 = vpop.eup %2449  ;;  %v1585_v11 = vsel %vm1527_vm5, %v2802_v4, 0.0  ;;  %v1150_v20 = vrot.slane %v1136_v6, %v2646_v60 }
 0x341   : > { %1586 = vadd.xlane.f32.xlu1 %v1585_v11  ;;  %v1588_v13 = vsel %vm1527_vm5, %v2806_v7, 0.0  ;;  %v1099_v14 = vrot.slane %v1085_v9, %v2646_v60  ;;  %v1100_v16 = vcombine.low %v1077_v5, %v1092_v10  ;;  %v1101_v17 = vcombine.high %v1077_v5, %v1092_v10 }
 0x342   : > { %v1151_v18 = vcombine.high %v1068_v8, %v2643_v53  ;;  %v1158_v22 = vrot.slane %v1068_v8, %v2646_v60 }
 0x343   : > { %1589 = vadd.xlane.f32.xlu0 %v1588_v13  ;;  %v2820_v23 = vpop.eup %2451  ;;  %v1108_v25 = vrot.slane %v1100_v16, %v2650_v2  ;;  %v1115_v27 = vrot.slane %v1101_v17, %v2650_v2  ;;  %v1116_v29 = vcombine.low %v1084_v12, %v1099_v14  ;;  %v1117_v15 = vcombine.high %v1084_v12, %v1099_v14 }
 0x344   : > { %v1165_v28 = vrot.slane %v1151_v18, %v2646_v60  ;;  %v1166_v30 = vcombine.low %v1143_v19, %v1158_v22  ;;  %v1167_v31 = vcombine.high %v1143_v19, %v1158_v22  ;;  %v1591_v53 = vsel %vm1527_vm5, %v2820_v23, 0.0  ;;  %v2827_v32 = vpop.eup %2453 }
 0x345   : > { %v1124_v33 = vrot.slane %v1116_v29, %v2650_v2  ;;  %v1131_v34 = vrot.slane %v1117_v15, %v2650_v2  ;;  %v1202_v35 = vcombine.low %v1108_v25, %v1115_v27  ;;  %v2242_v36 = vcombine.high %v1108_v25, %v1115_v27  ;;  %1592 = vadd.xlane.f32.xlu1 %v1591_v53 }
 0x346   : > { %v1174_v38 = vrot.slane %v1166_v30, %v2650_v2  ;;  %v1181_v39 = vrot.slane %v1167_v31, %v2650_v2  ;;  %v1182_v40 = vcombine.low %v1150_v20, %v1165_v28  ;;  %v1183_v41 = vcombine.high %v1150_v20, %v1165_v28 }
 0x347   : > { %v2831_v37 = vpop.eup %2455  ;;  %v1209_v42 = vrot.slane %v1202_v35, %v2646_v60  ;;  %v1217_v43 = vrot.slane %v2242_v36, %v2646_v60  ;;  %v1218_v44 = vcombine.low %v1124_v33, %v1131_v34  ;;  %v2243_v47 = vcombine.high %v1124_v33, %v1131_v34 }
 0x348   : > { %v1190_v24 = vrot.slane %v1182_v40, %v2650_v2  ;;  %v1197_v26 = vrot.slane %v1183_v41, %v2650_v2  ;;  %v1252_v48 = vcombine.low %v1174_v38, %v1181_v39  ;;  %v2244_v49 = vcombine.high %v1174_v38, %v1181_v39 }
 0x349   : > { %v1225_v51 = vrot.slane %v1218_v44, %v2646_v60  ;;  %v1233_v52 = vrot.slane %v2243_v47, %v2646_v60  ;;  %v1594_v54 = vsel %vm1527_vm5, %v2827_v32, 0.0  ;;  %v1597_v55 = vsel %vm1527_vm5, %v2831_v37, 0.0 }
 0x34a   : > { %v1259_v56 = vrot.slane %v1252_v48, %v2646_v60  ;;  %v1267_v0 = vrot.slane %v2244_v49, %v2646_v60  ;;  %v1268_v58 = vcombine.low %v1190_v24, %v1197_v26  ;;  %v2245_v59 = vcombine.high %v1190_v24, %v1197_v26  ;;  %1595 = vadd.xlane.f32.xlu0 %v1594_v54 }
 0x34b   : > { %1598 = vadd.xlane.f32.xlu1 %v1597_v55  ;;  %v1234_v61 = vcombine.low %v1209_v42, %v1217_v43  ;;  %v1242_v62 = vcombine.low %v1225_v51, %v1233_v52 }
 0x34c   : > { %v1275_v63 = vrot.slane %v1268_v58, %v2646_v60  ;;  %v1283_v45 = vrot.slane %v2245_v59, %v2646_v60  ;;  %v1284_v1 = vcombine.low %v1259_v56, %v1267_v0 }
 0x34d   : > { %v1241_v3 = vrot.slane %v1234_v61, %v2650_v2  ;;  %v1249_v5 = vrot.slane %v1242_v62, %v2650_v2 }
 0x34e   : > { %v1292_v6 = vcombine.low %v1275_v63, %v1283_v45  ;;  %v1291_v10 = vrot.slane %v1284_v1, %v2650_v2 }
 0x34f   : > { %v1250_v8 = vcombine.low %v1241_v3, %v1249_v5  ;;  %v1251_v9 = vcombine.high %v1241_v3, %v1249_v5 }
 0x350   : > { %v1299_v11 = vrot.slane %v1292_v6, %v2650_v2 }
 0x351   : > { %v1306_v14 = vshrl.u32 %v1250_v8, 16  ;;  %v1314_v16 = vshrl.u32 %v1251_v9, 16 }
 0x352   : > { %v1300_v12 = vcombine.low %v1291_v10, %v1299_v11  ;;  %v1301_v13 = vcombine.high %v1291_v10, %v1299_v11 }
 0x354   : > { %v1304_v17 = vpack.i.b16 %v1300_v12, %v1250_v8  ;;  %v1307_v18 = vshrl.u32 %v1300_v12, 16  ;;  %v1312_v19 = vpack.i.b16 %v1301_v13, %v1251_v9  ;;  %v1315_v20 = vshrl.u32 %v1301_v13, 16 }
 0x356   : > { %2342 = vmatpush3.bf16.msra.mxu0 %v1304_v17  ;;  %v1308_v22 = vpack.i.b16 %v1307_v18, %v1306_v14  ;;  %v1316_v25 = vpack.i.b16 %v1315_v20, %v1314_v16 }
 0x357   : > { %2353 = vmatprep.subr.bf16.mxu0 %v2517_v21 }
 0x358   : > { %2348 = vmatpush3.bf16.msra.mxu1 %v1308_v22 }
 0x359   : > { %2359 = vmatprep.subr.bf16.mxu1 %v2517_v21 }
 0x3c6   : > { %v1578_v27 = vpop.xlane.xlu1 %1577 }
 0x3c7   : > { %2457 = vrcp.f32 %v1578_v27 }
 0x3c8   : > { %v1581_v29 = vpop.xlane.xlu0 %1580 }
 0x3c9   : > { %2459 = vrcp.f32 %v1581_v29 }
 0x3cc   : > { %v1584_v15 = vpop.xlane.xlu0 %1583 }
 0x3cd   : > { %2461 = vrcp.f32 %v1584_v15 }
 0x3ce   : > { %v1587_v28 = vpop.xlane.xlu1 %1586 }
 0x3cf   : > { %2463 = vrcp.f32 %v1587_v28 }
 0x3d0   : > { %v1590_v30 = vpop.xlane.xlu0 %1589 }
 0x3d1   : > { %v2458_v31 = vpop.eup %2457  ;;  %2465 = vrcp.f32 %v1590_v30 }
 0x3d2   : > { %v1593_v33 = vpop.xlane.xlu1 %1592  ;;  %v1616_v34 = vmul.f32 %v2458_v31, %v2787_v46 }
 0x3d3   : > { %v2460_v53 = vpop.eup %2459  ;;  %2467 = vrcp.f32 %v1593_v33 }
 0x3d4   : > { %v1617_v35 = vmul.f32 %v2460_v53, %v2791_v50 }
 0x3d6   : > { %v1624_v36 = vpack.c.bf16 %v1617_v35, %v1616_v34 }
 0x3d7   : > { %v2462_v38 = vpop.eup %2461  ;;  %v1596_v39 = vpop.xlane.xlu0 %1595 }
 0x3d8   : > { %2344 = vmatmul.mubr.msk.bf16.vlgmr.msra.gmra.mrb[12].mxu0 %vm1527_vm5, %v1624_v36  ;;  %2469 = vrcp.f32 %v1596_v39  ;;  %v1599_v41 = vpop.xlane.xlu1 %1598  ;;  %v1618_v42 = vmul.f32 %v2462_v38, %v2797_v57 }
 0x3d9   : > { %v2464_v40 = vpop.eup %2463  ;;  %2354 = vmatpush3.bf16.msra.mxu0 %v1312_v19  ;;  %2355 = vmatprep.mubr.msk.bf16.mxu0 %vm2521_vm0, %v2517_v21  ;;  %2471 = vrcp.f32 %v1599_v41 }
 0x3da   : > { %v1619_v43 = vmul.f32 %v2464_v40, %v2802_v4 }
 0x3db   : > { %v2466_v46 = vpop.eup %2465 }
 0x3dc   : > { %v1625_v50 = vpack.c.bf16 %v1619_v43, %v1618_v42  ;;  %v1620_v47 = vmul.f32 %v2466_v46, %v2806_v7 }
 0x3dd   : > { %v2468_v44 = vpop.eup %2467 }
 0x3de   : > { %2350 = vmatmul.mubr.msk.bf16.vlgmr.msra.gmra.mrb[12].mxu1 %vm1527_vm5, %v1625_v50  ;;  %v1621_v24 = vmul.f32 %v2468_v44, %v2820_v23 }
 0x3df   : > { %2360 = vmatpush3.bf16.msra.mxu1 %v1316_v25  ;;  %2361 = vmatprep.mubr.msk.bf16.mxu1 %vm2521_vm0, %v2517_v21 }
 0x3e0   : > { %v1626_v26 = vpack.c.bf16 %v1621_v24, %v1620_v47 }
 0x3e2   : > { %v2470_v48 = vpop.eup %2469  ;;  %2356 = vmatmul.mubr.msk.bf16.vlgmr.msra.gmra.mrb[16].mxu0 %vm1527_vm5, %v1626_v26 }
 0x3e3   : > { %v2472_v57 = vpop.eup %2471  ;;  %v1622_v4 = vmul.f32 %v2470_v48, %v2827_v32 }
 0x3e4   : > { %v1623_v49 = vmul.f32 %v2472_v57, %v2831_v37 }
 0x3e6   : > { %v1627_v51 = vpack.c.bf16 %v1623_v49, %v1622_v4 }
 0x3e8   : > { %2362 = vmatmul.mubr.msk.bf16.vlgmr.msra.gmra.mrb[16].mxu1 %vm1527_vm5, %v1627_v51 }
 0x4ab   : > { %v1665_v52 = vpop.f32.mrb[12].mxu0 }
 0x4ac   : > { %v2345_v7 = vpop.f32.mrb[13].mxu0 }
 0x4ad   : > { %v1668_v54 = vpop.f32.mrb[14].mxu0 }
 0x4ae   : > { %v2346_v23 = vpop.f32.mrb[15].mxu0 }
 0x4b1   : > { %v1709_v55 = vpop.f32.mrb[12].mxu1 }
 0x4b2   : > { %v2351_v56 = vpop.f32.mrb[13].mxu1 }
 0x4b3   : > { %v1712_v0 = vpop.f32.mrb[14].mxu1 }
 0x4b4   : > { %v2352_v21 = vpop.f32.mrb[15].mxu1 }
 0x4b5   : > { %v1753_v58 = vpop.f32.mrb[16].mxu0 }
 0x4b6   : > { %v1804_v59 = vcombine.low %v1665_v52, %v1753_v58  ;;  %v1805_v61 = vcombine.high %v1665_v52, %v1753_v58  ;;  %v2357_v62 = vpop.f32.mrb[17].mxu0 }
 0x4b7   : > { %v1756_v63 = vpop.f32.mrb[18].mxu0 }
 0x4b8   : > { %v1872_v45 = vcombine.low %v1668_v54, %v1756_v63  ;;  %v1873_v32 = vcombine.high %v1668_v54, %v1756_v63  ;;  %v2358_v1 = vpop.f32.mrb[19].mxu0  ;;  %v1812_v8 = vrot.slane %v1804_v59, %v2646_v60  ;;  %v1819_v9 = vrot.slane %v1805_v61, %v2646_v60 }
 0x4ba   : > { %v1880_v22 = vrot.slane %v1872_v45, %v2646_v60  ;;  %v1887_v25 = vrot.slane %v1873_v32, %v2646_v60 }
 0x4bb   : > { %v1797_v37 = vpop.f32.mrb[16].mxu1 }
 0x4bc   : > { %v1820_v3 = vcombine.low %v1709_v55, %v1797_v37  ;;  %v1821_v5 = vcombine.high %v1709_v55, %v1797_v37  ;;  %v2363_v6 = vpop.f32.mrb[17].mxu1 }
 0x4bd   : > { %v1800_v10 = vpop.f32.mrb[18].mxu1 }
 0x4be   : > { %v1828_v11 = vrot.slane %v1820_v3, %v2646_v60  ;;  %v1835_v12 = vrot.slane %v1821_v5, %v2646_v60  ;;  %v1888_v13 = vcombine.low %v1712_v0, %v1800_v10  ;;  %v1889_v14 = vcombine.high %v1712_v0, %v1800_v10  ;;  %v2364_v16 = vpop.f32.mrb[19].mxu1 }
 0x4c0   : > { %v1836_v17 = vcombine.low %v1812_v8, %v1828_v11  ;;  %v1837_v18 = vcombine.high %v1812_v8, %v1828_v11  ;;  %v1852_v19 = vcombine.low %v1819_v9, %v1835_v12  ;;  %v1853_v20 = vcombine.high %v1819_v9, %v1835_v12 }
 0x4c1   : > { %v1896_v27 = vrot.slane %v1888_v13, %v2646_v60  ;;  %v1903_v29 = vrot.slane %v1889_v14, %v2646_v60 }
 0x4c2   : > { %v1844_v15 = vrot.slane %v1836_v17, %v2650_v2  ;;  %v1851_v28 = vrot.slane %v1837_v18, %v2650_v2  ;;  %v1860_v30 = vrot.slane %v1852_v19, %v2650_v2  ;;  %v1867_v31 = vrot.slane %v1853_v20, %v2650_v2 }
 0x4c3   : > { %v1904_v53 = vcombine.low %v1880_v22, %v1896_v27  ;;  %v1905_v33 = vcombine.high %v1880_v22, %v1896_v27  ;;  %v1920_v34 = vcombine.low %v1887_v25, %v1903_v29  ;;  %v1921_v35 = vcombine.high %v1887_v25, %v1903_v29 }
 0x4c4   : > { %v1940_v36 = vcombine.low %v1844_v15, %v1851_v28  ;;  %v2254_v38 = vcombine.high %v1844_v15, %v1851_v28  ;;  %v1956_v39 = vcombine.low %v1860_v30, %v1867_v31  ;;  %v2255_v40 = vcombine.high %v1860_v30, %v1867_v31 }
 0x4c5   : > { %v1912_v41 = vrot.slane %v1904_v53, %v2650_v2  ;;  %v1919_v42 = vrot.slane %v1905_v33, %v2650_v2  ;;  %v1928_v43 = vrot.slane %v1920_v34, %v2650_v2  ;;  %v1935_v46 = vrot.slane %v1921_v35, %v2650_v2 }
 0x4c6   : > { %v1947_v50 = vrot.slane %v1940_v36, %v2646_v60  ;;  %v1955_v44 = vrot.slane %v2254_v38, %v2646_v60  ;;  %v1963_v47 = vrot.slane %v1956_v39, %v2646_v60  ;;  %v1971_v24 = vrot.slane %v2255_v40, %v2646_v60 }
 0x4c7   : > { %v2008_v26 = vcombine.low %v1912_v41, %v1919_v42  ;;  %v2256_v48 = vcombine.high %v1912_v41, %v1919_v42  ;;  %v2024_v57 = vcombine.low %v1928_v43, %v1935_v46  ;;  %v2257_v4 = vcombine.high %v1928_v43, %v1935_v46 }
 0x4c8   : > { %v1973_v49 = vcombine.high %v1947_v50, %v1955_v44  ;;  %v1989_v51 = vcombine.high %v1963_v47, %v1971_v24  ;;  %v1972_v52 = vcombine.low %v1947_v50, %v1955_v44  ;;  %v1988_v7 = vcombine.low %v1963_v47, %v1971_v24 }
 0x4c9   : > { %v2015_v54 = vrot.slane %v2008_v26, %v2646_v60  ;;  %v2023_v23 = vrot.slane %v2256_v48, %v2646_v60  ;;  %v2031_v55 = vrot.slane %v2024_v57, %v2646_v60  ;;  %v2039_v56 = vrot.slane %v2257_v4, %v2646_v60 }
 0x4ca   : > { %v1987_v0 = vrot.slane %v1973_v49, %v2650_v2  ;;  %v2003_v21 = vrot.slane %v1989_v51, %v2650_v2  ;;  %v1980_v58 = vrot.slane %v1972_v52, %v2650_v2  ;;  %v1996_v59 = vrot.slane %v1988_v7, %v2650_v2 }
 0x4cb   : > { %v2041_v61 = vcombine.high %v2015_v54, %v2023_v23  ;;  %v2057_v62 = vcombine.high %v2031_v55, %v2039_v56  ;;  %v2040_v63 = vcombine.low %v2015_v54, %v2023_v23  ;;  %v2056_v45 = vcombine.low %v2031_v55, %v2039_v56 }
 0x4cc   : > { %v2006_v32 = vcombine.low %v1987_v0, %v2003_v21  ;;  %v2005_v1 = vcombine.high %v1980_v58, %v1996_v59  ;;  %v2007_v37 = vcombine.high %v1987_v0, %v2003_v21  ;;  %v2004_v3 = vcombine.low %v1980_v58, %v1996_v59 }
 0x4cd   : > { %v2055_v5 = vrot.slane %v2041_v61, %v2650_v2  ;;  %v2071_v60 = vrot.slane %v2057_v62, %v2650_v2  ;;  %v2048_v6 = vrot.slane %v2040_v63, %v2650_v2  ;;  %v2064_v8 = vrot.slane %v2056_v45, %v2650_v2 }
 0x4cf   : > { %v2074_v9 = vcombine.low %v2055_v5, %v2071_v60  ;;  %v2073_v10 = vcombine.high %v2048_v6, %v2064_v8  ;;  %v2075_v11 = vcombine.high %v2055_v5, %v2071_v60  ;;  %v2072_v12 = vcombine.low %v2048_v6, %v2064_v8 }
 0x4d1   : > { %v2399_v13 = vpack.i.bf16 %v2074_v9, %v2006_v32  ;;  %v2394_v14 = vpack.i.bf16 %v2073_v10, %v2005_v1  ;;  %v2404_v16 = vpack.i.bf16 %v2075_v11, %v2007_v37 }
 0x4d3   : > { %2400 = vrot.lane.b32.xlu1 %v2399_v13, %s2520_s17  ;;  %2395 = vrot.lane.b32.xlu0 %v2394_v14, %s2518_s13 }
 0x4d7   : > { %2405 = vrot.lane.b32.xlu1 %v2404_v16, %s2519_s14 }
 0x545   : > { %v2401_v17 = vpop.permute.xlu1 %2400  ;;  %v2396_v18 = vpop.permute.xlu0 %2395 }
 0x546   : > { %v2398_v19 = vunpack.i.h.bf16 %v2396_v18  ;;  %v2397_v20 = vunpack.i.l.bf16 %v2396_v18  ;;  %v2403_v22 = vunpack.i.h.bf16 %v2401_v17  ;;  %v2402_v2 = vunpack.i.l.bf16 %v2401_v17 }
 0x548   : > { %v2100_v25 = vsel %vm1318_vm1, %v2004_v3, %v2397_v20  ;;  %v2101_v27 = vsel %vm1318_vm1, %v2072_v12, %v2398_v19 }
 0x549   : > { %v2406_v29 = vpop.permute.xlu1 %2405  ;;  %v2103_v30 = vsel %vm2102_vm7, %v2100_v25, %v2402_v2  ;;  %v2104_v31 = vsel %vm2102_vm7, %v2101_v27, %v2403_v22 }
 0x54a   : > { %v2408_v15 = vunpack.i.h.bf16 %v2406_v29  ;;  %v2407_v28 = vunpack.i.l.bf16 %v2406_v29 }
 0x54c   : > { %v2106_v53 = vsel %vm2105_vm8, %v2103_v30, %v2407_v28  ;;  %v2107_v33 = vsel %vm2105_vm8, %v2104_v31, %v2408_v15 }
 0x54d   : > { %v2270_v34 = vpack.c.bf16 %v2107_v33, %v2106_v53 }
 0x54f   : > { %2271 = vst [vmem:[%s232_s24] sm:$0xff] %v2270_v34  }
 0x550 PF: > { %s15_s15 = sadd.s32 1, %s2511_s15  }
 0x551   : > { %p12_p3 = scmp.ge.s32.totalorder %s15_s15, 4  }
 0x553   :  { %14 = sbr.rel (!%p12_p3) target bundleno = 1 (0x1), region = 74 }
 0x55a   :  { %2139 = vsyncpa [#allocation3], 1 }
 0x55b   :  { %2141 = vsyncpa [#allocation3 + $0x1], 1 }

// kernel: decoder_layer.7
= control target key start
LH: loop header
LB: loop body
LE: loop exit
PB: predicated region body
PF: predicated region fallthrough
CT: control target
= control target key end

     0   :  { %s2609_s24 = smov 0   ;;  %s3000_s0 = inlined_call_operand.vmem [shape: f32[2,16,128], index: 0, kind: input, shape index: {}]   ;;  %s3001_s1 = inlined_call_operand.vmem [shape: f32[2,16,128], index: 1, kind: input, shape index: {}]   ;;  %s3002_s2 = inlined_call_operand.vmem [shape: bf16[2,16,16], index: 2, kind: input, shape index: {}]   ;;  %s3003_s3 = inlined_call_operand.vmem [shape: bf16[128,128], index: 3, kind: input, shape index: {}]   ;;  %s3004_s4 = inlined_call_operand.vmem [shape: f32[1,128], index: 4, kind: input, shape index: {}]   ;;  %s3005_s5 = inlined_call_operand.vmem [shape: bf16[128,256], index: 5, kind: input, shape index: {}]   ;;  %s3006_s6 = inlined_call_operand.vmem [shape: f32[1,256], index: 6, kind: input, shape index: {}]   ;;  %s3007_s7 = inlined_call_operand.vmem [shape: bf16[2,16,128], index: 7, kind: output, shape index: {}]  }
   0x1 LB: > { %s2288_s25 = sadd.s32 4294967295, %s2559_s24   ;;  %p2292_p0 = scmp.ge.s32.totalorder %s2559_s24, 1  ;;  %s2559_s24 = sphi %s2609_s24, %s17_s24  }
   0x2   : > { %p257_p1 = scmp.lt.s32.totalorder %s2559_s24, 3 }
   0x4   : > { %p258_p2 = pnand %p2292_p0, %p257_p1 }
   0x5   : > { %v2489_v0 = vld [vmem:[%s3005_s5 + $0x4] ss:$8 sps:$4 sm:$0xff] (!%p258_p2)   ;;  %v2491_v1 = vld [vmem:[%s3005_s5] ss:$8 sps:$4 sm:$0xff] (!%p258_p2)   ;;  %v2561_v2 = vmov (!%p258_p2), 0.0   ;;  %v2562_v3 = vmov (!%p258_p2), 0   ;;  %v458_v32 = vlaneseq (!%p258_p2) }
   0x6   : > { %261 = sbr.rel (%p258_p2) target bundleno = 1323 (0x52b), region = 48  ;;  %2390 = vmatprep.subr.bf16.mxu0 (!%p258_p2), %v2561_v2  ;;  %580 = vmatprep.mubr.bf16.mxu1 (!%p258_p2), %v2562_v3  ;;  %v2492_v4 = vld [vmem:[%s3003_s3] sm:$0xff] (!%p258_p2)   ;;  %v2493_v5 = vld [vmem:[%s3005_s5 + $0x14] ss:$8 sps:$4 sm:$0xff] (!%p258_p2)   ;;  %v2495_v6 = vld [vmem:[%s3005_s5 + $0x10] ss:$8 sps:$4 sm:$0xff] (!%p258_p2)  }
   0x7   : > { %548 = vmatprep.subr.bf16.mxu1 (!%p258_p2), %v2489_v0  ;;  %vm2563_vm0 = vmmov (!%p258_p2), 0   ;;  %2391 = vmatpush3.bf16.msra.mxu0 (!%p258_p2), %v2492_v4  ;;  %v2496_v7 = vld [vmem:[%s3003_s3 + $0x8] sm:$0xff] (!%p258_p2)   ;;  %v2500_v10 = vld [vmem:[%s3003_s3 + $0x10] sm:$0xff] (!%p258_p2)   ;;  %v2504_v13 = vld [vmem:[%s3003_s3 + $0x18] sm:$0xff] (!%p258_p2)   ;;  %p299_p3 = scmp.lt.s32.totalorder (!%p258_p2), %s2288_s25, 1  ;;  %v459_v33 = vshrl.u32 (!%p258_p2), %v458_v32, 7  ;;  %v2735_v0 = vpack.i.b16 (!%p258_p2), %v2562_v3, %v2562_v3 }
   0x8   : > { %549 = vmatpush1.bf16.msra.mxu1 (!%p258_p2), %v2491_v1  ;;  %2406 = vmatprep.mubr.msk.bf16.mxu0 (!%p258_p2), %vm2563_vm0, %v2561_v2  ;;  %v2497_v8 = vld [vmem:[%s3005_s5 + $0x24] ss:$8 sps:$4 sm:$0xff] (!%p258_p2)   ;;  %v2499_v9 = vld [vmem:[%s3005_s5 + $0x20] ss:$8 sps:$4 sm:$0xff] (!%p258_p2)   ;;  %v2501_v11 = vld [vmem:[%s3005_s5 + $0x34] ss:$8 sps:$4 sm:$0xff] (!%p258_p2)  }
   0x9   : > { %550 = vmatprep.subr.bf16.mxu1 (!%p258_p2), %v2493_v5  ;;  %2392 = vmatprep.subr.bf16.mxu0 (!%p258_p2), %v2561_v2  ;;  %v2503_v12 = vld [vmem:[%s3005_s5 + $0x30] ss:$8 sps:$4 sm:$0xff] (!%p258_p2)   ;;  %v2505_v14 = vld [vmem:[%s3005_s5 + $0x44] ss:$8 sps:$4 sm:$0xff] (!%p258_p2)   ;;  %v2507_v15 = vld [vmem:[%s3005_s5 + $0x40] ss:$8 sps:$4 sm:$0xff] (!%p258_p2)  }
   0xa   : > { %v2508_v16 = vld [vmem:[%s3003_s3 + $0x20] sm:$0xff] (!%p258_p2)   ;;  %v2509_v17 = vld [vmem:[%s3005_s5 + $0x54] ss:$8 sps:$4 sm:$0xff] (!%p258_p2)   ;;  %v2511_v18 = vld [vmem:[%s3005_s5 + $0x50] ss:$8 sps:$4 sm:$0xff] (!%p258_p2)   ;;  %v460_v34 = vsub.s32 (!%p258_p2), 0, %v459_v33 }
   0xb   : > { %2393 = vmatpush3.bf16.msra.mxu0 (!%p258_p2), %v2496_v7  ;;  %v2512_v19 = vld [vmem:[%s3003_s3 + $0x28] sm:$0xff] (!%p258_p2)   ;;  %v2516_v22 = vld [vmem:[%s3003_s3 + $0x30] sm:$0xff] (!%p258_p2)   ;;  %v2520_v27 = vld [vmem:[%s3003_s3 + $0x38] sm:$0xff] (!%p258_p2)   ;;  %v464_v36 = vsub.s32 (!%p258_p2), 1, %v459_v33  ;;  %s2565_s21 = smov (!%p258_p2), 96   ;;  %s2566_s22 = smov (!%p258_p2), 64  }
   0xc   : > { %551 = vmatpush1.bf16.msra.mxu1 (!%p258_p2), %v2495_v6  ;;  %2394 = vmatprep.subr.bf16.mxu0 (!%p258_p2), %v2561_v2  ;;  %v2513_v20 = vld [vmem:[%s3005_s5 + $0x64] ss:$8 sps:$4 sm:$0xff] (!%p258_p2)   ;;  %v2515_v21 = vld [vmem:[%s3005_s5 + $0x60] ss:$8 sps:$4 sm:$0xff] (!%p258_p2)   ;;  %v2517_v23 = vld [vmem:[%s3005_s5 + $0x74] ss:$8 sps:$4 sm:$0xff] (!%p258_p2)  }
   0xd   : > { %552 = vmatprep.subr.bf16.mxu1 %v2497_v8  ;;  %s3013_s25 = smov (!%p299_p3, %s2288_s25), 1  ;;  %v2519_v24 = vld [vmem:[%s3005_s5 + $0x70] ss:$8 sps:$4 sm:$0xff]   ;;  %v456_v35 = vld [vmem:[%s3006_s6] sm:$0x3]  ;;  %vm1409_vm1 = vcmask 261120  }
   0xe   : > { %s2354_s20 = sshll.u32 %s3013_s25, 4  ;;  %v461_v37 = vrot.slane %v456_v35, %v460_v34  ;;  %v2301_v38 = vld [vmem:[%s3004_s4] ss:$0 sm:$0xff]  ;;  %v465_v40 = vrot.slane %v456_v35, %v464_v36  ;;  %v2567_v59 = vmov 1983009808   ;;  %s2356_s23 = sshll.u32 %s3013_s25, 3 }
   0xf   : > { %2395 = vmatpush3.bf16.msra.mxu0 %v2500_v10  ;;  %s308_s8 = scalar_lea.vmem %s3001_s1, %s2354_s20  ;;  %s303_s11 = scalar_lea.vmem %s3000_s0, %s2354_s20  ;;  %v627_v60 = vunpack.c.l.s4 %v2567_v59  ;;  %v2568_v61 = vmov 1934713408   ;;  %vm1618_vm5 = vcmask 130048   ;;  %vm2193_vm7 = vcmask 523264  }
  0x10   : > { %553 = vmatpush1.bf16.msra.mxu1 %v2499_v9  ;;  %2396 = vmatprep.subr.bf16.mxu0 %v2561_v2  ;;  %v325_v25 = vld [vmem:[%s308_s8] sm:$0xff]  ;;  %v326_v26 = vld [vmem:[%s308_s8 + $0x8] sm:$0xff]  ;;  %s2564_s20 = smov 32   ;;  %v658_v62 = vunpack.c.l.s4 %v2568_v61  ;;  %s313_s28 = scalar_lea.vmem %s3002_s2, %s2356_s23  ;;  %vm2196_vm8 = vcmask 785408  }
  0x11   : > { %554 = vmatprep.subr.bf16.mxu1 %v2501_v11  ;;  %v322_v28 = vld [vmem:[%s303_s11] sm:$0xff]  ;;  %v323_v29 = vld [vmem:[%s303_s11 + $0x8] sm:$0xff]  ;;  %v327_v30 = vpack.c.bf16 %v326_v26, %v325_v25  ;;  %v628_v63 = vunpack.c.0.s8 %v627_v60  ;;  %s318_s8 = scalar_lea.vmem %s3007_s7, %s2356_s23 }
  0x12   : > { %v324_v31 = vpack.c.bf16 %v323_v29, %v322_v28  ;;  %v659_v5 = vunpack.c.0.s8 %v658_v62 }
  0x13   : > { %2397 = vmatpush3.bf16.msra.mxu0 %v2504_v13  ;;  %v2737_v9 = vsub.s32 %v628_v63, %v459_v33 }
  0x14   : > { %555 = vmatpush1.bf16.msra.mxu1 %v2503_v12  ;;  %2398 = vmatprep.subr.bf16.mxu0 %v2561_v2 }
  0x15   : > { %556 = vmatprep.subr.bf16.mxu1 %v2505_v14  ;;  %v2740_v14 = vsub.s32 %v659_v5, %v459_v33 }
  0x17   : > { %2399 = vmatpush3.bf16.msra.mxu0 %v2508_v16 }
  0x18   : > { %557 = vmatpush1.bf16.msra.mxu1 %v2507_v15  ;;  %2400 = vmatprep.subr.bf16.mxu0 %v2561_v2 }
  0x19   : > { %558 = vmatprep.subr.bf16.mxu1 %v2509_v17 }
  0x1b   : > { %2401 = vmatpush3.bf16.msra.mxu0 %v2512_v19 }
  0x1c   : > { %559 = vmatpush1.bf16.msra.mxu1 %v2511_v18  ;;  %2402 = vmatprep.subr.bf16.mxu0 %v2561_v2 }
  0x1d   : > { %560 = vmatprep.subr.bf16.mxu1 %v2513_v20 }
  0x1f   : > { %2403 = vmatpush3.bf16.msra.mxu0 %v2516_v22 }
  0x20   : > { %561 = vmatpush1.bf16.msra.mxu1 %v2515_v21  ;;  %2404 = vmatprep.subr.bf16.mxu0 %v2561_v2 }
  0x21   : > { %562 = vmatprep.subr.bf16.mxu1 %v2517_v23 }
  0x23   : > { %2405 = vmatpush3.bf16.msra.mxu0 %v2520_v27 }
  0x24   : > { %563 = vmatpush1.bf16.msra.mxu1 %v2519_v24  ;;  %2410 = vmatprep.subr.bf16.mxu0 %v2561_v2 }
  0x25   : > { %2416 = vmatprep.subr.bf16.mxu1 %v2561_v2 }
  0x26   : > { %2407 = vmatmul.mubr.bf16.vlgmr.msra.gmra.mrb[0].mxu0 %v324_v31 }
  0x27   : > { %581 = vmatmul.mubr.bf16.vlgmr.msra.gmra.mrb[0].mxu1 %v327_v30  ;;  %2412 = vmatprep.mubr.msk.bf16.mxu0 %vm2563_vm0, %v2561_v2 }
  0x28   : > { %2418 = vmatprep.mubr.msk.bf16.mxu1 %vm2563_vm0, %v2561_v2 }
  0xf9   : > { %v433_v42 = vpop.f32.mrb[0].mxu0 }
  0xfa   : > { %v582_v39 = vpop.f32.mrb[0].mxu1  ;;  %v434_v43 = vadd.f32 %v2301_v38, %v433_v42  ;;  %v2408_v45 = vpop.f32.mrb[1].mxu0 }
  0xfb   : > { %v584_v41 = vpop.f32.mrb[1].mxu1  ;;  %v583_v46 = vadd.f32 %v582_v39, %v461_v37  ;;  %v436_v49 = vpop.f32.mrb[2].mxu0 }
  0xfc   : > { %v586_v44 = vpop.f32.mrb[2].mxu1  ;;  %v585_v50 = vadd.f32 %v584_v41, %v465_v40  ;;  %v593_v51 = vmul.f32 0.17677669, %v434_v43  ;;  %v437_v53 = vadd.f32 %v2301_v38, %v436_v49  ;;  %v2409_v54 = vpop.f32.mrb[3].mxu0 }
  0xfd   : > { %v587_v47 = vadd.f32 %v586_v44, %v461_v37  ;;  %v588_v48 = vpop.f32.mrb[3].mxu1 }
  0xfe   : > { %v589_v52 = vadd.f32 %v588_v48, %v465_v40  ;;  %v594_v57 = vmul.f32 0.17677669, %v437_v53 }
  0xff   : > { %v869_v55 = vpack.c.bf16 %v587_v47, %v583_v46 }
 0x100   : > { %v2725_v56 = vpack.c.bf16 %v589_v52, %v585_v50  ;;  %v595_v58 = vpack.c.bf16 %v594_v57, %v593_v51 }
 0x101   : > { %875 = vrot.lane.b32.xlu1 %v869_v55, %s2564_s20  ;;  %871 = vrot.lane.b32.xlu0 %v869_v55, %s2565_s21  ;;  %v881_v7 = vshrl.u32 %v869_v55, 16 }
 0x102   : > { %v607_v24 = vshrl.u32 %v595_v58, 16 }
 0x105   : > { %873 = vrot.lane.b32.xlu0 %v869_v55, %s2566_s22  ;;  %597 = vrot.lane.b32.xlu1 %v595_v58, %s2565_s21 }
 0x109   : > { %599 = vrot.lane.b32.xlu0 %v595_v58, %s2566_s22  ;;  %601 = vrot.lane.b32.xlu1 %v595_v58, %s2564_s20 }
 0x173   : > { %v876_v1 = vpop.permute.xlu1 %875  ;;  %v872_v4 = vpop.permute.xlu0 %871 }
 0x174   : > { %v879_v6 = vpack.i.b16 %v872_v4, %v869_v55  ;;  %v882_v8 = vshrl.u32 %v872_v4, 16  ;;  %v890_v17 = vshrl.u32 %v876_v1, 16 }
 0x176   : > { %v883_v10 = vpack.i.b16 %v882_v8, %v881_v7  ;;  %v893_v11 = vcombine.high %v879_v6, %v2735_v0  ;;  %v900_v21 = vrot.slane %v879_v6, %v2737_v9 }
 0x177   : > { %v874_v12 = vpop.permute.xlu0 %873  ;;  %v598_v13 = vpop.permute.xlu1 %597 }
 0x178   : > { %v959_v15 = vcombine.high %v883_v10, %v2735_v0  ;;  %v887_v16 = vpack.i.b16 %v876_v1, %v874_v12  ;;  %v889_v18 = vshrl.u32 %v874_v12, 16  ;;  %v605_v19 = vpack.i.b16 %v598_v13, %v595_v58 }
 0x179   : > { %v608_v20 = vshrl.u32 %v598_v13, 16  ;;  %v907_v25 = vrot.slane %v893_v11, %v2737_v9  ;;  %v966_v26 = vrot.slane %v883_v10, %v2737_v9 }
 0x17a   : > { %v908_v22 = vcombine.high %v887_v16, %v2735_v0  ;;  %v915_v23 = vrot.slane %v887_v16, %v2737_v9  ;;  %v973_v27 = vrot.slane %v959_v15, %v2737_v9  ;;  %v891_v28 = vpack.i.b16 %v890_v17, %v889_v18 }
 0x17b   : > { %v609_v32 = vpack.i.b16 %v608_v20, %v607_v24  ;;  %v600_v33 = vpop.permute.xlu0 %599  ;;  %v625_v36 = vcombine.high %v605_v19, %v2735_v0  ;;  %v632_v37 = vrot.slane %v605_v19, %v2737_v9  ;;  %v602_v54 = vpop.permute.xlu1 %601 }
 0x17c   : > { %v922_v29 = vrot.slane %v908_v22, %v2737_v9  ;;  %v923_v30 = vcombine.low %v900_v21, %v915_v23  ;;  %v924_v31 = vcombine.high %v900_v21, %v915_v23  ;;  %v974_v34 = vcombine.high %v891_v28, %v2735_v0 }
 0x17d   : > { %v981_v35 = vrot.slane %v891_v28, %v2737_v9  ;;  %v615_v45 = vshrl.u32 %v600_v33, 16  ;;  %v691_v63 = vcombine.high %v609_v32, %v2735_v0  ;;  %v639_v1 = vrot.slane %v625_v36, %v2737_v9 }
 0x17e   : > { %v931_v38 = vrot.slane %v923_v30, %v2740_v14  ;;  %v938_v39 = vrot.slane %v924_v31, %v2740_v14  ;;  %v939_v40 = vcombine.low %v907_v25, %v922_v29  ;;  %v940_v41 = vcombine.high %v907_v25, %v922_v29 }
 0x17f   : > { %v988_v42 = vrot.slane %v974_v34, %v2737_v9  ;;  %v989_v43 = vcombine.low %v966_v26, %v981_v35  ;;  %v990_v44 = vcombine.high %v966_v26, %v981_v35  ;;  %v613_v4 = vpack.i.b16 %v602_v54, %v600_v33 }
 0x180   : > { %v947_v46 = vrot.slane %v939_v40, %v2740_v14  ;;  %v954_v47 = vrot.slane %v940_v41, %v2740_v14  ;;  %v1025_v48 = vcombine.low %v931_v38, %v938_v39  ;;  %v2330_v49 = vcombine.high %v931_v38, %v938_v39 }
 0x181   : > { %v997_v50 = vrot.slane %v989_v43, %v2740_v14  ;;  %v1004_v51 = vrot.slane %v990_v44, %v2740_v14  ;;  %v1005_v52 = vcombine.low %v973_v27, %v988_v42  ;;  %v1006_v53 = vcombine.high %v973_v27, %v988_v42 }
 0x182   : > { %v1032_v55 = vrot.slane %v1025_v48, %v2737_v9  ;;  %v1040_v57 = vrot.slane %v2330_v49, %v2737_v9  ;;  %v1041_v58 = vcombine.low %v947_v46, %v954_v47  ;;  %v2331_v59 = vcombine.high %v947_v46, %v954_v47 }
 0x183   : > { %v1013_v60 = vrot.slane %v1005_v52, %v2740_v14  ;;  %v1020_v61 = vrot.slane %v1006_v53, %v2740_v14  ;;  %v1075_v62 = vcombine.low %v997_v50, %v1004_v51  ;;  %v616_v5 = vshrl.u32 %v602_v54, 16 }
 0x184   : > { %v1048_v6 = vrot.slane %v1041_v58, %v2737_v9  ;;  %v2332_v7 = vcombine.high %v997_v50, %v1004_v51  ;;  %v1056_v10 = vrot.slane %v2331_v59, %v2737_v9  ;;  %v1057_v11 = vcombine.low %v1032_v55, %v1040_v57 }
 0x185   : > { %v1091_v8 = vcombine.low %v1013_v60, %v1020_v61  ;;  %v698_v12 = vrot.slane %v609_v32, %v2737_v9  ;;  %v617_v13 = vpack.i.b16 %v616_v5, %v615_v45  ;;  %v640_v15 = vcombine.high %v613_v4, %v2735_v0 }
 0x186   : > { %v647_v16 = vrot.slane %v613_v4, %v2737_v9  ;;  %v2333_v17 = vcombine.high %v1013_v60, %v1020_v61  ;;  %v705_v18 = vrot.slane %v691_v63, %v2737_v9  ;;  %v1065_v19 = vcombine.low %v1048_v6, %v1056_v10 }
 0x187   : > { %v1082_v20 = vrot.slane %v1075_v62, %v2737_v9  ;;  %v654_v21 = vrot.slane %v640_v15, %v2737_v9  ;;  %v706_v24 = vcombine.high %v617_v13, %v2735_v0  ;;  %v713_v25 = vrot.slane %v617_v13, %v2737_v9 }
 0x188   : > { %v655_v22 = vcombine.low %v632_v37, %v647_v16  ;;  %v656_v23 = vcombine.high %v632_v37, %v647_v16  ;;  %v1064_v26 = vrot.slane %v1057_v11, %v2740_v14  ;;  %v1090_v27 = vrot.slane %v2332_v7, %v2737_v9 }
 0x189   : > { %v1098_v28 = vrot.slane %v1091_v8, %v2737_v9  ;;  %v671_v31 = vcombine.low %v639_v1, %v654_v21  ;;  %v672_v32 = vcombine.high %v639_v1, %v654_v21  ;;  %v720_v33 = vrot.slane %v706_v24, %v2737_v9 }
 0x18a   : > { %v663_v29 = vrot.slane %v655_v22, %v2740_v14  ;;  %v670_v30 = vrot.slane %v656_v23, %v2740_v14  ;;  %v721_v34 = vcombine.low %v698_v12, %v713_v25  ;;  %v722_v35 = vcombine.high %v698_v12, %v713_v25 }
 0x18b   : > { %v1072_v36 = vrot.slane %v1065_v19, %v2740_v14  ;;  %v679_v37 = vrot.slane %v671_v31, %v2740_v14  ;;  %v686_v38 = vrot.slane %v672_v32, %v2740_v14  ;;  %v737_v43 = vcombine.low %v705_v18, %v720_v33 }
 0x18c   : > { %v757_v39 = vcombine.low %v663_v29, %v670_v30  ;;  %v2326_v40 = vcombine.high %v663_v29, %v670_v30  ;;  %v729_v41 = vrot.slane %v721_v34, %v2740_v14  ;;  %v736_v42 = vrot.slane %v722_v35, %v2740_v14 }
 0x18d   : > { %v738_v44 = vcombine.high %v705_v18, %v720_v33  ;;  %v773_v45 = vcombine.low %v679_v37, %v686_v38  ;;  %v2327_v46 = vcombine.high %v679_v37, %v686_v38  ;;  %v1106_v47 = vrot.slane %v2333_v17, %v2737_v9 }
 0x18e   : > { %v1107_v48 = vcombine.low %v1082_v20, %v1090_v27  ;;  %v745_v49 = vrot.slane %v737_v43, %v2740_v14  ;;  %v807_v51 = vcombine.low %v729_v41, %v736_v42  ;;  %v2328_v52 = vcombine.high %v729_v41, %v736_v42 }
 0x18f   : > { %v752_v50 = vrot.slane %v738_v44, %v2740_v14  ;;  %v764_v53 = vrot.slane %v757_v39, %v2737_v9  ;;  %v772_v54 = vrot.slane %v2326_v40, %v2737_v9  ;;  %v780_v55 = vrot.slane %v773_v45, %v2737_v9  ;;  %v591_v44 = vld [vmem:[%s313_s28] sm:$0xf]  ;;  %v592_v45 = vld [vmem:[%s313_s28 + $0x4] sm:$0xf] }
 0x190   : > { %v788_v57 = vrot.slane %v2327_v46, %v2737_v9  ;;  %v814_v58 = vrot.slane %v807_v51, %v2737_v9  ;;  %v822_v59 = vrot.slane %v2328_v52, %v2737_v9  ;;  %v1115_v62 = vcombine.low %v1098_v28, %v1106_v47 }
 0x191   : > { %v823_v60 = vcombine.low %v745_v49, %v752_v50  ;;  %v2329_v61 = vcombine.high %v745_v49, %v752_v50  ;;  %v1073_v5 = vcombine.low %v1064_v26, %v1072_v36  ;;  %v1114_v7 = vrot.slane %v1107_v48, %v2740_v14 }
 0x192   : > { %v797_v63 = vcombine.low %v780_v55, %v788_v57  ;;  %v839_v6 = vcombine.low %v814_v58, %v822_v59  ;;  %v1122_v8 = vrot.slane %v1115_v62, %v2740_v14  ;;  %v789_v10 = vcombine.low %v764_v53, %v772_v54 }
 0x193   : > { %v830_v1 = vrot.slane %v823_v60, %v2737_v9  ;;  %v838_v4 = vrot.slane %v2329_v61, %v2737_v9  ;;  %v1128_v13 = vshrl.u32 %v1073_v5, 16  ;;  %v1074_v25 = vcombine.high %v1064_v26, %v1072_v36 }
 0x194   : > { %v1123_v12 = vcombine.low %v1114_v7, %v1122_v8  ;;  %v804_v15 = vrot.slane %v797_v63, %v2740_v14  ;;  %v846_v19 = vrot.slane %v839_v6, %v2740_v14  ;;  %v1124_v20 = vcombine.high %v1114_v7, %v1122_v8 }
 0x195   : > { %v847_v11 = vcombine.low %v830_v1, %v838_v4  ;;  %v796_v21 = vrot.slane %v789_v10, %v2740_v14  ;;  %v1134_v32 = vshrl.u32 %v1074_v25, 16  ;;  %vm1598_vm2 = vcmp.eq.bf16.partialorder %v591_v44, 0 }
 0x196   : > { %v1127_v17 = vpack.i.b16 %v1123_v12, %v1073_v5  ;;  %v1129_v18 = vshrl.u32 %v1123_v12, 16  ;;  %v1135_v29 = vshrl.u32 %v1124_v20, 16  ;;  %v1133_v30 = vpack.i.b16 %v1124_v20, %v1074_v25 }
 0x197   : > { %v854_v16 = vrot.slane %v847_v11, %v2740_v14  ;;  %v805_v28 = vcombine.low %v796_v21, %v804_v15  ;;  %v806_v39 = vcombine.high %v796_v21, %v804_v15  ;;  %vm1599_vm3 = vcmp.eq.bf16.partialorder %v592_v45, 0 }
 0x198   : > { %v1414_v22 = vsel %vm1409_vm1, %v1127_v17, 0  ;;  %v1130_v23 = vpack.i.b16 %v1129_v18, %v1128_v13  ;;  %v1136_v35 = vpack.i.b16 %v1135_v29, %v1134_v32  ;;  %v1508_v26 = vsel %vm1409_vm1, %v1133_v30, 0 }
 0x199   : > { %v855_v24 = vcombine.low %v846_v19, %v854_v16  ;;  %2411 = vmatpush3.bf16.xpose.msra.mxu0 %v1414_v22  ;;  %v860_v34 = vshrl.u32 %v805_v28, 16  ;;  %v856_v37 = vcombine.high %v846_v19, %v854_v16  ;;  %v866_v42 = vshrl.u32 %v806_v39, 16 }
 0x19a   : > { %v1461_v27 = vsel %vm1409_vm1, %v1130_v23, 0  ;;  %2422 = vmatprep.subr.bf16.mxu0 %v2561_v2  ;;  %v1555_v38 = vsel %vm1409_vm1, %v1136_v35, 0  ;;  %v1600_v46 = vsel %vm1598_vm2, 65537, %v2562_v3  ;;  %v1601_v47 = vsel %vm1599_vm3, 65537, %v2562_v3 }
 0x19b   : > { %2417 = vmatpush3.bf16.xpose.msra.mxu1 %v1461_v27  ;;  %v861_v31 = vshrl.u32 %v855_v24, 16  ;;  %v859_v33 = vpack.i.b16 %v855_v24, %v805_v28  ;;  %v867_v40 = vshrl.u32 %v856_v37, 16  ;;  %v865_v41 = vpack.i.b16 %v856_v37, %v806_v39 }
 0x19c   : > { %2428 = vmatprep.subr.bf16.mxu1 %v2561_v2  ;;  %v1602_v48 = vunpack.c.l.b16 %v1600_v46  ;;  %v1603_v49 = vunpack.c.l.b16 %v1601_v47 }
 0x19d   : > { %v862_v36 = vpack.i.b16 %v861_v31, %v860_v34  ;;  %v868_v43 = vpack.i.b16 %v867_v40, %v866_v42 }
 0x19e   : > { %vm2833_vm4 = vcmp.ne.s32.totalorder %v1602_v48, 0  ;;  %vm2837_vm6 = vcmp.ne.s32.totalorder %v1603_v49, 0 }
 0x1a0   : > { %2413 = vmatmul.mubr.msk.bf16.vlgmr.msra.gmra.mrb[4].mxu0 %vm1409_vm1, %v859_v33 }
 0x1a1   : > { %2423 = vmatpush3.bf16.xpose.msra.mxu0 %v1508_v26  ;;  %2424 = vmatprep.mubr.msk.bf16.mxu0 %vm2563_vm0, %v2561_v2 }
 0x1a2   : > { %2419 = vmatmul.mubr.msk.bf16.vlgmr.msra.gmra.mrb[4].mxu1 %vm1409_vm1, %v862_v36  ;;  %2434 = vmatprep.subr.bf16.mxu0 %v2561_v2 }
 0x1a3   : > { %2429 = vmatpush3.bf16.xpose.msra.mxu1 %v1555_v38  ;;  %2430 = vmatprep.mubr.msk.bf16.mxu1 %vm2563_vm0, %v2561_v2 }
 0x1a4   : > { %2440 = vmatprep.subr.bf16.mxu1 %v2561_v2 }
 0x1a8   : > { %2425 = vmatmul.mubr.msk.bf16.vlgmr.msra.gmra.mrb[8].mxu0 %vm1409_vm1, %v865_v41 }
 0x1a9   : > { %2436 = vmatprep.mubr.msk.bf16.mxu0 %vm2563_vm0, %v2561_v2 }
 0x1aa   : > { %2431 = vmatmul.mubr.msk.bf16.vlgmr.msra.gmra.mrb[8].mxu1 %vm1409_vm1, %v868_v43 }
 0x1ab   : > { %2442 = vmatprep.mubr.msk.bf16.mxu1 %vm2563_vm0, %v2561_v2 }
 0x273   : > { %v1450_v51 = vpop.f32.mrb[4].mxu0 }
 0x274   : > { %v1610_v53 = vsel %vm2833_vm4, -1e+09, %v1450_v51  ;;  %v2414_v54 = vpop.f32.mrb[5].mxu0  ;;  %v1149_v51 = vshrl.u32 %v2725_v56, 16 }
 0x275   : > { %v1453_v55 = vpop.f32.mrb[6].mxu0  ;;  %v1497_v57 = vpop.f32.mrb[4].mxu1  ;;  %v1619_v3 = vsel %vm1618_vm5, %v1610_v53, -inf }
 0x276   : > { %v1611_v58 = vsel %vm2837_vm6, -1e+09, %v1453_v55  ;;  %v1612_v59 = vsel %vm2833_vm4, -1e+09, %v1497_v57  ;;  %v2420_v60 = vpop.f32.mrb[5].mxu1  ;;  %1620 = vmax.xlane.f32.xlu0 %v1619_v3  ;;  %v2415_v61 = vpop.f32.mrb[7].mxu0 }
 0x277   : > { %v1500_v62 = vpop.f32.mrb[6].mxu1  ;;  %v1622_v63 = vsel %vm1618_vm5, %v1611_v58, -inf  ;;  %v1625_v4 = vsel %vm1618_vm5, %v1612_v59, -inf }
 0x278   : > { %v2421_v1 = vpop.f32.mrb[7].mxu1  ;;  %1623 = vmax.xlane.f32.xlu1 %v1622_v63  ;;  %v1613_v5 = vsel %vm2837_vm6, -1e+09, %v1500_v62 }
 0x279   : > { %v1628_v12 = vsel %vm1618_vm5, %v1613_v5, -inf }
 0x27a   : > { %1626 = vmax.xlane.f32.xlu0 %v1625_v4 }
 0x27b   : > { %v1544_v6 = vpop.f32.mrb[8].mxu0 }
 0x27c   : > { %v1614_v7 = vsel %vm2833_vm4, -1e+09, %v1544_v6  ;;  %v2426_v8 = vpop.f32.mrb[9].mxu0 }
 0x27d   : > { %v1547_v10 = vpop.f32.mrb[10].mxu0  ;;  %v1591_v11 = vpop.f32.mrb[8].mxu1  ;;  %v1631_v13 = vsel %vm1618_vm5, %v1614_v7, -inf }
 0x27e   : > { %v1615_v15 = vsel %vm2837_vm6, -1e+09, %v1547_v10  ;;  %v1616_v16 = vsel %vm2833_vm4, -1e+09, %v1591_v11  ;;  %v2432_v17 = vpop.f32.mrb[9].mxu1  ;;  %1629 = vmax.xlane.f32.xlu0 %v1628_v12  ;;  %1632 = vmax.xlane.f32.xlu1 %v1631_v13  ;;  %v2427_v18 = vpop.f32.mrb[11].mxu0 }
 0x27f   : > { %v1594_v19 = vpop.f32.mrb[10].mxu1  ;;  %v1637_v21 = vsel %vm1618_vm5, %v1616_v16, -inf  ;;  %v1634_v22 = vsel %vm1618_vm5, %v1615_v15, -inf }
 0x280   : > { %v2433_v20 = vpop.f32.mrb[11].mxu1  ;;  %v1617_v23 = vsel %vm2837_vm6, -1e+09, %v1594_v19 }
 0x281   : > { %v1640_v24 = vsel %vm1618_vm5, %v1617_v23, -inf }
 0x282   : > { %1638 = vmax.xlane.f32.xlu1 %v1637_v21  ;;  %1635 = vmax.xlane.f32.xlu0 %v1634_v22 }
 0x286   : > { %1641 = vmax.xlane.f32.xlu0 %v1640_v24 }
 0x293   : > { %1139 = vrot.lane.b32.xlu1 %v2725_v56, %s2565_s21 }
 0x297   : > { %1143 = vrot.lane.b32.xlu1 %v2725_v56, %s2564_s20 }
 0x29c   : > { %1141 = vrot.lane.b32.xlu0 %v2725_v56, %s2566_s22 }
 0x303   : > { %v1621_v25 = vpop.xlane.xlu0 %1620 }
 0x304   : > { %v1643_v27 = vsub.f32 %v1610_v53, %v1621_v25 }
 0x305   : > { %v1624_v28 = vpop.xlane.xlu1 %1623 }
 0x306   : > { %v1651_v29 = vmul.f32 1.442695, %v1643_v27  ;;  %v1644_v30 = vsub.f32 %v1611_v58, %v1624_v28 }
 0x307   : > { %v1627_v31 = vpop.xlane.xlu0 %1626 }
 0x308   : > { %2521 = vpow2.f32 %v1651_v29  ;;  %v1653_v32 = vmul.f32 1.442695, %v1644_v30  ;;  %v1645_v33 = vsub.f32 %v1612_v59, %v1627_v31 }
 0x30a   : > { %2523 = vpow2.f32 %v1653_v32  ;;  %v1655_v34 = vmul.f32 1.442695, %v1645_v33 }
 0x30b   : > { %v1630_v35 = vpop.xlane.xlu0 %1629  ;;  %v1633_v26 = vpop.xlane.xlu1 %1632 }
 0x30c   : > { %2525 = vpow2.f32 %v1655_v34  ;;  %v1646_v36 = vsub.f32 %v1613_v5, %v1630_v35  ;;  %v1647_v37 = vsub.f32 %v1614_v7, %v1633_v26 }
 0x30e   : > { %v1657_v38 = vmul.f32 1.442695, %v1646_v36  ;;  %v1659_v39 = vmul.f32 1.442695, %v1647_v37 }
 0x30f   : > { %v1639_v40 = vpop.xlane.xlu1 %1638  ;;  %v1636_v41 = vpop.xlane.xlu0 %1635 }
 0x310   : > { %2527 = vpow2.f32 %v1657_v38  ;;  %v1649_v42 = vsub.f32 %v1616_v16, %v1639_v40  ;;  %v1648_v43 = vsub.f32 %v1615_v15, %v1636_v41 }
 0x311   : > { %2529 = vpow2.f32 %v1659_v39 }
 0x312   : > { %v2871_v44 = vpop.eup %2521  ;;  %v1661_v45 = vmul.f32 1.442695, %v1648_v43  ;;  %v1663_v46 = vmul.f32 1.442695, %v1649_v42 }
 0x313   : > { %v1140_v47 = vpop.permute.xlu1 %1139  ;;  %v1642_v48 = vpop.xlane.xlu0 %1641  ;;  %v1667_v49 = vsel %vm1618_vm5, %v2871_v44, 0.0 }
 0x314   : > { %v2875_v50 = vpop.eup %2523  ;;  %v1147_v52 = vpack.i.b16 %v1140_v47, %v2725_v56  ;;  %v1150_v53 = vshrl.u32 %v1140_v47, 16  ;;  %v1650_v54 = vsub.f32 %v1617_v23, %v1642_v48  ;;  %1668 = vadd.xlane.f32.xlu1 %v1667_v49  ;;  %2531 = vpow2.f32 %v1661_v45 }
 0x315   : > { %v1670_v55 = vsel %vm1618_vm5, %v2875_v50, 0.0  ;;  %2533 = vpow2.f32 %v1663_v46 }
 0x316   : > { %v2881_v57 = vpop.eup %2525  ;;  %v1151_v3 = vpack.i.b16 %v1150_v53, %v1149_v51  ;;  %v1665_v58 = vmul.f32 1.442695, %v1650_v54  ;;  %1671 = vadd.xlane.f32.xlu0 %v1670_v55  ;;  %v1161_v61 = vcombine.high %v1147_v52, %v2735_v0  ;;  %v1168_v5 = vrot.slane %v1147_v52, %v2737_v9 }
 0x317   : > { %v1144_v59 = vpop.permute.xlu1 %1143  ;;  %v1142_v60 = vpop.permute.xlu0 %1141  ;;  %v1673_v1 = vsel %vm1618_vm5, %v2881_v57, 0.0 }
 0x318   : > { %2535 = vpow2.f32 %v1665_v58  ;;  %v1158_v62 = vshrl.u32 %v1144_v59, 16  ;;  %v1155_v56 = vpack.i.b16 %v1144_v59, %v1142_v60  ;;  %v1157_v63 = vshrl.u32 %v1142_v60, 16 }
 0x319   : > { %v1227_v6 = vcombine.high %v1151_v3, %v2735_v0  ;;  %v1175_v13 = vrot.slane %v1161_v61, %v2737_v9  ;;  %v1234_v20 = vrot.slane %v1151_v3, %v2737_v9 }
 0x31a   : > { %v2886_v4 = vpop.eup %2527  ;;  %1674 = vadd.xlane.f32.xlu0 %v1673_v1  ;;  %v1159_v8 = vpack.i.b16 %v1158_v62, %v1157_v63  ;;  %v1176_v10 = vcombine.high %v1155_v56, %v2735_v0  ;;  %v1183_v11 = vrot.slane %v1155_v56, %v2737_v9 }
 0x31b   : > { %v2890_v7 = vpop.eup %2529  ;;  %v1676_v12 = vsel %vm1618_vm5, %v2886_v4, 0.0  ;;  %v1241_v21 = vrot.slane %v1227_v6, %v2737_v9 }
 0x31c   : > { %1677 = vadd.xlane.f32.xlu1 %v1676_v12  ;;  %v1679_v15 = vsel %vm1618_vm5, %v2890_v7, 0.0  ;;  %v1190_v16 = vrot.slane %v1176_v10, %v2737_v9  ;;  %v1191_v17 = vcombine.low %v1168_v5, %v1183_v11  ;;  %v1192_v18 = vcombine.high %v1168_v5, %v1183_v11 }
 0x31d   : > { %v1242_v19 = vcombine.high %v1159_v8, %v2735_v0  ;;  %v1249_v22 = vrot.slane %v1159_v8, %v2737_v9 }
 0x31e   : > { %1680 = vadd.xlane.f32.xlu0 %v1679_v15  ;;  %v2904_v23 = vpop.eup %2531  ;;  %v1199_v24 = vrot.slane %v1191_v17, %v2740_v14  ;;  %v1206_v25 = vrot.slane %v1192_v18, %v2740_v14  ;;  %v1207_v27 = vcombine.low %v1175_v13, %v1190_v16  ;;  %v1208_v28 = vcombine.high %v1175_v13, %v1190_v16 }
 0x31f   : > { %v1256_v29 = vrot.slane %v1242_v19, %v2737_v9  ;;  %v1257_v30 = vcombine.low %v1234_v20, %v1249_v22  ;;  %v1258_v31 = vcombine.high %v1234_v20, %v1249_v22  ;;  %v1682_v0 = vsel %vm1618_vm5, %v2904_v23, 0.0  ;;  %v2911_v32 = vpop.eup %2533 }
 0x320   : > { %v1215_v33 = vrot.slane %v1207_v27, %v2740_v14  ;;  %v1222_v34 = vrot.slane %v1208_v28, %v2740_v14  ;;  %v1293_v35 = vcombine.low %v1199_v24, %v1206_v25  ;;  %v2334_v26 = vcombine.high %v1199_v24, %v1206_v25  ;;  %1683 = vadd.xlane.f32.xlu1 %v1682_v0 }
 0x321   : > { %v1265_v37 = vrot.slane %v1257_v30, %v2740_v14  ;;  %v1272_v38 = vrot.slane %v1258_v31, %v2740_v14  ;;  %v1273_v39 = vcombine.low %v1241_v21, %v1256_v29  ;;  %v1274_v40 = vcombine.high %v1241_v21, %v1256_v29 }
 0x322   : > { %v2915_v36 = vpop.eup %2535  ;;  %v1300_v41 = vrot.slane %v1293_v35, %v2737_v9  ;;  %v1308_v42 = vrot.slane %v2334_v26, %v2737_v9  ;;  %v1309_v43 = vcombine.low %v1215_v33, %v1222_v34  ;;  %v2335_v45 = vcombine.high %v1215_v33, %v1222_v34 }
 0x323   : > { %v1281_v46 = vrot.slane %v1273_v39, %v2740_v14  ;;  %v1288_v47 = vrot.slane %v1274_v40, %v2740_v14  ;;  %v1343_v48 = vcombine.low %v1265_v37, %v1272_v38  ;;  %v2336_v49 = vcombine.high %v1265_v37, %v1272_v38 }
 0x324   : > { %v1316_v51 = vrot.slane %v1309_v43, %v2737_v9  ;;  %v1324_v52 = vrot.slane %v2335_v45, %v2737_v9  ;;  %v1685_v53 = vsel %vm1618_vm5, %v2911_v32, 0.0  ;;  %v1688_v54 = vsel %vm1618_vm5, %v2915_v36, 0.0 }
 0x325   : > { %v1350_v55 = vrot.slane %v1343_v48, %v2737_v9  ;;  %v1358_v3 = vrot.slane %v2336_v49, %v2737_v9  ;;  %v1359_v58 = vcombine.low %v1281_v46, %v1288_v47  ;;  %v2337_v59 = vcombine.high %v1281_v46, %v1288_v47  ;;  %1686 = vadd.xlane.f32.xlu0 %v1685_v53 }
 0x326   : > { %1689 = vadd.xlane.f32.xlu1 %v1688_v54  ;;  %v1325_v60 = vcombine.low %v1300_v41, %v1308_v42  ;;  %v1333_v61 = vcombine.low %v1316_v51, %v1324_v52 }
 0x327   : > { %v1366_v62 = vrot.slane %v1359_v58, %v2737_v9  ;;  %v1374_v56 = vrot.slane %v2337_v59, %v2737_v9  ;;  %v1375_v63 = vcombine.low %v1350_v55, %v1358_v3 }
 0x328   : > { %v1332_v1 = vrot.slane %v1325_v60, %v2740_v14  ;;  %v1340_v5 = vrot.slane %v1333_v61, %v2740_v14 }
 0x329   : > { %v1383_v6 = vcombine.low %v1366_v62, %v1374_v56  ;;  %v1382_v11 = vrot.slane %v1375_v63, %v2740_v14 }
 0x32a   : > { %v1341_v8 = vcombine.low %v1332_v1, %v1340_v5  ;;  %v1342_v10 = vcombine.high %v1332_v1, %v1340_v5 }
 0x32b   : > { %v1390_v12 = vrot.slane %v1383_v6, %v2740_v14 }
 0x32c   : > { %v1397_v16 = vshrl.u32 %v1341_v8, 16  ;;  %v1405_v17 = vshrl.u32 %v1342_v10, 16 }
 0x32d   : > { %v1391_v13 = vcombine.low %v1382_v11, %v1390_v12  ;;  %v1392_v15 = vcombine.high %v1382_v11, %v1390_v12 }
 0x32f   : > { %v1395_v18 = vpack.i.b16 %v1391_v13, %v1341_v8  ;;  %v1398_v19 = vshrl.u32 %v1391_v13, 16  ;;  %v1403_v20 = vpack.i.b16 %v1392_v15, %v1342_v10  ;;  %v1406_v21 = vshrl.u32 %v1392_v15, 16 }
 0x331   : > { %2435 = vmatpush3.bf16.msra.mxu0 %v1395_v18  ;;  %v1399_v22 = vpack.i.b16 %v1398_v19, %v1397_v16  ;;  %v1407_v24 = vpack.i.b16 %v1406_v21, %v1405_v17 }
 0x332   : > { %2446 = vmatprep.subr.bf16.mxu0 %v2561_v2 }
 0x333   : > { %2441 = vmatpush3.bf16.msra.mxu1 %v1399_v22 }
 0x334   : > { %2452 = vmatprep.subr.bf16.mxu1 %v2561_v2 }
 0x3a1   : > { %v1669_v25 = vpop.xlane.xlu1 %1668 }
 0x3a2   : > { %2537 = vrcp.f32 %v1669_v25 }
 0x3a3   : > { %v1672_v27 = vpop.xlane.xlu0 %1671 }
 0x3a4   : > { %2539 = vrcp.f32 %v1672_v27 }
 0x3a7   : > { %v1675_v28 = vpop.xlane.xlu0 %1674 }
 0x3a8   : > { %2541 = vrcp.f32 %v1675_v28 }
 0x3a9   : > { %v1678_v29 = vpop.xlane.xlu1 %1677 }
 0x3aa   : > { %2543 = vrcp.f32 %v1678_v29 }
 0x3ab   : > { %v1681_v30 = vpop.xlane.xlu0 %1680 }
 0x3ac   : > { %v2538_v31 = vpop.eup %2537  ;;  %2545 = vrcp.f32 %v1681_v30 }
 0x3ad   : > { %v1684_v33 = vpop.xlane.xlu1 %1683  ;;  %v1707_v34 = vmul.f32 %v2538_v31, %v2871_v44 }
 0x3ae   : > { %v2540_v0 = vpop.eup %2539  ;;  %2547 = vrcp.f32 %v1684_v33 }
 0x3af   : > { %v1708_v35 = vmul.f32 %v2540_v0, %v2875_v50 }
 0x3b1   : > { %v1715_v26 = vpack.c.bf16 %v1708_v35, %v1707_v34 }
 0x3b2   : > { %v2542_v37 = vpop.eup %2541  ;;  %v1687_v38 = vpop.xlane.xlu0 %1686 }
 0x3b3   : > { %2437 = vmatmul.mubr.msk.bf16.vlgmr.msra.gmra.mrb[12].mxu0 %vm1618_vm5, %v1715_v26  ;;  %2549 = vrcp.f32 %v1687_v38  ;;  %v1690_v40 = vpop.xlane.xlu1 %1689  ;;  %v1709_v41 = vmul.f32 %v2542_v37, %v2881_v57 }
 0x3b4   : > { %v2544_v39 = vpop.eup %2543  ;;  %2447 = vmatpush3.bf16.msra.mxu0 %v1403_v20  ;;  %2448 = vmatprep.mubr.msk.bf16.mxu0 %vm2563_vm0, %v2561_v2  ;;  %2551 = vrcp.f32 %v1690_v40 }
 0x3b5   : > { %v1710_v42 = vmul.f32 %v2544_v39, %v2886_v4 }
 0x3b6   : > { %v2546_v44 = vpop.eup %2545 }
 0x3b7   : > { %v1716_v50 = vpack.c.bf16 %v1710_v42, %v1709_v41  ;;  %v1711_v45 = vmul.f32 %v2546_v44, %v2890_v7 }
 0x3b8   : > { %v2548_v43 = vpop.eup %2547 }
 0x3b9   : > { %2443 = vmatmul.mubr.msk.bf16.vlgmr.msra.gmra.mrb[12].mxu1 %vm1618_vm5, %v1716_v50  ;;  %v1712_v46 = vmul.f32 %v2548_v43, %v2904_v23 }
 0x3ba   : > { %2453 = vmatpush3.bf16.msra.mxu1 %v1407_v24  ;;  %2454 = vmatprep.mubr.msk.bf16.mxu1 %vm2563_vm0, %v2561_v2 }
 0x3bb   : > { %v1717_v47 = vpack.c.bf16 %v1712_v46, %v1711_v45 }
 0x3bd   : > { %v2550_v48 = vpop.eup %2549  ;;  %2449 = vmatmul.mubr.msk.bf16.vlgmr.msra.gmra.mrb[16].mxu0 %vm1618_vm5, %v1717_v47 }
 0x3be   : > { %v2552_v57 = vpop.eup %2551  ;;  %v1713_v4 = vmul.f32 %v2550_v48, %v2911_v32 }
 0x3bf   : > { %v1714_v49 = vmul.f32 %v2552_v57, %v2915_v36 }
 0x3c1   : > { %v1718_v51 = vpack.c.bf16 %v1714_v49, %v1713_v4 }
 0x3c3   : > { %2455 = vmatmul.mubr.msk.bf16.vlgmr.msra.gmra.mrb[16].mxu1 %vm1618_vm5, %v1718_v51 }
 0x486   : > { %v1756_v52 = vpop.f32.mrb[12].mxu0 }
 0x487   : > { %v2438_v7 = vpop.f32.mrb[13].mxu0 }
 0x488   : > { %v1759_v53 = vpop.f32.mrb[14].mxu0 }
 0x489   : > { %v2439_v23 = vpop.f32.mrb[15].mxu0 }
 0x48c   : > { %v1800_v54 = vpop.f32.mrb[12].mxu1 }
 0x48d   : > { %v2444_v55 = vpop.f32.mrb[13].mxu1 }
 0x48e   : > { %v1803_v3 = vpop.f32.mrb[14].mxu1 }
 0x48f   : > { %v2445_v2 = vpop.f32.mrb[15].mxu1 }
 0x490   : > { %v1844_v58 = vpop.f32.mrb[16].mxu0 }
 0x491   : > { %v1895_v59 = vcombine.low %v1756_v52, %v1844_v58  ;;  %v1896_v60 = vcombine.high %v1756_v52, %v1844_v58  ;;  %v2450_v61 = vpop.f32.mrb[17].mxu0 }
 0x492   : > { %v1847_v62 = vpop.f32.mrb[18].mxu0 }
 0x493   : > { %v1963_v56 = vcombine.low %v1759_v53, %v1847_v62  ;;  %v1964_v32 = vcombine.high %v1759_v53, %v1847_v62  ;;  %v2451_v63 = vpop.f32.mrb[19].mxu0  ;;  %v1903_v8 = vrot.slane %v1895_v59, %v2737_v9  ;;  %v1910_v10 = vrot.slane %v1896_v60, %v2737_v9 }
 0x495   : > { %v1971_v22 = vrot.slane %v1963_v56, %v2737_v9  ;;  %v1978_v24 = vrot.slane %v1964_v32, %v2737_v9 }
 0x496   : > { %v1888_v36 = vpop.f32.mrb[16].mxu1 }
 0x497   : > { %v1911_v1 = vcombine.low %v1800_v54, %v1888_v36  ;;  %v1912_v5 = vcombine.high %v1800_v54, %v1888_v36  ;;  %v2456_v6 = vpop.f32.mrb[17].mxu1 }
 0x498   : > { %v1891_v11 = vpop.f32.mrb[18].mxu1 }
 0x499   : > { %v1919_v12 = vrot.slane %v1911_v1, %v2737_v9  ;;  %v1926_v13 = vrot.slane %v1912_v5, %v2737_v9  ;;  %v1979_v15 = vcombine.low %v1803_v3, %v1891_v11  ;;  %v1980_v16 = vcombine.high %v1803_v3, %v1891_v11  ;;  %v2457_v17 = vpop.f32.mrb[19].mxu1 }
 0x49b   : > { %v1927_v18 = vcombine.low %v1903_v8, %v1919_v12  ;;  %v1928_v19 = vcombine.high %v1903_v8, %v1919_v12  ;;  %v1943_v20 = vcombine.low %v1910_v10, %v1926_v13  ;;  %v1944_v21 = vcombine.high %v1910_v10, %v1926_v13 }
 0x49c   : > { %v1987_v25 = vrot.slane %v1979_v15, %v2737_v9  ;;  %v1994_v27 = vrot.slane %v1980_v16, %v2737_v9 }
 0x49d   : > { %v1935_v28 = vrot.slane %v1927_v18, %v2740_v14  ;;  %v1942_v29 = vrot.slane %v1928_v19, %v2740_v14  ;;  %v1951_v30 = vrot.slane %v1943_v20, %v2740_v14  ;;  %v1958_v31 = vrot.slane %v1944_v21, %v2740_v14 }
 0x49e   : > { %v1995_v0 = vcombine.low %v1971_v22, %v1987_v25  ;;  %v1996_v33 = vcombine.high %v1971_v22, %v1987_v25  ;;  %v2011_v34 = vcombine.low %v1978_v24, %v1994_v27  ;;  %v2012_v35 = vcombine.high %v1978_v24, %v1994_v27 }
 0x49f   : > { %v2031_v26 = vcombine.low %v1935_v28, %v1942_v29  ;;  %v2346_v37 = vcombine.high %v1935_v28, %v1942_v29  ;;  %v2047_v38 = vcombine.low %v1951_v30, %v1958_v31  ;;  %v2347_v39 = vcombine.high %v1951_v30, %v1958_v31 }
 0x4a0   : > { %v2003_v40 = vrot.slane %v1995_v0, %v2740_v14  ;;  %v2010_v41 = vrot.slane %v1996_v33, %v2740_v14  ;;  %v2019_v42 = vrot.slane %v2011_v34, %v2740_v14  ;;  %v2026_v44 = vrot.slane %v2012_v35, %v2740_v14 }
 0x4a1   : > { %v2038_v50 = vrot.slane %v2031_v26, %v2737_v9  ;;  %v2046_v43 = vrot.slane %v2346_v37, %v2737_v9  ;;  %v2054_v45 = vrot.slane %v2047_v38, %v2737_v9  ;;  %v2062_v46 = vrot.slane %v2347_v39, %v2737_v9 }
 0x4a2   : > { %v2099_v47 = vcombine.low %v2003_v40, %v2010_v41  ;;  %v2348_v48 = vcombine.high %v2003_v40, %v2010_v41  ;;  %v2115_v57 = vcombine.low %v2019_v42, %v2026_v44  ;;  %v2349_v4 = vcombine.high %v2019_v42, %v2026_v44 }
 0x4a3   : > { %v2064_v49 = vcombine.high %v2038_v50, %v2046_v43  ;;  %v2080_v51 = vcombine.high %v2054_v45, %v2062_v46  ;;  %v2063_v52 = vcombine.low %v2038_v50, %v2046_v43  ;;  %v2079_v7 = vcombine.low %v2054_v45, %v2062_v46 }
 0x4a4   : > { %v2106_v53 = vrot.slane %v2099_v47, %v2737_v9  ;;  %v2114_v23 = vrot.slane %v2348_v48, %v2737_v9  ;;  %v2122_v54 = vrot.slane %v2115_v57, %v2737_v9  ;;  %v2130_v55 = vrot.slane %v2349_v4, %v2737_v9 }
 0x4a5   : > { %v2078_v3 = vrot.slane %v2064_v49, %v2740_v14  ;;  %v2094_v2 = vrot.slane %v2080_v51, %v2740_v14  ;;  %v2071_v58 = vrot.slane %v2063_v52, %v2740_v14  ;;  %v2087_v59 = vrot.slane %v2079_v7, %v2740_v14 }
 0x4a6   : > { %v2132_v60 = vcombine.high %v2106_v53, %v2114_v23  ;;  %v2148_v61 = vcombine.high %v2122_v54, %v2130_v55  ;;  %v2131_v62 = vcombine.low %v2106_v53, %v2114_v23  ;;  %v2147_v56 = vcombine.low %v2122_v54, %v2130_v55 }
 0x4a7   : > { %v2097_v32 = vcombine.low %v2078_v3, %v2094_v2  ;;  %v2096_v63 = vcombine.high %v2071_v58, %v2087_v59  ;;  %v2098_v36 = vcombine.high %v2078_v3, %v2094_v2  ;;  %v2095_v1 = vcombine.low %v2071_v58, %v2087_v59 }
 0x4a8   : > { %v2146_v5 = vrot.slane %v2132_v60, %v2740_v14  ;;  %v2162_v9 = vrot.slane %v2148_v61, %v2740_v14  ;;  %v2139_v6 = vrot.slane %v2131_v62, %v2740_v14  ;;  %v2155_v8 = vrot.slane %v2147_v56, %v2740_v14 }
 0x4aa   : > { %v2165_v10 = vcombine.low %v2146_v5, %v2162_v9  ;;  %v2164_v11 = vcombine.high %v2139_v6, %v2155_v8  ;;  %v2166_v12 = vcombine.high %v2146_v5, %v2162_v9  ;;  %v2163_v13 = vcombine.low %v2139_v6, %v2155_v8 }
 0x4ac   : > { %v2479_v15 = vpack.i.bf16 %v2165_v10, %v2097_v32  ;;  %v2474_v16 = vpack.i.bf16 %v2164_v11, %v2096_v63  ;;  %v2484_v17 = vpack.i.bf16 %v2166_v12, %v2098_v36 }
 0x4ae   : > { %2480 = vrot.lane.b32.xlu1 %v2479_v15, %s2566_s22  ;;  %2475 = vrot.lane.b32.xlu0 %v2474_v16, %s2564_s20 }
 0x4b2   : > { %2485 = vrot.lane.b32.xlu1 %v2484_v17, %s2565_s21 }
 0x520   : > { %v2481_v18 = vpop.permute.xlu1 %2480  ;;  %v2476_v19 = vpop.permute.xlu0 %2475 }
 0x521   : > { %v2478_v20 = vunpack.i.h.bf16 %v2476_v19  ;;  %v2477_v21 = vunpack.i.l.bf16 %v2476_v19  ;;  %v2483_v22 = vunpack.i.h.bf16 %v2481_v18  ;;  %v2482_v14 = vunpack.i.l.bf16 %v2481_v18 }
 0x523   : > { %v2191_v24 = vsel %vm1409_vm1, %v2095_v1, %v2477_v21  ;;  %v2192_v25 = vsel %vm1409_vm1, %v2163_v13, %v2478_v20 }
 0x524   : > { %v2486_v27 = vpop.permute.xlu1 %2485  ;;  %v2194_v30 = vsel %vm2193_vm7, %v2191_v24, %v2482_v14  ;;  %v2195_v31 = vsel %vm2193_vm7, %v2192_v25, %v2483_v22 }
 0x525   : > { %v2488_v28 = vunpack.i.h.bf16 %v2486_v27  ;;  %v2487_v29 = vunpack.i.l.bf16 %v2486_v27 }
 0x527   : > { %v2197_v0 = vsel %vm2196_vm8, %v2194_v30, %v2487_v29  ;;  %v2198_v33 = vsel %vm2196_vm8, %v2195_v31, %v2488_v28 }
 0x528   : > { %v2363_v34 = vpack.c.bf16 %v2198_v33, %v2197_v0 }
 0x52a   : > { %2364 = vst [vmem:[%s318_s8] sm:$0xff] %v2363_v34  }
 0x52b PF: > { %s17_s24 = sadd.s32 1, %s2559_s24  }
 0x52c   : > { %p14_p4 = scmp.ge.s32.totalorder %s17_s24, 4  }
 0x52e   :  { %16 = sbr.rel (!%p14_p4) target bundleno = 1 (0x1), region = 84 }

</bundles_post_ra>
